<compile_context>
chip_gen: v6e
topology: v6e:2x2x1
jax: 0.10.0
libtpu: 0.0.40
codegen_flags: <defaults>
</compile_context>

<pallas_src>
import jax
import jax.numpy as jnp
from jax import lax
from jax.experimental import pallas as pl
from jax.experimental.pallas import tpu as pltpu


def _round_up(x, m):
    return ((x + m - 1) // m) * m


def _pad_axis(x, axis, new_size, value=0):
    pad = new_size - x.shape[axis]
    if pad <= 0:
        return x
    widths = [(0, 0)] * x.ndim
    widths[axis] = (0, pad)
    return jnp.pad(x, widths, constant_values=value)


def _make_kernel(B, U, K, D, Vd, Vp, T, eval_mode):
    H1, H2, H3 = D, D, 2 * D

    def gates_to_hc(gates, c, H):
        i = jax.nn.sigmoid(gates[:, 0 * H:1 * H])
        f = jax.nn.sigmoid(gates[:, 1 * H:2 * H])
        g = jnp.tanh(gates[:, 2 * H:3 * H])
        o = jax.nn.sigmoid(gates[:, 3 * H:4 * H])
        c_new = f * c + i * g
        h_new = o * jnp.tanh(c_new)
        return h_new, c_new

    def kernel(y_ref, cond_ref, gum_ref,
               keys_ref, values_ref, mask_ref,
               embw1_ref, wih1c_ref, whh1_ref, b1_ref, h01_ref, c01_ref,
               wih2_ref, whh2_ref, b2_ref, h02_ref, c02_ref,
               wih3_ref, whh3_ref, b3_ref, h03_ref, c03_ref,
               wq1_ref, bq1_ref, wq2_ref, bq2_ref,
               wc1h_ref, wc1c_ref, bc1_ref,
               embT_ref, bc2_ref,
               logits_ref,
               h1_s, c1_s, h2_s, c2_s, h3_s, c3_s, ctx_s, pred_s):

        iota_v = lax.broadcasted_iota(jnp.int32, (B, Vp), 1)

        # ---- loop-invariant values hoisted out of the recurrence ----
        # (JAX does not CSE broadcast_in_dim; per-iter broadcasts would repeat T times)
        b1 = jnp.broadcast_to(b1_ref[...], (B, 4 * H1))
        b2 = jnp.broadcast_to(b2_ref[...], (B, 4 * H2))
        b3 = jnp.broadcast_to(b3_ref[...], (B, 4 * H3))
        bq1 = jnp.broadcast_to(bq1_ref[...], (B, bq1_ref.shape[1]))
        bq2 = jnp.broadcast_to(bq2_ref[...], (B, bq2_ref.shape[1]))
        bc1 = jnp.broadcast_to(bc1_ref[...], (B, bc1_ref.shape[1]))
        bc2 = jnp.broadcast_to(bc2_ref[...], (B, Vp))
        mask = mask_ref[...]                                           # (B, U)

        def mlp_query(h):
            z = jnp.maximum(
                jnp.dot(h, wq1_ref[...], preferred_element_type=jnp.float32) + bq1,
                0.0)
            return jnp.dot(z, wq2_ref[...], preferred_element_type=jnp.float32) + bq2

        def attention(query):                          # (B, K) -> (B, Vd)
            # TODO(synk): at production U/K/Vd sizes these reductions should be
            # routed to the MXU as a batched dot_general; for single-query decode
            # at these shapes the VPU/XLU path is cheap and lowers robustly.
            keys = keys_ref[...]                       # (B, U, K)
            vals = values_ref[...]                     # (B, U, Vd)
            att = jnp.sum(keys * query[:, None, :], axis=2)            # (B, U)
            masked = att * mask
            m = jnp.max(masked, axis=1, keepdims=True)
            e = jnp.exp(masked - m)
            pre_alpha = e * pl.reciprocal(jnp.sum(e, axis=1, keepdims=True), approx=True)
            mp = pre_alpha * mask
            denom = jnp.maximum(jnp.sum(jnp.abs(mp), axis=1, keepdims=True), 1e-12)
            alpha = mp * pl.reciprocal(denom, approx=True)             # L1 normalize
            return jnp.sum(alpha[:, :, None] * vals, axis=1)           # (B, Vd)

        # ---------------- initial state (before step 0) ----------------
        h1_s[...] = jnp.broadcast_to(h01_ref[...], (B, H1))
        c1_s[...] = jnp.broadcast_to(c01_ref[...], (B, H1))
        h2_s[...] = jnp.broadcast_to(h02_ref[...], (B, H2))
        c2_s[...] = jnp.broadcast_to(c02_ref[...], (B, H2))
        h3_s[...] = jnp.broadcast_to(h03_ref[...], (B, H3))
        c3_s[...] = jnp.broadcast_to(c03_ref[...], (B, H3))
        ctx_s[...] = attention(mlp_query(h3_s[...]))
        pred_s[...] = jnp.zeros((B, 1), jnp.int32)     # pred_char = 0

        # ---------------- full decode recurrence in one invocation ----------------
        @pl.loop(0, T)
        def _step(t):
            y = y_ref[t]                               # (B, 1) int32 ground truth
            cond = cond_ref[t]                         # (B, 1) int32 teacher-forcing flag
            inp = jnp.where(cond > 0, y, pred_s[...])  # getInputChar on integer indices
            input_oh = (iota_v == inp).astype(jnp.float32)             # (B, Vp)

            ctx = ctx_s[...]
            # LSTM cell 1: embedding matmul folded into emb @ Wih1_top; no runtime concat
            gates1 = (jnp.dot(input_oh, embw1_ref[...], preferred_element_type=jnp.float32)
                      + jnp.dot(ctx, wih1c_ref[...], preferred_element_type=jnp.float32)
                      + jnp.dot(h1_s[...], whh1_ref[...], preferred_element_type=jnp.float32)
                      + b1)
            h1, c1 = gates_to_hc(gates1, c1_s[...], H1)
            h1_s[...] = h1
            c1_s[...] = c1

            gates2 = (jnp.dot(h1, wih2_ref[...], preferred_element_type=jnp.float32)
                      + jnp.dot(h2_s[...], whh2_ref[...], preferred_element_type=jnp.float32)
                      + b2)
            h2, c2 = gates_to_hc(gates2, c2_s[...], H2)
            h2_s[...] = h2
            c2_s[...] = c2

            gates3 = (jnp.dot(h2, wih3_ref[...], preferred_element_type=jnp.float32)
                      + jnp.dot(h3_s[...], whh3_ref[...], preferred_element_type=jnp.float32)
                      + b3)
            h3, c3 = gates_to_hc(gates3, c3_s[...], H3)
            h3_s[...] = h3
            c3_s[...] = c3

            new_ctx = attention(mlp_query(h3))         # (B, Vd)
            ctx_s[...] = new_ctx

            # char projection (split wc1 -> no concat), tied output weight embT
            hid = (jnp.dot(h3, wc1h_ref[...], preferred_element_type=jnp.float32)
                   + jnp.dot(new_ctx, wc1c_ref[...], preferred_element_type=jnp.float32)
                   + bc1)
            hid = jnp.where(hid >= 0.0, hid, 0.01 * hid)               # LeakyReLU(0.01)
            logit = (jnp.dot(hid, embT_ref[...], preferred_element_type=jnp.float32)
                     + bc2)
            logits_ref[t] = logit                      # lane-dense (B, Vp) store

            if eval_mode:
                sample_logit = logit                   # greedy feedback
            else:
                sample_logit = logit + gum_ref[t]      # gumbel_argmax feedback
            idx = jnp.argmax(sample_logit, axis=1).astype(jnp.int32)
            pred_s[...] = idx[:, None]

    return kernel


def decoder_forward(params, input_y, keys, values, feature_lengths,
                    max_label_length, gumbel, cond, eval_mode=False):
    B, U, K = keys.shape
    Vd = values.shape[2]
    V, D = params['emb'].shape
    T = int(max_label_length)

    Bp = _round_up(max(B, 8), 8)        # fill f32 sublanes
    Vp = _round_up(max(V, 128), 128)    # lane-dense logits / one-hots
    NEG = -1e30
    p = params

    # ---- batch padding (stripped after the call) ----
    keys_p = _pad_axis(keys.astype(jnp.float32), 0, Bp)
    values_p = _pad_axis(values.astype(jnp.float32), 0, Bp)
    flen_p = _pad_axis(feature_lengths.astype(jnp.int32), 0, Bp, value=U)
    mask = (jnp.arange(U)[None, :] < flen_p[:, None]).astype(jnp.float32)          # (Bp, U)

    y_t = _pad_axis(jnp.transpose(input_y).astype(jnp.int32), 1, Bp)[:, :, None]    # (T, Bp, 1)
    cond_t = _pad_axis(cond.astype(jnp.int32), 1, Bp)[:, :, None]                   # (T, Bp, 1)
    gum_p = _pad_axis(_pad_axis(gumbel.astype(jnp.float32), 1, Bp), 2, Vp)           # (T, Bp, Vp)

    # ---- vocab padding + weight splits (no runtime concats inside the kernel) ----
    emb_p = _pad_axis(p['emb'], 0, Vp)                     # (Vp, D)  zero rows for padding
    embT_p = _pad_axis(jnp.transpose(p['emb']), 1, Vp)     # (D, Vp)  tied output weight
    bc2_p = _pad_axis(p['bc2'], 1, Vp, value=NEG)          # padded vocab lanes never win argmax

    emb_w1 = jnp.dot(emb_p, p['wih1'][:D])                 # (Vp, 4D): embedding folded into cell-1 Wih
    wih1c = p['wih1'][D:]                                  # (Vd, 4D)
    wc1h = p['wc1'][:2 * D]                                # (2D, D)
    wc1c = p['wc1'][2 * D:]                                # (Vd, D)

    kernel = _make_kernel(Bp, U, K, D, Vd, Vp, T, eval_mode)

    def full_spec(shape):
        zeros = (0,) * len(shape)

        def imap(t):
            return zeros
        return pl.BlockSpec(tuple(shape), imap)

    operands = [
        y_t, cond_t, gum_p,
        keys_p, values_p, mask,
        emb_w1, wih1c, p['whh1'], p['b1'], p['h01'], p['c01'],
        p['wih2'], p['whh2'], p['b2'], p['h02'], p['c02'],
        p['wih3'], p['whh3'], p['b3'], p['h03'], p['c03'],
        p['wq1'], p['bq1'], p['wq2'], p['bq2'],
        wc1h, wc1c, p['bc1'],
        embT_p, bc2_p,
    ]
    in_specs = [full_spec(x.shape) for x in operands]
    out_spec = pl.BlockSpec((T, Bp, Vp), lambda t: (0, 0, 0))

    scratch = [
        pltpu.VMEM((Bp, D), jnp.float32),       # h1
        pltpu.VMEM((Bp, D), jnp.float32),       # c1
        pltpu.VMEM((Bp, D), jnp.float32),       # h2
        pltpu.VMEM((Bp, D), jnp.float32),       # c2
        pltpu.VMEM((Bp, 2 * D), jnp.float32),   # h3
        pltpu.VMEM((Bp, 2 * D), jnp.float32),   # c3
        pltpu.VMEM((Bp, Vd), jnp.float32),      # context
        pltpu.VMEM((Bp, 1), jnp.int32),         # pred_char index
    ]

    logits_tbv = pl.pallas_call(
        kernel,
        out_shape=jax.ShapeDtypeStruct((T, Bp, Vp), jnp.float32),
        grid_spec=pltpu.PrefetchScalarGridSpec(
            num_scalar_prefetch=0,
            grid=(1,),                               # whole recurrence in one grid step
            in_specs=in_specs,
            out_specs=out_spec,
            scratch_shapes=scratch),
        compiler_params=pltpu.CompilerParams(
            dimension_semantics=("arbitrary",),
            vmem_limit_bytes=32 * 1024 * 1024),
    )(*operands)

    logits_real = logits_tbv[:, :B, :V]                                   # (T, B, V)
    logits = jnp.transpose(logits_real, (1, 0, 2))                        # (B, T, V)
    greedys = jnp.argmax(logits, axis=2).astype(jnp.int32)                # (B, T)
    generateds = jnp.transpose(
        jnp.argmax(logits_real + gumbel, axis=2)).astype(jnp.int32)       # (B, T)
    return logits, generateds, greedys


def init_params(key, vocab_size, decoder_dim, encoder_dim, key_dim, linear_dim,
                init_bias=None):
    D, V, K, L = decoder_dim, vocab_size, key_dim, linear_dim
    Vd = 2 * encoder_dim
    ks = jax.random.split(key, 16)

    def u(k, shape, scale):
        return jax.random.uniform(k, shape, jnp.float32, -scale, scale)

    emb = jax.random.normal(ks[0], (V, D), jnp.float32) * 0.1
    s1 = 1.0 / (D ** 0.5)
    s3 = 1.0 / ((2 * D) ** 0.5)
    return dict(
        emb=emb,                                                     # tied output weight (emb.T)
        wih1=u(ks[1], (D + Vd, 4 * D), s1), whh1=u(ks[2], (D, 4 * D), s1),
        b1=u(ks[3], (1, 4 * D), s1),                                 # b_ih + b_hh combined
        h01=jnp.zeros((1, D), jnp.float32), c01=jnp.zeros((1, D), jnp.float32),
        wih2=u(ks[4], (D, 4 * D), s1), whh2=u(ks[5], (D, 4 * D), s1),
        b2=u(ks[6], (1, 4 * D), s1),
        h02=jnp.zeros((1, D), jnp.float32), c02=jnp.zeros((1, D), jnp.float32),
        wih3=u(ks[7], (D, 8 * D), s3), whh3=u(ks[8], (2 * D, 8 * D), s3),
        b3=u(ks[9], (1, 8 * D), s3),
        h03=jnp.zeros((1, 2 * D), jnp.float32), c03=jnp.zeros((1, 2 * D), jnp.float32),
        wq1=u(ks[10], (2 * D, L), 1.0 / (2 * D) ** 0.5),
        bq1=u(ks[11], (1, L), 1.0 / (2 * D) ** 0.5),
        wq2=u(ks[12], (L, K), 1.0 / L ** 0.5),
        bq2=u(ks[13], (1, K), 1.0 / L ** 0.5),
        wc1=u(ks[14], (2 * D + Vd, D), 1.0 / (2 * D + Vd) ** 0.5),
        bc1=u(ks[15], (1, D), 1.0 / (2 * D + Vd) ** 0.5),
        bc2=(init_bias if init_bias is not None else jnp.zeros((1, V), jnp.float32)),
    )


if __name__ == "__main__":
    B, U, T = 2, 16, 8      # batch, max_feature_length, max_label_length
    V = 16                  # vocab_size
    D = 32                  # args.decoder_dim
    E = 16                  # args.encoder_dim -> value_dim = 32
    Kdim = 32               # args.key_dim
    L = 32                  # args.linear_dim
    net_out_prob = 0.3      # args.net_out_prob

    root = jax.random.PRNGKey(0)
    k_par, k_keys, k_vals, k_y, k_cond, k_gum = jax.random.split(root, 6)

    params = init_params(k_par, V, D, E, Kdim, L)
    keys = jax.random.normal(k_keys, (B, U, Kdim), jnp.float32)
    values = jax.random.normal(k_vals, (B, U, 2 * E), jnp.float32)
    feature_lengths = jnp.array([16, 11], dtype=jnp.int32)
    input_y = jax.random.randint(k_y, (B, T), 0, V, jnp.int32)

    # TODO(synk): torch.bernoulli / gumbel noise are drawn host-side (jax.random) and
    # fed to the kernel, since torch RNG semantics cannot be reproduced on-device.
    cond = jax.random.bernoulli(k_cond, 1.0 - net_out_prob, (T, B)).astype(jnp.int32)
    eps = 1e-10
    uni = jax.random.uniform(k_gum, (T, B, V), jnp.float32)
    gumbel = -jnp.log(eps - jnp.log(uni + eps))

    logits, generateds, greedys = decoder_forward(
        params, input_y, keys, values, feature_lengths, T, gumbel, cond,
        eval_mode=False)
    jax.block_until_ready((logits, generateds, greedys))

    assert logits.shape == (B, T, V)
    assert generateds.shape == (B, T)
    assert greedys.shape == (B, T)
    assert bool(jnp.all(jnp.isfinite(logits)))
    print("KERNEL_OK")
</pallas_src>

<mosaic_0001>
module attributes {stable_mosaic.version = 11 : i64} {
  func.func @kernel(%arg0: i32, %arg1: memref<8x8x1xi32, #tpu.memory_space<vmem>>, %arg2: memref<8x8x1xi32, #tpu.memory_space<vmem>>, %arg3: memref<8x8x128xf32, #tpu.memory_space<vmem>>, %arg4: memref<8x16x32xf32, #tpu.memory_space<vmem>>, %arg5: memref<8x16x32xf32, #tpu.memory_space<vmem>>, %arg6: memref<8x16xf32, #tpu.memory_space<vmem>>, %arg7: memref<128x128xf32, #tpu.memory_space<vmem>>, %arg8: memref<32x128xf32, #tpu.memory_space<vmem>>, %arg9: memref<32x128xf32, #tpu.memory_space<vmem>>, %arg10: memref<1x128xf32, #tpu.memory_space<vmem>>, %arg11: memref<1x32xf32, #tpu.memory_space<vmem>>, %arg12: memref<1x32xf32, #tpu.memory_space<vmem>>, %arg13: memref<32x128xf32, #tpu.memory_space<vmem>>, %arg14: memref<32x128xf32, #tpu.memory_space<vmem>>, %arg15: memref<1x128xf32, #tpu.memory_space<vmem>>, %arg16: memref<1x32xf32, #tpu.memory_space<vmem>>, %arg17: memref<1x32xf32, #tpu.memory_space<vmem>>, %arg18: memref<32x256xf32, #tpu.memory_space<vmem>>, %arg19: memref<64x256xf32, #tpu.memory_space<vmem>>, %arg20: memref<1x256xf32, #tpu.memory_space<vmem>>, %arg21: memref<1x64xf32, #tpu.memory_space<vmem>>, %arg22: memref<1x64xf32, #tpu.memory_space<vmem>>, %arg23: memref<64x32xf32, #tpu.memory_space<vmem>>, %arg24: memref<1x32xf32, #tpu.memory_space<vmem>>, %arg25: memref<32x32xf32, #tpu.memory_space<vmem>>, %arg26: memref<1x32xf32, #tpu.memory_space<vmem>>, %arg27: memref<64x32xf32, #tpu.memory_space<vmem>>, %arg28: memref<32x32xf32, #tpu.memory_space<vmem>>, %arg29: memref<1x32xf32, #tpu.memory_space<vmem>>, %arg30: memref<32x128xf32, #tpu.memory_space<vmem>>, %arg31: memref<1x128xf32, #tpu.memory_space<vmem>>, %arg32: memref<8x8x128xf32, #tpu.memory_space<vmem>>, %arg33: memref<8x32xf32, #tpu.memory_space<vmem>>, %arg34: memref<8x32xf32, #tpu.memory_space<vmem>>, %arg35: memref<8x32xf32, #tpu.memory_space<vmem>>, %arg36: memref<8x32xf32, #tpu.memory_space<vmem>>, %arg37: memref<8x64xf32, #tpu.memory_space<vmem>>, %arg38: memref<8x64xf32, #tpu.memory_space<vmem>>, %arg39: memref<8x32xf32, #tpu.memory_space<vmem>>, %arg40: memref<8x1xi32, #tpu.memory_space<vmem>>) attributes {dimension_semantics = [#tpu.dimension_semantics<arbitrary>], iteration_bounds = array<i64: 1>, scalar_prefetch = 0 : i64, scratch_operands = 8 : i64, tpu.core_type = #tpu.core_type<tc>, window_params = [{pipeline_mode = #tpu.pipeline_mode<synchronous>, transform_indices = @transform_0, window_bounds = array<i64: 8, 8, 1>}, {pipeline_mode = #tpu.pipeline_mode<synchronous>, transform_indices = @transform_1, window_bounds = array<i64: 8, 8, 1>}, {pipeline_mode = #tpu.pipeline_mode<synchronous>, transform_indices = @transform_2, window_bounds = array<i64: 8, 8, 128>}, {pipeline_mode = #tpu.pipeline_mode<synchronous>, transform_indices = @transform_3, window_bounds = array<i64: 8, 16, 32>}, {pipeline_mode = #tpu.pipeline_mode<synchronous>, transform_indices = @transform_4, window_bounds = array<i64: 8, 16, 32>}, {pipeline_mode = #tpu.pipeline_mode<synchronous>, transform_indices = @transform_5, window_bounds = array<i64: 8, 16>}, {pipeline_mode = #tpu.pipeline_mode<synchronous>, transform_indices = @transform_6, window_bounds = array<i64: 128, 128>}, {pipeline_mode = #tpu.pipeline_mode<synchronous>, transform_indices = @transform_7, window_bounds = array<i64: 32, 128>}, {pipeline_mode = #tpu.pipeline_mode<synchronous>, transform_indices = @transform_8, window_bounds = array<i64: 32, 128>}, {pipeline_mode = #tpu.pipeline_mode<synchronous>, transform_indices = @transform_9, window_bounds = array<i64: 1, 128>}, {pipeline_mode = #tpu.pipeline_mode<synchronous>, transform_indices = @transform_10, window_bounds = array<i64: 1, 32>}, {pipeline_mode = #tpu.pipeline_mode<synchronous>, transform_indices = @transform_11, window_bounds = array<i64: 1, 32>}, {pipeline_mode = #tpu.pipeline_mode<synchronous>, transform_indices = @transform_12, window_bounds = array<i64: 32, 128>}, {pipeline_mode = #tpu.pipeline_mode<synchronous>, transform_indices = @transform_13, window_bounds = array<i64: 32, 128>}, {pipeline_mode = #tpu.pipeline_mode<synchronous>, transform_indices = @transform_14, window_bounds = array<i64: 1, 128>}, {pipeline_mode = #tpu.pipeline_mode<synchronous>, transform_indices = @transform_15, window_bounds = array<i64: 1, 32>}, {pipeline_mode = #tpu.pipeline_mode<synchronous>, transform_indices = @transform_16, window_bounds = array<i64: 1, 32>}, {pipeline_mode = #tpu.pipeline_mode<synchronous>, transform_indices = @transform_17, window_bounds = array<i64: 32, 256>}, {pipeline_mode = #tpu.pipeline_mode<synchronous>, transform_indices = @transform_18, window_bounds = array<i64: 64, 256>}, {pipeline_mode = #tpu.pipeline_mode<synchronous>, transform_indices = @transform_19, window_bounds = array<i64: 1, 256>}, {pipeline_mode = #tpu.pipeline_mode<synchronous>, transform_indices = @transform_20, window_bounds = array<i64: 1, 64>}, {pipeline_mode = #tpu.pipeline_mode<synchronous>, transform_indices = @transform_21, window_bounds = array<i64: 1, 64>}, {pipeline_mode = #tpu.pipeline_mode<synchronous>, transform_indices = @transform_22, window_bounds = array<i64: 64, 32>}, {pipeline_mode = #tpu.pipeline_mode<synchronous>, transform_indices = @transform_23, window_bounds = array<i64: 1, 32>}, {pipeline_mode = #tpu.pipeline_mode<synchronous>, transform_indices = @transform_24, window_bounds = array<i64: 32, 32>}, {pipeline_mode = #tpu.pipeline_mode<synchronous>, transform_indices = @transform_25, window_bounds = array<i64: 1, 32>}, {pipeline_mode = #tpu.pipeline_mode<synchronous>, transform_indices = @transform_26, window_bounds = array<i64: 64, 32>}, {pipeline_mode = #tpu.pipeline_mode<synchronous>, transform_indices = @transform_27, window_bounds = array<i64: 32, 32>}, {pipeline_mode = #tpu.pipeline_mode<synchronous>, transform_indices = @transform_28, window_bounds = array<i64: 1, 32>}, {pipeline_mode = #tpu.pipeline_mode<synchronous>, transform_indices = @transform_29, window_bounds = array<i64: 32, 128>}, {pipeline_mode = #tpu.pipeline_mode<synchronous>, transform_indices = @transform_30, window_bounds = array<i64: 1, 128>}, {pipeline_mode = #tpu.pipeline_mode<synchronous>, transform_indices = @transform_31, window_bounds = array<i64: 8, 8, 128>}]} {
    %0 = tpu.iota {dimensions = array<i32: 1>} : vector<8x128xi32>
    %c0 = arith.constant 0 : index
    %c0_0 = arith.constant 0 : index
    %1 = vector.load %arg10[%c0, %c0_0] : memref<1x128xf32, #tpu.memory_space<vmem>>, vector<1x128xf32>
    %2 = vector.shape_cast %1 : vector<1x128xf32> to vector<1x128xf32>
    %3 = vector.broadcast %2 : vector<1x128xf32> to vector<8x128xf32>
    %c0_1 = arith.constant 0 : index
    %c0_2 = arith.constant 0 : index
    %4 = vector.load %arg15[%c0_1, %c0_2] : memref<1x128xf32, #tpu.memory_space<vmem>>, vector<1x128xf32>
    %5 = vector.shape_cast %4 : vector<1x128xf32> to vector<1x128xf32>
    %6 = vector.broadcast %5 : vector<1x128xf32> to vector<8x128xf32>
    %c0_3 = arith.constant 0 : index
    %c0_4 = arith.constant 0 : index
    %7 = vector.load %arg20[%c0_3, %c0_4] : memref<1x256xf32, #tpu.memory_space<vmem>>, vector<1x256xf32>
    %8 = vector.shape_cast %7 : vector<1x256xf32> to vector<1x256xf32>
    %9 = vector.broadcast %8 : vector<1x256xf32> to vector<8x256xf32>
    %c0_5 = arith.constant 0 : index
    %c0_6 = arith.constant 0 : index
    %10 = vector.load %arg24[%c0_5, %c0_6] : memref<1x32xf32, #tpu.memory_space<vmem>>, vector<1x32xf32>
    %11 = vector.shape_cast %10 : vector<1x32xf32> to vector<1x32xf32>
    %12 = vector.broadcast %11 : vector<1x32xf32> to vector<8x32xf32>
    %c0_7 = arith.constant 0 : index
    %c0_8 = arith.constant 0 : index
    %13 = vector.load %arg26[%c0_7, %c0_8] : memref<1x32xf32, #tpu.memory_space<vmem>>, vector<1x32xf32>
    %14 = vector.shape_cast %13 : vector<1x32xf32> to vector<1x32xf32>
    %15 = vector.broadcast %14 : vector<1x32xf32> to vector<8x32xf32>
    %c0_9 = arith.constant 0 : index
    %c0_10 = arith.constant 0 : index
    %16 = vector.load %arg29[%c0_9, %c0_10] : memref<1x32xf32, #tpu.memory_space<vmem>>, vector<1x32xf32>
    %17 = vector.shape_cast %16 : vector<1x32xf32> to vector<1x32xf32>
    %18 = vector.broadcast %17 : vector<1x32xf32> to vector<8x32xf32>
    %c0_11 = arith.constant 0 : index
    %c0_12 = arith.constant 0 : index
    %19 = vector.load %arg31[%c0_11, %c0_12] : memref<1x128xf32, #tpu.memory_space<vmem>>, vector<1x128xf32>
    %20 = vector.shape_cast %19 : vector<1x128xf32> to vector<1x128xf32>
    %21 = vector.broadcast %20 : vector<1x128xf32> to vector<8x128xf32>
    %c0_13 = arith.constant 0 : index
    %c0_14 = arith.constant 0 : index
    %22 = vector.load %arg6[%c0_13, %c0_14] : memref<8x16xf32, #tpu.memory_space<vmem>>, vector<8x16xf32>
    %c0_15 = arith.constant 0 : index
    %c0_16 = arith.constant 0 : index
    %23 = vector.load %arg11[%c0_15, %c0_16] : memref<1x32xf32, #tpu.memory_space<vmem>>, vector<1x32xf32>
    %24 = vector.shape_cast %23 : vector<1x32xf32> to vector<1x32xf32>
    %25 = vector.broadcast %24 : vector<1x32xf32> to vector<8x32xf32>
    %c0_17 = arith.constant 0 : index
    %c0_18 = arith.constant 0 : index
    %26 = vector.load %arg33[%c0_17, %c0_18] : memref<8x32xf32, #tpu.memory_space<vmem>>, vector<8x32xf32>
    tpu.vector_store %arg33[%c0_17, %c0_18], %25 {strides = array<i32>} : memref<8x32xf32, #tpu.memory_space<vmem>>, vector<8x32xf32>,
    %c0_19 = arith.constant 0 : index
    %c0_20 = arith.constant 0 : index
    %27 = vector.load %arg12[%c0_19, %c0_20] : memref<1x32xf32, #tpu.memory_space<vmem>>, vector<1x32xf32>
    %28 = vector.shape_cast %27 : vector<1x32xf32> to vector<1x32xf32>
    %29 = vector.broadcast %28 : vector<1x32xf32> to vector<8x32xf32>
    %c0_21 = arith.constant 0 : index
    %c0_22 = arith.constant 0 : index
    %30 = vector.load %arg34[%c0_21, %c0_22] : memref<8x32xf32, #tpu.memory_space<vmem>>, vector<8x32xf32>
    tpu.vector_store %arg34[%c0_21, %c0_22], %29 {strides = array<i32>} : memref<8x32xf32, #tpu.memory_space<vmem>>, vector<8x32xf32>,
    %c0_23 = arith.constant 0 : index
    %c0_24 = arith.constant 0 : index
    %31 = vector.load %arg16[%c0_23, %c0_24] : memref<1x32xf32, #tpu.memory_space<vmem>>, vector<1x32xf32>
    %32 = vector.shape_cast %31 : vector<1x32xf32> to vector<1x32xf32>
    %33 = vector.broadcast %32 : vector<1x32xf32> to vector<8x32xf32>
    %c0_25 = arith.constant 0 : index
    %c0_26 = arith.constant 0 : index
    %34 = vector.load %arg35[%c0_25, %c0_26] : memref<8x32xf32, #tpu.memory_space<vmem>>, vector<8x32xf32>
    tpu.vector_store %arg35[%c0_25, %c0_26], %33 {strides = array<i32>} : memref<8x32xf32, #tpu.memory_space<vmem>>, vector<8x32xf32>,
    %c0_27 = arith.constant 0 : index
    %c0_28 = arith.constant 0 : index
    %35 = vector.load %arg17[%c0_27, %c0_28] : memref<1x32xf32, #tpu.memory_space<vmem>>, vector<1x32xf32>
    %36 = vector.shape_cast %35 : vector<1x32xf32> to vector<1x32xf32>
    %37 = vector.broadcast %36 : vector<1x32xf32> to vector<8x32xf32>
    %c0_29 = arith.constant 0 : index
    %c0_30 = arith.constant 0 : index
    %38 = vector.load %arg36[%c0_29, %c0_30] : memref<8x32xf32, #tpu.memory_space<vmem>>, vector<8x32xf32>
    tpu.vector_store %arg36[%c0_29, %c0_30], %37 {strides = array<i32>} : memref<8x32xf32, #tpu.memory_space<vmem>>, vector<8x32xf32>,
    %c0_31 = arith.constant 0 : index
    %c0_32 = arith.constant 0 : index
    %39 = vector.load %arg21[%c0_31, %c0_32] : memref<1x64xf32, #tpu.memory_space<vmem>>, vector<1x64xf32>
    %40 = vector.shape_cast %39 : vector<1x64xf32> to vector<1x64xf32>
    %41 = vector.broadcast %40 : vector<1x64xf32> to vector<8x64xf32>
    %c0_33 = arith.constant 0 : index
    %c0_34 = arith.constant 0 : index
    %42 = vector.load %arg37[%c0_33, %c0_34] : memref<8x64xf32, #tpu.memory_space<vmem>>, vector<8x64xf32>
    tpu.vector_store %arg37[%c0_33, %c0_34], %41 {strides = array<i32>} : memref<8x64xf32, #tpu.memory_space<vmem>>, vector<8x64xf32>,
    %c0_35 = arith.constant 0 : index
    %c0_36 = arith.constant 0 : index
    %43 = vector.load %arg22[%c0_35, %c0_36] : memref<1x64xf32, #tpu.memory_space<vmem>>, vector<1x64xf32>
    %44 = vector.shape_cast %43 : vector<1x64xf32> to vector<1x64xf32>
    %45 = vector.broadcast %44 : vector<1x64xf32> to vector<8x64xf32>
    %c0_37 = arith.constant 0 : index
    %c0_38 = arith.constant 0 : index
    %46 = vector.load %arg38[%c0_37, %c0_38] : memref<8x64xf32, #tpu.memory_space<vmem>>, vector<8x64xf32>
    tpu.vector_store %arg38[%c0_37, %c0_38], %45 {strides = array<i32>} : memref<8x64xf32, #tpu.memory_space<vmem>>, vector<8x64xf32>,
    %c0_39 = arith.constant 0 : index
    %c0_40 = arith.constant 0 : index
    %47 = vector.load %arg37[%c0_39, %c0_40] : memref<8x64xf32, #tpu.memory_space<vmem>>, vector<8x64xf32>
    %c0_41 = arith.constant 0 : index
    %c0_42 = arith.constant 0 : index
    %48 = vector.load %arg23[%c0_41, %c0_42] : memref<64x32xf32, #tpu.memory_space<vmem>>, vector<64x32xf32>
    %cst = arith.constant dense<0.000000e+00> : vector<8x32xf32>
    %49 = tpu.matmul %47, %48, %cst {dimension_numbers = #tpu.dot_dimension_numbers<[1], [0], [0], [1], [0, 0, 1, 1], [], []>} : vector<8x64xf32>, vector<64x32xf32>, vector<8x32xf32> -> vector<8x32xf32>
    %50 = arith.addf %49, %12 : vector<8x32xf32>
    %cst_43 = arith.constant 0.000000e+00 : f32
    %51 = vector.broadcast %cst_43 : f32 to vector<8x32xf32>
    %52 = arith.maximumf %50, %51 : vector<8x32xf32>
    %c0_44 = arith.constant 0 : index
    %c0_45 = arith.constant 0 : index
    %53 = vector.load %arg25[%c0_44, %c0_45] : memref<32x32xf32, #tpu.memory_space<vmem>>, vector<32x32xf32>
    %cst_46 = arith.constant dense<0.000000e+00> : vector<8x32xf32>
    %54 = tpu.matmul %52, %53, %cst_46 {dimension_numbers = #tpu.dot_dimension_numbers<[1], [0], [0], [1], [0, 0, 1, 1], [], []>} : vector<8x32xf32>, vector<32x32xf32>, vector<8x32xf32> -> vector<8x32xf32>
    %55 = arith.addf %54, %15 : vector<8x32xf32>
    %c0_47 = arith.constant 0 : index
    %c0_48 = arith.constant 0 : index
    %c0_49 = arith.constant 0 : index
    %56 = vector.load %arg4[%c0_47, %c0_48, %c0_49] : memref<8x16x32xf32, #tpu.memory_space<vmem>>, vector<8x16x32xf32>
    %c0_50 = arith.constant 0 : index
    %c0_51 = arith.constant 0 : index
    %c0_52 = arith.constant 0 : index
    %57 = vector.load %arg5[%c0_50, %c0_51, %c0_52] : memref<8x16x32xf32, #tpu.memory_space<vmem>>, vector<8x16x32xf32>
    %58 = vector.shape_cast %55 : vector<8x32xf32> to vector<8x1x32xf32>
    %59 = vector.broadcast %58 : vector<8x1x32xf32> to vector<8x16x32xf32>
    %60 = arith.mulf %56, %59 : vector<8x16x32xf32>
    %cst_53 = arith.constant dense<0.000000e+00> : vector<8x16xf32>
    %61 = vector.multi_reduction <add>, %60, %cst_53 [2] : vector<8x16x32xf32> to vector<8x16xf32>
    %62 = arith.mulf %61, %22 : vector<8x16xf32>
    %cst_54 = arith.constant dense<0xFF800000> : vector<8xf32>
    %63 = vector.multi_reduction <maximumf>, %62, %cst_54 [1] : vector<8x16xf32> to vector<8xf32>
    %64 = vector.shape_cast %63 : vector<8xf32> to vector<8x1xf32>
    %65 = vector.broadcast %64 : vector<8x1xf32> to vector<8x16xf32>
    %66 = arith.subf %62, %65 : vector<8x16xf32>
    %67 = math.exp %66 : vector<8x16xf32>
    %cst_55 = arith.constant dense<0.000000e+00> : vector<8xf32>
    %68 = vector.multi_reduction <add>, %67, %cst_55 [1] : vector<8x16xf32> to vector<8xf32>
    %69 = vector.shape_cast %68 : vector<8xf32> to vector<8x1xf32>
    %70 = tpu.reciprocal %69 {approx = true} : vector<8x1xf32> -> vector<8x1xf32>
    %71 = vector.broadcast %70 : vector<8x1xf32> to vector<8x16xf32>
    %72 = arith.mulf %67, %71 : vector<8x16xf32>
    %73 = arith.mulf %72, %22 : vector<8x16xf32>
    %74 = math.absf %73 : vector<8x16xf32>
    %cst_56 = arith.constant dense<0.000000e+00> : vector<8xf32>
    %75 = vector.multi_reduction <add>, %74, %cst_56 [1] : vector<8x16xf32> to vector<8xf32>
    %76 = vector.shape_cast %75 : vector<8xf32> to vector<8x1xf32>
    %cst_57 = arith.constant 9.99999996E-13 : f32
    %77 = vector.broadcast %cst_57 : f32 to vector<8x1xf32>
    %78 = arith.maximumf %76, %77 : vector<8x1xf32>
    %79 = tpu.reciprocal %78 {approx = true} : vector<8x1xf32> -> vector<8x1xf32>
    %80 = vector.broadcast %79 : vector<8x1xf32> to vector<8x16xf32>
    %81 = arith.mulf %73, %80 : vector<8x16xf32>
    %82 = vector.shape_cast %81 : vector<8x16xf32> to vector<8x16x1xf32>
    %83 = vector.broadcast %82 : vector<8x16x1xf32> to vector<8x16x32xf32>
    %84 = arith.mulf %83, %57 : vector<8x16x32xf32>
    %cst_58 = arith.constant dense<0.000000e+00> : vector<8x32xf32>
    %85 = vector.multi_reduction <add>, %84, %cst_58 [1] : vector<8x16x32xf32> to vector<8x32xf32>
    %c0_59 = arith.constant 0 : index
    %c0_60 = arith.constant 0 : index
    %86 = vector.load %arg39[%c0_59, %c0_60] : memref<8x32xf32, #tpu.memory_space<vmem>>, vector<8x32xf32>
    tpu.vector_store %arg39[%c0_59, %c0_60], %85 {strides = array<i32>} : memref<8x32xf32, #tpu.memory_space<vmem>>, vector<8x32xf32>,
    %c0_i32 = arith.constant 0 : i32
    %87 = vector.broadcast %c0_i32 : i32 to vector<8x1xi32>
    %c0_61 = arith.constant 0 : index
    %c0_62 = arith.constant 0 : index
    %88 = vector.load %arg40[%c0_61, %c0_62] : memref<8x1xi32, #tpu.memory_space<vmem>>, vector<8x1xi32>
    tpu.vector_store %arg40[%c0_61, %c0_62], %87 {strides = array<i32>} : memref<8x1xi32, #tpu.memory_space<vmem>>, vector<8x1xi32>,
    %c0_i32_63 = arith.constant 0 : i32
    %c8_i32 = arith.constant 8 : i32
    %89 = arith.addi %c0_i32_63, %c8_i32 : i32
    %c1_i32 = arith.constant 1 : i32
    scf.for %arg41 = %c0_i32_63 to %89 step %c1_i32  : i32 {
      %c1_i32_65 = arith.constant 1 : i32
      %90 = arith.muli %arg41, %c1_i32_65 : i32
      %c0_i32_66 = arith.constant 0 : i32
      %91 = arith.addi %c0_i32_66, %90 : i32
      %92 = arith.index_cast %91 : i32 to index
      %c0_67 = arith.constant 0 : index
      %c0_68 = arith.constant 0 : index
      %93 = vector.load %arg1[%92, %c0_67, %c0_68] : memref<8x8x1xi32, #tpu.memory_space<vmem>>, vector<1x8x1xi32>
      %94 = vector.shape_cast %93 : vector<1x8x1xi32> to vector<8x1xi32>
      %95 = arith.index_cast %91 : i32 to index
      %c0_69 = arith.constant 0 : index
      %c0_70 = arith.constant 0 : index
      %96 = vector.load %arg2[%95, %c0_69, %c0_70] : memref<8x8x1xi32, #tpu.memory_space<vmem>>, vector<1x8x1xi32>
      %97 = vector.shape_cast %96 : vector<1x8x1xi32> to vector<8x1xi32>
      %c0_i32_71 = arith.constant 0 : i32
      %98 = vector.broadcast %c0_i32_71 : i32 to vector<8x1xi32>
      %99 = arith.cmpi sgt, %97, %98 : vector<8x1xi32>
      %c0_72 = arith.constant 0 : index
      %c0_73 = arith.constant 0 : index
      %100 = vector.load %arg40[%c0_72, %c0_73] : memref<8x1xi32, #tpu.memory_space<vmem>>, vector<8x1xi32>
      %101 = arith.select %99, %94, %100 : vector<8x1xi1>, vector<8x1xi32>
      %102 = vector.broadcast %101 : vector<8x1xi32> to vector<8x128xi32>
      %103 = arith.cmpi eq, %0, %102 : vector<8x128xi32>
      %104 = arith.extui %103 : vector<8x128xi1> to vector<8x128xi32>
      %105 = arith.sitofp %104 : vector<8x128xi32> to vector<8x128xf32>
      %c0_74 = arith.constant 0 : index
      %c0_75 = arith.constant 0 : index
      %106 = vector.load %arg39[%c0_74, %c0_75] : memref<8x32xf32, #tpu.memory_space<vmem>>, vector<8x32xf32>
      %c0_76 = arith.constant 0 : index
      %c0_77 = arith.constant 0 : index
      %107 = vector.load %arg7[%c0_76, %c0_77] : memref<128x128xf32, #tpu.memory_space<vmem>>, vector<128x128xf32>
      %cst_78 = arith.constant dense<0.000000e+00> : vector<8x128xf32>
      %108 = tpu.matmul %105, %107, %cst_78 {dimension_numbers = #tpu.dot_dimension_numbers<[1], [0], [0], [1], [0, 0, 1, 1], [], []>} : vector<8x128xf32>, vector<128x128xf32>, vector<8x128xf32> -> vector<8x128xf32>
      %c0_79 = arith.constant 0 : index
      %c0_80 = arith.constant 0 : index
      %109 = vector.load %arg8[%c0_79, %c0_80] : memref<32x128xf32, #tpu.memory_space<vmem>>, vector<32x128xf32>
      %cst_81 = arith.constant dense<0.000000e+00> : vector<8x128xf32>
      %110 = tpu.matmul %106, %109, %cst_81 {dimension_numbers = #tpu.dot_dimension_numbers<[1], [0], [0], [1], [0, 0, 1, 1], [], []>} : vector<8x32xf32>, vector<32x128xf32>, vector<8x128xf32> -> vector<8x128xf32>
      %111 = arith.addf %108, %110 : vector<8x128xf32>
      %c0_82 = arith.constant 0 : index
      %c0_83 = arith.constant 0 : index
      %112 = vector.load %arg33[%c0_82, %c0_83] : memref<8x32xf32, #tpu.memory_space<vmem>>, vector<8x32xf32>
      %c0_84 = arith.constant 0 : index
      %c0_85 = arith.constant 0 : index
      %113 = vector.load %arg9[%c0_84, %c0_85] : memref<32x128xf32, #tpu.memory_space<vmem>>, vector<32x128xf32>
      %cst_86 = arith.constant dense<0.000000e+00> : vector<8x128xf32>
      %114 = tpu.matmul %112, %113, %cst_86 {dimension_numbers = #tpu.dot_dimension_numbers<[1], [0], [0], [1], [0, 0, 1, 1], [], []>} : vector<8x32xf32>, vector<32x128xf32>, vector<8x128xf32> -> vector<8x128xf32>
      %115 = arith.addf %111, %114 : vector<8x128xf32>
      %116 = arith.addf %115, %3 : vector<8x128xf32>
      %c0_87 = arith.constant 0 : index
      %c0_88 = arith.constant 0 : index
      %117 = vector.load %arg34[%c0_87, %c0_88] : memref<8x32xf32, #tpu.memory_space<vmem>>, vector<8x32xf32>
      %118 = vector.extract_strided_slice %116 {offsets = [0, 0], sizes = [8, 32], strides = [1, 1]} : vector<8x128xf32> to vector<8x32xf32>
      %119 = arith.negf %118 : vector<8x32xf32>
      %120 = math.exp %119 : vector<8x32xf32>
      %cst_89 = arith.constant 1.000000e+00 : f32
      %121 = vector.broadcast %cst_89 : f32 to vector<8x32xf32>
      %122 = arith.addf %121, %120 : vector<8x32xf32>
      %123 = arith.divf %121, %122 : vector<8x32xf32>
      %124 = vector.extract_strided_slice %116 {offsets = [0, 32], sizes = [8, 32], strides = [1, 1]} : vector<8x128xf32> to vector<8x32xf32>
      %125 = arith.negf %124 : vector<8x32xf32>
      %126 = math.exp %125 : vector<8x32xf32>
      %cst_90 = arith.constant 1.000000e+00 : f32
      %127 = vector.broadcast %cst_90 : f32 to vector<8x32xf32>
      %128 = arith.addf %127, %126 : vector<8x32xf32>
      %129 = arith.divf %127, %128 : vector<8x32xf32>
      %130 = vector.extract_strided_slice %116 {offsets = [0, 64], sizes = [8, 32], strides = [1, 1]} : vector<8x128xf32> to vector<8x32xf32>
      %131 = math.tanh %130 : vector<8x32xf32>
      %132 = vector.extract_strided_slice %116 {offsets = [0, 96], sizes = [8, 32], strides = [1, 1]} : vector<8x128xf32> to vector<8x32xf32>
      %133 = arith.negf %132 : vector<8x32xf32>
      %134 = math.exp %133 : vector<8x32xf32>
      %cst_91 = arith.constant 1.000000e+00 : f32
      %135 = vector.broadcast %cst_91 : f32 to vector<8x32xf32>
      %136 = arith.addf %135, %134 : vector<8x32xf32>
      %137 = arith.divf %135, %136 : vector<8x32xf32>
      %138 = arith.mulf %129, %117 : vector<8x32xf32>
      %139 = arith.mulf %123, %131 : vector<8x32xf32>
      %140 = arith.addf %138, %139 : vector<8x32xf32>
      %141 = math.tanh %140 : vector<8x32xf32>
      %142 = arith.mulf %137, %141 : vector<8x32xf32>
      %c0_92 = arith.constant 0 : index
      %c0_93 = arith.constant 0 : index
      %143 = vector.load %arg33[%c0_92, %c0_93] : memref<8x32xf32, #tpu.memory_space<vmem>>, vector<8x32xf32>
      tpu.vector_store %arg33[%c0_92, %c0_93], %142 {strides = array<i32>} : memref<8x32xf32, #tpu.memory_space<vmem>>, vector<8x32xf32>,
      %c0_94 = arith.constant 0 : index
      %c0_95 = arith.constant 0 : index
      %144 = vector.load %arg34[%c0_94, %c0_95] : memref<8x32xf32, #tpu.memory_space<vmem>>, vector<8x32xf32>
      tpu.vector_store %arg34[%c0_94, %c0_95], %140 {strides = array<i32>} : memref<8x32xf32, #tpu.memory_space<vmem>>, vector<8x32xf32>,
      %c0_96 = arith.constant 0 : index
      %c0_97 = arith.constant 0 : index
      %145 = vector.load %arg13[%c0_96, %c0_97] : memref<32x128xf32, #tpu.memory_space<vmem>>, vector<32x128xf32>
      %cst_98 = arith.constant dense<0.000000e+00> : vector<8x128xf32>
      %146 = tpu.matmul %142, %145, %cst_98 {dimension_numbers = #tpu.dot_dimension_numbers<[1], [0], [0], [1], [0, 0, 1, 1], [], []>} : vector<8x32xf32>, vector<32x128xf32>, vector<8x128xf32> -> vector<8x128xf32>
      %c0_99 = arith.constant 0 : index
      %c0_100 = arith.constant 0 : index
      %147 = vector.load %arg35[%c0_99, %c0_100] : memref<8x32xf32, #tpu.memory_space<vmem>>, vector<8x32xf32>
      %c0_101 = arith.constant 0 : index
      %c0_102 = arith.constant 0 : index
      %148 = vector.load %arg14[%c0_101, %c0_102] : memref<32x128xf32, #tpu.memory_space<vmem>>, vector<32x128xf32>
      %cst_103 = arith.constant dense<0.000000e+00> : vector<8x128xf32>
      %149 = tpu.matmul %147, %148, %cst_103 {dimension_numbers = #tpu.dot_dimension_numbers<[1], [0], [0], [1], [0, 0, 1, 1], [], []>} : vector<8x32xf32>, vector<32x128xf32>, vector<8x128xf32> -> vector<8x128xf32>
      %150 = arith.addf %146, %149 : vector<8x128xf32>
      %151 = arith.addf %150, %6 : vector<8x128xf32>
      %c0_104 = arith.constant 0 : index
      %c0_105 = arith.constant 0 : index
      %152 = vector.load %arg36[%c0_104, %c0_105] : memref<8x32xf32, #tpu.memory_space<vmem>>, vector<8x32xf32>
      %153 = vector.extract_strided_slice %151 {offsets = [0, 0], sizes = [8, 32], strides = [1, 1]} : vector<8x128xf32> to vector<8x32xf32>
      %154 = arith.negf %153 : vector<8x32xf32>
      %155 = math.exp %154 : vector<8x32xf32>
      %cst_106 = arith.constant 1.000000e+00 : f32
      %156 = vector.broadcast %cst_106 : f32 to vector<8x32xf32>
      %157 = arith.addf %156, %155 : vector<8x32xf32>
      %158 = arith.divf %156, %157 : vector<8x32xf32>
      %159 = vector.extract_strided_slice %151 {offsets = [0, 32], sizes = [8, 32], strides = [1, 1]} : vector<8x128xf32> to vector<8x32xf32>
      %160 = arith.negf %159 : vector<8x32xf32>
      %161 = math.exp %160 : vector<8x32xf32>
      %cst_107 = arith.constant 1.000000e+00 : f32
      %162 = vector.broadcast %cst_107 : f32 to vector<8x32xf32>
      %163 = arith.addf %162, %161 : vector<8x32xf32>
      %164 = arith.divf %162, %163 : vector<8x32xf32>
      %165 = vector.extract_strided_slice %151 {offsets = [0, 64], sizes = [8, 32], strides = [1, 1]} : vector<8x128xf32> to vector<8x32xf32>
      %166 = math.tanh %165 : vector<8x32xf32>
      %167 = vector.extract_strided_slice %151 {offsets = [0, 96], sizes = [8, 32], strides = [1, 1]} : vector<8x128xf32> to vector<8x32xf32>
      %168 = arith.negf %167 : vector<8x32xf32>
      %169 = math.exp %168 : vector<8x32xf32>
      %cst_108 = arith.constant 1.000000e+00 : f32
      %170 = vector.broadcast %cst_108 : f32 to vector<8x32xf32>
      %171 = arith.addf %170, %169 : vector<8x32xf32>
      %172 = arith.divf %170, %171 : vector<8x32xf32>
      %173 = arith.mulf %164, %152 : vector<8x32xf32>
      %174 = arith.mulf %158, %166 : vector<8x32xf32>
      %175 = arith.addf %173, %174 : vector<8x32xf32>
      %176 = math.tanh %175 : vector<8x32xf32>
      %177 = arith.mulf %172, %176 : vector<8x32xf32>
      %c0_109 = arith.constant 0 : index
      %c0_110 = arith.constant 0 : index
      %178 = vector.load %arg35[%c0_109, %c0_110] : memref<8x32xf32, #tpu.memory_space<vmem>>, vector<8x32xf32>
      tpu.vector_store %arg35[%c0_109, %c0_110], %177 {strides = array<i32>} : memref<8x32xf32, #tpu.memory_space<vmem>>, vector<8x32xf32>,
      %c0_111 = arith.constant 0 : index
      %c0_112 = arith.constant 0 : index
      %179 = vector.load %arg36[%c0_111, %c0_112] : memref<8x32xf32, #tpu.memory_space<vmem>>, vector<8x32xf32>
      tpu.vector_store %arg36[%c0_111, %c0_112], %175 {strides = array<i32>} : memref<8x32xf32, #tpu.memory_space<vmem>>, vector<8x32xf32>,
      %c0_113 = arith.constant 0 : index
      %c0_114 = arith.constant 0 : index
      %180 = vector.load %arg18[%c0_113, %c0_114] : memref<32x256xf32, #tpu.memory_space<vmem>>, vector<32x256xf32>
      %cst_115 = arith.constant dense<0.000000e+00> : vector<8x256xf32>
      %181 = tpu.matmul %177, %180, %cst_115 {dimension_numbers = #tpu.dot_dimension_numbers<[1], [0], [0], [1], [0, 0, 1, 1], [], []>} : vector<8x32xf32>, vector<32x256xf32>, vector<8x256xf32> -> vector<8x256xf32>
      %c0_116 = arith.constant 0 : index
      %c0_117 = arith.constant 0 : index
      %182 = vector.load %arg37[%c0_116, %c0_117] : memref<8x64xf32, #tpu.memory_space<vmem>>, vector<8x64xf32>
      %c0_118 = arith.constant 0 : index
      %c0_119 = arith.constant 0 : index
      %183 = vector.load %arg19[%c0_118, %c0_119] : memref<64x256xf32, #tpu.memory_space<vmem>>, vector<64x256xf32>
      %cst_120 = arith.constant dense<0.000000e+00> : vector<8x256xf32>
      %184 = tpu.matmul %182, %183, %cst_120 {dimension_numbers = #tpu.dot_dimension_numbers<[1], [0], [0], [1], [0, 0, 1, 1], [], []>} : vector<8x64xf32>, vector<64x256xf32>, vector<8x256xf32> -> vector<8x256xf32>
      %185 = arith.addf %181, %184 : vector<8x256xf32>
      %186 = arith.addf %185, %9 : vector<8x256xf32>
      %c0_121 = arith.constant 0 : index
      %c0_122 = arith.constant 0 : index
      %187 = vector.load %arg38[%c0_121, %c0_122] : memref<8x64xf32, #tpu.memory_space<vmem>>, vector<8x64xf32>
      %188 = vector.extract_strided_slice %186 {offsets = [0, 0], sizes = [8, 64], strides = [1, 1]} : vector<8x256xf32> to vector<8x64xf32>
      %189 = arith.negf %188 : vector<8x64xf32>
      %190 = math.exp %189 : vector<8x64xf32>
      %cst_123 = arith.constant 1.000000e+00 : f32
      %191 = vector.broadcast %cst_123 : f32 to vector<8x64xf32>
      %192 = arith.addf %191, %190 : vector<8x64xf32>
      %193 = arith.divf %191, %192 : vector<8x64xf32>
      %194 = vector.extract_strided_slice %186 {offsets = [0, 64], sizes = [8, 64], strides = [1, 1]} : vector<8x256xf32> to vector<8x64xf32>
      %195 = arith.negf %194 : vector<8x64xf32>
      %196 = math.exp %195 : vector<8x64xf32>
      %cst_124 = arith.constant 1.000000e+00 : f32
      %197 = vector.broadcast %cst_124 : f32 to vector<8x64xf32>
      %198 = arith.addf %197, %196 : vector<8x64xf32>
      %199 = arith.divf %197, %198 : vector<8x64xf32>
      %200 = vector.extract_strided_slice %186 {offsets = [0, 128], sizes = [8, 64], strides = [1, 1]} : vector<8x256xf32> to vector<8x64xf32>
      %201 = math.tanh %200 : vector<8x64xf32>
      %202 = vector.extract_strided_slice %186 {offsets = [0, 192], sizes = [8, 64], strides = [1, 1]} : vector<8x256xf32> to vector<8x64xf32>
      %203 = arith.negf %202 : vector<8x64xf32>
      %204 = math.exp %203 : vector<8x64xf32>
      %cst_125 = arith.constant 1.000000e+00 : f32
      %205 = vector.broadcast %cst_125 : f32 to vector<8x64xf32>
      %206 = arith.addf %205, %204 : vector<8x64xf32>
      %207 = arith.divf %205, %206 : vector<8x64xf32>
      %208 = arith.mulf %199, %187 : vector<8x64xf32>
      %209 = arith.mulf %193, %201 : vector<8x64xf32>
      %210 = arith.addf %208, %209 : vector<8x64xf32>
      %211 = math.tanh %210 : vector<8x64xf32>
      %212 = arith.mulf %207, %211 : vector<8x64xf32>
      %c0_126 = arith.constant 0 : index
      %c0_127 = arith.constant 0 : index
      %213 = vector.load %arg37[%c0_126, %c0_127] : memref<8x64xf32, #tpu.memory_space<vmem>>, vector<8x64xf32>
      tpu.vector_store %arg37[%c0_126, %c0_127], %212 {strides = array<i32>} : memref<8x64xf32, #tpu.memory_space<vmem>>, vector<8x64xf32>,
      %c0_128 = arith.constant 0 : index
      %c0_129 = arith.constant 0 : index
      %214 = vector.load %arg38[%c0_128, %c0_129] : memref<8x64xf32, #tpu.memory_space<vmem>>, vector<8x64xf32>
      tpu.vector_store %arg38[%c0_128, %c0_129], %210 {strides = array<i32>} : memref<8x64xf32, #tpu.memory_space<vmem>>, vector<8x64xf32>,
      %c0_130 = arith.constant 0 : index
      %c0_131 = arith.constant 0 : index
      %215 = vector.load %arg23[%c0_130, %c0_131] : memref<64x32xf32, #tpu.memory_space<vmem>>, vector<64x32xf32>
      %cst_132 = arith.constant dense<0.000000e+00> : vector<8x32xf32>
      %216 = tpu.matmul %212, %215, %cst_132 {dimension_numbers = #tpu.dot_dimension_numbers<[1], [0], [0], [1], [0, 0, 1, 1], [], []>} : vector<8x64xf32>, vector<64x32xf32>, vector<8x32xf32> -> vector<8x32xf32>
      %217 = arith.addf %216, %12 : vector<8x32xf32>
      %cst_133 = arith.constant 0.000000e+00 : f32
      %218 = vector.broadcast %cst_133 : f32 to vector<8x32xf32>
      %219 = arith.maximumf %217, %218 : vector<8x32xf32>
      %c0_134 = arith.constant 0 : index
      %c0_135 = arith.constant 0 : index
      %220 = vector.load %arg25[%c0_134, %c0_135] : memref<32x32xf32, #tpu.memory_space<vmem>>, vector<32x32xf32>
      %cst_136 = arith.constant dense<0.000000e+00> : vector<8x32xf32>
      %221 = tpu.matmul %219, %220, %cst_136 {dimension_numbers = #tpu.dot_dimension_numbers<[1], [0], [0], [1], [0, 0, 1, 1], [], []>} : vector<8x32xf32>, vector<32x32xf32>, vector<8x32xf32> -> vector<8x32xf32>
      %222 = arith.addf %221, %15 : vector<8x32xf32>
      %c0_137 = arith.constant 0 : index
      %c0_138 = arith.constant 0 : index
      %c0_139 = arith.constant 0 : index
      %223 = vector.load %arg4[%c0_137, %c0_138, %c0_139] : memref<8x16x32xf32, #tpu.memory_space<vmem>>, vector<8x16x32xf32>
      %c0_140 = arith.constant 0 : index
      %c0_141 = arith.constant 0 : index
      %c0_142 = arith.constant 0 : index
      %224 = vector.load %arg5[%c0_140, %c0_141, %c0_142] : memref<8x16x32xf32, #tpu.memory_space<vmem>>, vector<8x16x32xf32>
      %225 = vector.shape_cast %222 : vector<8x32xf32> to vector<8x1x32xf32>
      %226 = vector.broadcast %225 : vector<8x1x32xf32> to vector<8x16x32xf32>
      %227 = arith.mulf %223, %226 : vector<8x16x32xf32>
      %cst_143 = arith.constant dense<0.000000e+00> : vector<8x16xf32>
      %228 = vector.multi_reduction <add>, %227, %cst_143 [2] : vector<8x16x32xf32> to vector<8x16xf32>
      %229 = arith.mulf %228, %22 : vector<8x16xf32>
      %cst_144 = arith.constant dense<0xFF800000> : vector<8xf32>
      %230 = vector.multi_reduction <maximumf>, %229, %cst_144 [1] : vector<8x16xf32> to vector<8xf32>
      %231 = vector.shape_cast %230 : vector<8xf32> to vector<8x1xf32>
      %232 = vector.broadcast %231 : vector<8x1xf32> to vector<8x16xf32>
      %233 = arith.subf %229, %232 : vector<8x16xf32>
      %234 = math.exp %233 : vector<8x16xf32>
      %cst_145 = arith.constant dense<0.000000e+00> : vector<8xf32>
      %235 = vector.multi_reduction <add>, %234, %cst_145 [1] : vector<8x16xf32> to vector<8xf32>
      %236 = vector.shape_cast %235 : vector<8xf32> to vector<8x1xf32>
      %237 = tpu.reciprocal %236 {approx = true} : vector<8x1xf32> -> vector<8x1xf32>
      %238 = vector.broadcast %237 : vector<8x1xf32> to vector<8x16xf32>
      %239 = arith.mulf %234, %238 : vector<8x16xf32>
      %240 = arith.mulf %239, %22 : vector<8x16xf32>
      %241 = math.absf %240 : vector<8x16xf32>
      %cst_146 = arith.constant dense<0.000000e+00> : vector<8xf32>
      %242 = vector.multi_reduction <add>, %241, %cst_146 [1] : vector<8x16xf32> to vector<8xf32>
      %243 = vector.shape_cast %242 : vector<8xf32> to vector<8x1xf32>
      %cst_147 = arith.constant 9.99999996E-13 : f32
      %244 = vector.broadcast %cst_147 : f32 to vector<8x1xf32>
      %245 = arith.maximumf %243, %244 : vector<8x1xf32>
      %246 = tpu.reciprocal %245 {approx = true} : vector<8x1xf32> -> vector<8x1xf32>
      %247 = vector.broadcast %246 : vector<8x1xf32> to vector<8x16xf32>
      %248 = arith.mulf %240, %247 : vector<8x16xf32>
      %249 = vector.shape_cast %248 : vector<8x16xf32> to vector<8x16x1xf32>
      %250 = vector.broadcast %249 : vector<8x16x1xf32> to vector<8x16x32xf32>
      %251 = arith.mulf %250, %224 : vector<8x16x32xf32>
      %cst_148 = arith.constant dense<0.000000e+00> : vector<8x32xf32>
      %252 = vector.multi_reduction <add>, %251, %cst_148 [1] : vector<8x16x32xf32> to vector<8x32xf32>
      %c0_149 = arith.constant 0 : index
      %c0_150 = arith.constant 0 : index
      %253 = vector.load %arg39[%c0_149, %c0_150] : memref<8x32xf32, #tpu.memory_space<vmem>>, vector<8x32xf32>
      tpu.vector_store %arg39[%c0_149, %c0_150], %252 {strides = array<i32>} : memref<8x32xf32, #tpu.memory_space<vmem>>, vector<8x32xf32>,
      %c0_151 = arith.constant 0 : index
      %c0_152 = arith.constant 0 : index
      %254 = vector.load %arg27[%c0_151, %c0_152] : memref<64x32xf32, #tpu.memory_space<vmem>>, vector<64x32xf32>
      %cst_153 = arith.constant dense<0.000000e+00> : vector<8x32xf32>
      %255 = tpu.matmul %212, %254, %cst_153 {dimension_numbers = #tpu.dot_dimension_numbers<[1], [0], [0], [1], [0, 0, 1, 1], [], []>} : vector<8x64xf32>, vector<64x32xf32>, vector<8x32xf32> -> vector<8x32xf32>
      %c0_154 = arith.constant 0 : index
      %c0_155 = arith.constant 0 : index
      %256 = vector.load %arg28[%c0_154, %c0_155] : memref<32x32xf32, #tpu.memory_space<vmem>>, vector<32x32xf32>
      %cst_156 = arith.constant dense<0.000000e+00> : vector<8x32xf32>
      %257 = tpu.matmul %252, %256, %cst_156 {dimension_numbers = #tpu.dot_dimension_numbers<[1], [0], [0], [1], [0, 0, 1, 1], [], []>} : vector<8x32xf32>, vector<32x32xf32>, vector<8x32xf32> -> vector<8x32xf32>
      %258 = arith.addf %255, %257 : vector<8x32xf32>
      %259 = arith.addf %258, %18 : vector<8x32xf32>
      %cst_157 = arith.constant 0.000000e+00 : f32
      %260 = vector.broadcast %cst_157 : f32 to vector<8x32xf32>
      %261 = arith.cmpf oge, %259, %260 : vector<8x32xf32>
      %cst_158 = arith.constant 0.00999999977 : f32
      %262 = vector.broadcast %cst_158 : f32 to vector<8x32xf32>
      %263 = arith.mulf %262, %259 : vector<8x32xf32>
      %264 = arith.select %261, %259, %263 : vector<8x32xi1>, vector<8x32xf32>
      %c0_159 = arith.constant 0 : index
      %c0_160 = arith.constant 0 : index
      %265 = vector.load %arg30[%c0_159, %c0_160] : memref<32x128xf32, #tpu.memory_space<vmem>>, vector<32x128xf32>
      %cst_161 = arith.constant dense<0.000000e+00> : vector<8x128xf32>
      %266 = tpu.matmul %264, %265, %cst_161 {dimension_numbers = #tpu.dot_dimension_numbers<[1], [0], [0], [1], [0, 0, 1, 1], [], []>} : vector<8x32xf32>, vector<32x128xf32>, vector<8x128xf32> -> vector<8x128xf32>
      %267 = arith.addf %266, %21 : vector<8x128xf32>
      %268 = arith.index_cast %91 : i32 to index
      %c0_162 = arith.constant 0 : index
      %c0_163 = arith.constant 0 : index
      %269 = vector.load %arg32[%268, %c0_162, %c0_163] : memref<8x8x128xf32, #tpu.memory_space<vmem>>, vector<1x8x128xf32>
      %270 = vector.shape_cast %269 : vector<1x8x128xf32> to vector<8x128xf32>
      %271 = vector.shape_cast %267 : vector<8x128xf32> to vector<1x8x128xf32>
      tpu.vector_store %arg32[%268, %c0_162, %c0_163], %271 {strides = array<i32>} : memref<8x8x128xf32, #tpu.memory_space<vmem>>, vector<1x8x128xf32>,
      %272 = arith.index_cast %91 : i32 to index
      %c0_164 = arith.constant 0 : index
      %c0_165 = arith.constant 0 : index
      %273 = vector.load %arg3[%272, %c0_164, %c0_165] : memref<8x8x128xf32, #tpu.memory_space<vmem>>, vector<1x8x128xf32>
      %274 = vector.shape_cast %273 : vector<1x8x128xf32> to vector<8x128xf32>
      %275 = arith.addf %267, %274 : vector<8x128xf32>
      %276 = tpu.reduce_index %275 {axis = 1 : i32, kind = #tpu.reduction_kind<arg_max>} : vector<8x128xf32> -> vector<8xi32>
      %277 = vector.shape_cast %276 : vector<8xi32> to vector<8x1xi32>
      %c0_166 = arith.constant 0 : index
      %c0_167 = arith.constant 0 : index
      %278 = vector.load %arg40[%c0_166, %c0_167] : memref<8x1xi32, #tpu.memory_space<vmem>>, vector<8x1xi32>
      tpu.vector_store %arg40[%c0_166, %c0_167], %277 {strides = array<i32>} : memref<8x1xi32, #tpu.memory_space<vmem>>, vector<8x1xi32>,
    }
    %c8_i32_64 = arith.constant 8 : i32
    return
  }
  func.func @transform_0(%arg0: i32) -> (i32, i32, i32) {
    %c0_i32 = arith.constant 0 : i32
    %c0_i32_0 = arith.constant 0 : i32
    %c0_i32_1 = arith.constant 0 : i32
    %c0_i32_2 = arith.constant 0 : i32
    return %c0_i32, %c0_i32_0, %c0_i32_1 : i32, i32, i32
  }
  func.func @transform_1(%arg0: i32) -> (i32, i32, i32) {
    %c0_i32 = arith.constant 0 : i32
    %c0_i32_0 = arith.constant 0 : i32
    %c0_i32_1 = arith.constant 0 : i32
    %c0_i32_2 = arith.constant 0 : i32
    return %c0_i32, %c0_i32_0, %c0_i32_1 : i32, i32, i32
  }
  func.func @transform_2(%arg0: i32) -> (i32, i32, i32) {
    %c0_i32 = arith.constant 0 : i32
    %c0_i32_0 = arith.constant 0 : i32
    %c0_i32_1 = arith.constant 0 : i32
    %c0_i32_2 = arith.constant 0 : i32
    return %c0_i32, %c0_i32_0, %c0_i32_1 : i32, i32, i32
  }
  func.func @transform_3(%arg0: i32) -> (i32, i32, i32) {
    %c0_i32 = arith.constant 0 : i32
    %c0_i32_0 = arith.constant 0 : i32
    %c0_i32_1 = arith.constant 0 : i32
    %c0_i32_2 = arith.constant 0 : i32
    return %c0_i32, %c0_i32_0, %c0_i32_1 : i32, i32, i32
  }
  func.func @transform_4(%arg0: i32) -> (i32, i32, i32) {
    %c0_i32 = arith.constant 0 : i32
    %c0_i32_0 = arith.constant 0 : i32
    %c0_i32_1 = arith.constant 0 : i32
    %c0_i32_2 = arith.constant 0 : i32
    return %c0_i32, %c0_i32_0, %c0_i32_1 : i32, i32, i32
  }
  func.func @transform_5(%arg0: i32) -> (i32, i32) {
    %c0_i32 = arith.constant 0 : i32
    %c0_i32_0 = arith.constant 0 : i32
    %c0_i32_1 = arith.constant 0 : i32
    return %c0_i32, %c0_i32_0 : i32, i32
  }
  func.func @transform_6(%arg0: i32) -> (i32, i32) {
    %c0_i32 = arith.constant 0 : i32
    %c0_i32_0 = arith.constant 0 : i32
    %c0_i32_1 = arith.constant 0 : i32
    return %c0_i32, %c0_i32_0 : i32, i32
  }
  func.func @transform_7(%arg0: i32) -> (i32, i32) {
    %c0_i32 = arith.constant 0 : i32
    %c0_i32_0 = arith.constant 0 : i32
    %c0_i32_1 = arith.constant 0 : i32
    return %c0_i32, %c0_i32_0 : i32, i32
  }
  func.func @transform_8(%arg0: i32) -> (i32, i32) {
    %c0_i32 = arith.constant 0 : i32
    %c0_i32_0 = arith.constant 0 : i32
    %c0_i32_1 = arith.constant 0 : i32
    return %c0_i32, %c0_i32_0 : i32, i32
  }
  func.func @transform_9(%arg0: i32) -> (i32, i32) {
    %c0_i32 = arith.constant 0 : i32
    %c0_i32_0 = arith.constant 0 : i32
    %c0_i32_1 = arith.constant 0 : i32
    return %c0_i32, %c0_i32_0 : i32, i32
  }
  func.func @transform_10(%arg0: i32) -> (i32, i32) {
    %c0_i32 = arith.constant 0 : i32
    %c0_i32_0 = arith.constant 0 : i32
    %c0_i32_1 = arith.constant 0 : i32
    return %c0_i32, %c0_i32_0 : i32, i32
  }
  func.func @transform_11(%arg0: i32) -> (i32, i32) {
    %c0_i32 = arith.constant 0 : i32
    %c0_i32_0 = arith.constant 0 : i32
    %c0_i32_1 = arith.constant 0 : i32
    return %c0_i32, %c0_i32_0 : i32, i32
  }
  func.func @transform_12(%arg0: i32) -> (i32, i32) {
    %c0_i32 = arith.constant 0 : i32
    %c0_i32_0 = arith.constant 0 : i32
    %c0_i32_1 = arith.constant 0 : i32
    return %c0_i32, %c0_i32_0 : i32, i32
  }
  func.func @transform_13(%arg0: i32) -> (i32, i32) {
    %c0_i32 = arith.constant 0 : i32
    %c0_i32_0 = arith.constant 0 : i32
    %c0_i32_1 = arith.constant 0 : i32
    return %c0_i32, %c0_i32_0 : i32, i32
  }
  func.func @transform_14(%arg0: i32) -> (i32, i32) {
    %c0_i32 = arith.constant 0 : i32
    %c0_i32_0 = arith.constant 0 : i32
    %c0_i32_1 = arith.constant 0 : i32
    return %c0_i32, %c0_i32_0 : i32, i32
  }
  func.func @transform_15(%arg0: i32) -> (i32, i32) {
    %c0_i32 = arith.constant 0 : i32
    %c0_i32_0 = arith.constant 0 : i32
    %c0_i32_1 = arith.constant 0 : i32
    return %c0_i32, %c0_i32_0 : i32, i32
  }
  func.func @transform_16(%arg0: i32) -> (i32, i32) {
    %c0_i32 = arith.constant 0 : i32
    %c0_i32_0 = arith.constant 0 : i32
    %c0_i32_1 = arith.constant 0 : i32
    return %c0_i32, %c0_i32_0 : i32, i32
  }
  func.func @transform_17(%arg0: i32) -> (i32, i32) {
    %c0_i32 = arith.constant 0 : i32
    %c0_i32_0 = arith.constant 0 : i32
    %c0_i32_1 = arith.constant 0 : i32
    return %c0_i32, %c0_i32_0 : i32, i32
  }
  func.func @transform_18(%arg0: i32) -> (i32, i32) {
    %c0_i32 = arith.constant 0 : i32
    %c0_i32_0 = arith.constant 0 : i32
    %c0_i32_1 = arith.constant 0 : i32
    return %c0_i32, %c0_i32_0 : i32, i32
  }
  func.func @transform_19(%arg0: i32) -> (i32, i32) {
    %c0_i32 = arith.constant 0 : i32
    %c0_i32_0 = arith.constant 0 : i32
    %c0_i32_1 = arith.constant 0 : i32
    return %c0_i32, %c0_i32_0 : i32, i32
  }
  func.func @transform_20(%arg0: i32) -> (i32, i32) {
    %c0_i32 = arith.constant 0 : i32
    %c0_i32_0 = arith.constant 0 : i32
    %c0_i32_1 = arith.constant 0 : i32
    return %c0_i32, %c0_i32_0 : i32, i32
  }
  func.func @transform_21(%arg0: i32) -> (i32, i32) {
    %c0_i32 = arith.constant 0 : i32
    %c0_i32_0 = arith.constant 0 : i32
    %c0_i32_1 = arith.constant 0 : i32
    return %c0_i32, %c0_i32_0 : i32, i32
  }
  func.func @transform_22(%arg0: i32) -> (i32, i32) {
    %c0_i32 = arith.constant 0 : i32
    %c0_i32_0 = arith.constant 0 : i32
    %c0_i32_1 = arith.constant 0 : i32
    return %c0_i32, %c0_i32_0 : i32, i32
  }
  func.func @transform_23(%arg0: i32) -> (i32, i32) {
    %c0_i32 = arith.constant 0 : i32
    %c0_i32_0 = arith.constant 0 : i32
    %c0_i32_1 = arith.constant 0 : i32
    return %c0_i32, %c0_i32_0 : i32, i32
  }
  func.func @transform_24(%arg0: i32) -> (i32, i32) {
    %c0_i32 = arith.constant 0 : i32
    %c0_i32_0 = arith.constant 0 : i32
    %c0_i32_1 = arith.constant 0 : i32
    return %c0_i32, %c0_i32_0 : i32, i32
  }
  func.func @transform_25(%arg0: i32) -> (i32, i32) {
    %c0_i32 = arith.constant 0 : i32
    %c0_i32_0 = arith.constant 0 : i32
    %c0_i32_1 = arith.constant 0 : i32
    return %c0_i32, %c0_i32_0 : i32, i32
  }
  func.func @transform_26(%arg0: i32) -> (i32, i32) {
    %c0_i32 = arith.constant 0 : i32
    %c0_i32_0 = arith.constant 0 : i32
    %c0_i32_1 = arith.constant 0 : i32
    return %c0_i32, %c0_i32_0 : i32, i32
  }
  func.func @transform_27(%arg0: i32) -> (i32, i32) {
    %c0_i32 = arith.constant 0 : i32
    %c0_i32_0 = arith.constant 0 : i32
    %c0_i32_1 = arith.constant 0 : i32
    return %c0_i32, %c0_i32_0 : i32, i32
  }
  func.func @transform_28(%arg0: i32) -> (i32, i32) {
    %c0_i32 = arith.constant 0 : i32
    %c0_i32_0 = arith.constant 0 : i32
    %c0_i32_1 = arith.constant 0 : i32
    return %c0_i32, %c0_i32_0 : i32, i32
  }
  func.func @transform_29(%arg0: i32) -> (i32, i32) {
    %c0_i32 = arith.constant 0 : i32
    %c0_i32_0 = arith.constant 0 : i32
    %c0_i32_1 = arith.constant 0 : i32
    return %c0_i32, %c0_i32_0 : i32, i32
  }
  func.func @transform_30(%arg0: i32) -> (i32, i32) {
    %c0_i32 = arith.constant 0 : i32
    %c0_i32_0 = arith.constant 0 : i32
    %c0_i32_1 = arith.constant 0 : i32
    return %c0_i32, %c0_i32_0 : i32, i32
  }
  func.func @transform_31(%arg0: i32) -> (i32, i32, i32) {
    %c0_i32 = arith.constant 0 : i32
    %c0_i32_0 = arith.constant 0 : i32
    %c0_i32_1 = arith.constant 0 : i32
    %c0_i32_2 = arith.constant 0 : i32
    return %c0_i32, %c0_i32_0, %c0_i32_1 : i32, i32, i32
  }
}

</mosaic_0001>

<bundles_post_ra>
// kernel: tpu_custom_call.1
= control target key start
LH: loop header
LB: loop body
LE: loop exit
PB: predicated region body
PF: predicated region fallthrough
CT: control target
= control target key end

     0   :  { %s5035_s6 = smov 1   ;;  %s5036_s10 = smov 2   ;;  %s6516_s0 = inlined_call_operand.smem [shape: u32[32], index: -1, kind: input, shape index: {}] }
   0x1   :  { %s5111_s5 = sld [smem:[%s6516_s0]]   ;;  %s5037_s14 = smov 3  }
   0x2   :  { %s5116_s9 = sld [smem:[%s6516_s0 + %s5035_s6]]   ;;  %s5038_s18 = smov 4  }
   0x3   :  { %s5121_s13 = sld [smem:[%s6516_s0 + %s5036_s10]]   ;;  %s5039_s22 = smov 5  }
   0x4   :  { %s5126_s17 = sld [smem:[%s6516_s0 + %s5037_s14]]   ;;  %s5040_s26 = smov 6  }
   0x5   :  { %s5131_s21 = sld [smem:[%s6516_s0 + %s5038_s18]]   ;;  %s5041_s30 = smov 7  }
   0x6   :  { %s5136_s25 = sld [smem:[%s6516_s0 + %s5039_s22]]   ;;  %s5042_s4 = smov 8  }
   0x7   :  { %6545 = sst [smem:[#allocation56_spill]] %s5111_s5  ;;  %s5043_s10 = smov 9  }
   0x8   :  { %6546 = sst [smem:[#allocation57_spill]] %s5116_s9  ;;  %s5044_s15 = smov 10  }
   0x9   :  { %6547 = sst [smem:[#allocation58_spill]] %s5121_s13  ;;  %s5045_s20 = smov 11  }
   0xa   :  { %6548 = sst [smem:[#allocation59_spill]] %s5126_s17  ;;  %s5047_s1 = smov 13  }
   0xb   :  { %6549 = sst [smem:[#allocation60_spill]] %s5131_s21  ;;  %s5048_s7 = smov 14  }
   0xc   :  { %s5141_s29 = sld [smem:[%s6516_s0 + %s5040_s26]]   ;;  %s5046_s26 = smov 12  }
   0xd   :  { %s5146_s3 = sld [smem:[%s6516_s0 + %s5041_s30]]   ;;  %s5050_s22 = smov 16  }
   0xe   :  { %s5151_s8 = sld [smem:[%s6516_s0 + %s5042_s4]]   ;;  %s5051_s28 = smov 17  }
   0xf   :  { %s5156_s14 = sld [smem:[%s6516_s0 + %s5043_s10]]  }
  0x10   :  { %s5161_s19 = sld [smem:[%s6516_s0 + %s5044_s15]]   ;;  %s5049_s15 = smov 15  }
  0x11   :  { %s5166_s24 = sld [smem:[%s6516_s0 + %s5045_s20]]  }
  0x12   :  { %s5171_s30 = sld [smem:[%s6516_s0 + %s5046_s26]]  }
  0x13   :  { %s5176_s6 = sld [smem:[%s6516_s0 + %s5047_s1]]  }
  0x14   :  { %s5181_s12 = sld [smem:[%s6516_s0 + %s5048_s7]]   ;;  %s5052_s7 = smov 18  }
  0x15   :  { %6550 = sst [smem:[#allocation61_spill]] %s5156_s14 }
  0x16   :  { %s5186_s20 = sld [smem:[%s6516_s0 + %s5049_s15]]   ;;  %s5053_s15 = smov 19  }
  0x17   :  { %s5191_s27 = sld [smem:[%s6516_s0 + %s5050_s22]]   ;;  %s5054_s22 = smov 20  }
  0x18   :  { %s5196_s4 = sld [smem:[%s6516_s0 + %s5051_s28]]   ;;  %s5055_s28 = smov 21  }
  0x19   :  { %s5201_s13 = sld [smem:[%s6516_s0 + %s5052_s7]]   ;;  %s5056_s7 = smov 22  }
  0x1a   :  { %s5206_s9 = sld [smem:[%s6516_s0 + %s5053_s15]]   ;;  %s5057_s15 = smov 23  }
  0x1b   :  { %s5211_s5 = sld [smem:[%s6516_s0 + %s5054_s22]]   ;;  %s5058_s22 = smov 24  }
  0x1c   :  { %s5216_s21 = sld [smem:[%s6516_s0 + %s5055_s28]]   ;;  %s5059_s28 = smov 25  }
  0x1d   :  { %6551 = sst [smem:[#allocation62_spill]] %s5191_s27 }
  0x1e   :  { %s5221_s17 = sld [smem:[%s6516_s0 + %s5056_s7]]   ;;  %s5060_s7 = smov 26  }
  0x1f   :  { %6552 = sst [smem:[#allocation63_spill]] %s5201_s13 }
  0x20   :  { %s5226_s14 = sld [smem:[%s6516_s0 + %s5057_s15]]   ;;  %s5061_s15 = smov 27  }
  0x21   :  { %6553 = sst [smem:[#allocation64_spill]] %s5211_s5 }
  0x22   :  { %s5231_s5 = sld [smem:[%s6516_s0 + %s5058_s22]]   ;;  %s5062_s22 = smov 28  }
  0x23   :  { %s5236_s13 = sld [smem:[%s6516_s0 + %s5059_s28]]   ;;  %s5063_s28 = smov 29  }
  0x24   :  { %6554 = sst [smem:[#allocation65_spill]] %s5221_s17 }
  0x25   :  { %s5241_s17 = sld [smem:[%s6516_s0 + %s5060_s7]]   ;;  %s5064_s7 = smov 30  }
  0x26   :  { %6555 = sst [smem:[#allocation66_spill]] %s5226_s14 }
  0x27   :  { %s5246_s14 = sld [smem:[%s6516_s0 + %s5061_s15]]   ;;  %s5065_s15 = smov 31  }
  0x28   :  { %s5251_s27 = sld [smem:[%s6516_s0 + %s5062_s22]]  }
  0x29   :  { %6556 = sst [smem:[#allocation67_spill]] %s5236_s13 }
  0x2a   :  { %s5256_s13 = sld [smem:[%s6516_s0 + %s5063_s28]]  }
  0x2b   :  { %6557 = sst [smem:[#allocation68_spill]] %s5241_s17 }
  0x2c   :  { %s5261_s17 = sld [smem:[%s6516_s0 + %s5064_s7]]  }
  0x2d   :  { %6558 = sst [smem:[#allocation69_spill]] %s5246_s14 }
  0x2e   :  { %s5266_s14 = sld [smem:[%s6516_s0 + %s5065_s15]]  }
  0x2f   :  { %68 = vsyncpa [#allocation11], 0 }
  0x30   :  { %69 = vsyncpa [#allocation14], 0 }
  0x31   :  { %70 = vsyncpa [#allocation17], 0 }
  0x32   :  { %71 = vsyncpa [#allocation20], 0 }
  0x33   :  { %72 = vsyncpa [#allocation23], 0 }
  0x34   :  { %73 = vsyncpa [#allocation26], 0 }
  0x35   :  { %74 = vsyncpa [#allocation29], 0 }
  0x36   :  { %75 = vsyncpa [#allocation32], 0 }
  0x37   :  { %76 = vsyncpa [#allocation35], 0 }
  0x38   :  { %77 = vsyncpa [#allocation38], 0 }
  0x39   :  { %78 = vsyncpa [#allocation41], 0 }
  0x3a   :  { %79 = vsyncpa [#allocation12], 0  ;;  %s5066_s22 = smov [#allocation13]  }
  0x3b   :  { %s105_s23 = sshll.u32 %s5066_s22, 4  ;;  %s106_s23 = int_to_ptr.vmem [resolvable:$true] %s105_s23 }
  0x3c   :  { %s4571_s26 = scalar_lea.vmem %s106_s23, 2048  ;;  %p4576_p1 = scmp.lt.s32.totalorder %s106_s23, %s106_s23 }
  0x3d   :  { %p4572_p0 = scmp.ne.s32.totalorder %s106_s23, %s4571_s26  ;;  %p4577_p2 = scmp.lt.s32.totalorder %s4571_s26, %s4571_s26 }
  0x3f   :  { %p4578_p3 = por %p4577_p2, %p4576_p1 }
  0x41   :  { %p4579_p4 = pnand %p4578_p3, %p4572_p0 }
  0x43   :  { %4582 = shalt.err (!%p4579_p4)
}
  0x44   :  { %s5067_s0 = smov 128   ;;  %s5068_s28 = smov 8  }
  0x45   :  { %111 = dma.hbm_to_vmem [thread:$0]  %s5141_s29, 2048, %s106_s23, [#allocation14], %s5067_s0, %s5067_s0, %s5068_s28  }
  0x46   :  { %s5069_s1 = smov [#allocation16]   ;;  %s5070_s7 = smov [#allocation19]  }
  0x47   :  { %s129_s2 = sshll.u32 %s5069_s1, 4  ;;  %s154_s10 = sshll.u32 %s5070_s7, 4  ;;  %s130_s2 = int_to_ptr.vmem [resolvable:$true] %s129_s2  ;;  %s155_s10 = int_to_ptr.vmem [resolvable:$true] %s154_s10 }
  0x48   :  { %s4591_s11 = scalar_lea.vmem %s130_s2, 512  ;;  %p4596_p6 = scmp.lt.s32.totalorder %s130_s2, %s130_s2 }
  0x49   :  { %p4592_p5 = scmp.ne.s32.totalorder %s130_s2, %s4591_s11  ;;  %p4597_p7 = scmp.lt.s32.totalorder %s4591_s11, %s4591_s11 }
  0x4b   :  { %p4598_p8 = por %p4597_p7, %p4596_p6 }
  0x4d   :  { %p4599_p9 = pnand %p4598_p8, %p4592_p5 }
  0x4f   :  { %4602 = shalt.err (!%p4599_p9)
}
  0x50   :  { %135 = dma.hbm_to_vmem [thread:$0]  %s5151_s8, 512, %s130_s2, [#allocation17], %s5067_s0, %s5067_s0, %s5068_s28  }
  0x51   :  { %s4611_s15 = scalar_lea.vmem %s155_s10, 16  ;;  %s4615_s29 = scalar_lea.vmem %s155_s10, 32 }
  0x52   :  { %p4612_p10 = scmp.ne.s32.totalorder %s155_s10, %s4611_s15  ;;  %p4616_p11 = scmp.lt.s32.totalorder %s155_s10, %s155_s10 }
  0x53   :  { %p4617_p12 = scmp.lt.s32.totalorder %s4615_s29, %s4611_s15 }
  0x55   :  { %p4618_p13 = por %p4617_p12, %p4616_p11 }
  0x57   :  { %p4619_p0 = pnand %p4618_p13, %p4612_p10 }
  0x59   :  { %4622 = shalt.err (!%p4619_p0)
}
  0x5a   :  { %157 = dma.hbm_to_vmem [thread:$0]  %s5166_s24, 16, %s155_s10, [#allocation20]  }
  0x5b   :  { %s5071_s16 = smov [#allocation22]   ;;  %s5072_s22 = smov [#allocation25]  }
  0x5c   :  { %s175_s18 = sshll.u32 %s5071_s16, 4  ;;  %s198_s23 = sshll.u32 %s5072_s22, 4  ;;  %s176_s18 = int_to_ptr.vmem [resolvable:$true] %s175_s18  ;;  %s199_s23 = int_to_ptr.vmem [resolvable:$true] %s198_s23 }
  0x5d   :  { %s4631_s26 = scalar_lea.vmem %s176_s18, 512  ;;  %p4636_p2 = scmp.lt.s32.totalorder %s176_s18, %s176_s18 }
  0x5e   :  { %p4632_p1 = scmp.ne.s32.totalorder %s176_s18, %s4631_s26  ;;  %p4637_p3 = scmp.lt.s32.totalorder %s4631_s26, %s4631_s26 }
  0x60   :  { %p4638_p4 = por %p4637_p3, %p4636_p2 }
  0x62   :  { %p4639_p5 = pnand %p4638_p4, %p4632_p1 }
  0x64   :  { %4642 = shalt.err (!%p4639_p5)
}
  0x65   :  { %181 = dma.hbm_to_vmem [thread:$0]  %s5176_s6, 512, %s176_s18, [#allocation23], %s5067_s0, %s5067_s0, %s5068_s28  }
  0x66   :  { %s4651_s8 = scalar_lea.vmem %s199_s23, 16  ;;  %s4655_s24 = scalar_lea.vmem %s199_s23, 32 }
  0x67   :  { %p4652_p6 = scmp.ne.s32.totalorder %s199_s23, %s4651_s8  ;;  %p4656_p7 = scmp.lt.s32.totalorder %s199_s23, %s199_s23 }
  0x68   :  { %p4657_p8 = scmp.lt.s32.totalorder %s4655_s24, %s4651_s8 }
  0x6a   :  { %p4658_p9 = por %p4657_p8, %p4656_p7 }
  0x6c   :  { %p4659_p10 = pnand %p4658_p9, %p4652_p6 }
  0x6e   :  { %4662 = shalt.err (!%p4659_p10)
}
  0x6f   :  { %201 = dma.hbm_to_vmem [thread:$0]  %s5186_s20, 16, %s199_s23, [#allocation26]  }
  0x70   :  { %s5073_s1 = smov [#allocation28]  }
  0x71   :  { %s217_s2 = sshll.u32 %s5073_s1, 4  ;;  %s218_s2 = int_to_ptr.vmem [resolvable:$true] %s217_s2 }
  0x72   :  { %s4671_s7 = scalar_lea.vmem %s218_s2, 1024  ;;  %p4676_p12 = scmp.lt.s32.totalorder %s218_s2, %s218_s2 }
  0x73   :  { %p4672_p11 = scmp.ne.s32.totalorder %s218_s2, %s4671_s7  ;;  %p4677_p13 = scmp.lt.s32.totalorder %s4671_s7, %s4671_s7 }
  0x75   :  { %p4678_p0 = por %p4677_p13, %p4676_p12 }
  0x77   :  { %p4679_p1 = pnand %p4678_p0, %p4672_p11 }
  0x79   :  { %4682 = shalt.err (!%p4679_p1)
}
  0x7a   :  { %s5074_s6 = smov 256   ;;  %s5075_s10 = smov 16  }
  0x7b   :  { %223 = dma.hbm_to_vmem [thread:$0]  %s5196_s4, 1024, %s218_s2, [#allocation29], %s5074_s6, %s5074_s6, %s5075_s10  }
  0x7c   :  { %s5076_s11 = smov [#allocation31]   ;;  %s5077_s20 = smov [#allocation34]  }
  0x7d   :  { %s242_s15 = sshll.u32 %s5076_s11, 4  ;;  %s262_s29 = sshll.u32 %s5077_s20, 4  ;;  %s243_s15 = int_to_ptr.vmem [resolvable:$true] %s242_s15  ;;  %s263_s29 = int_to_ptr.vmem [resolvable:$true] %s262_s29 }
  0x7e   :  { %s4691_s16 = scalar_lea.vmem %s243_s15, 32  ;;  %p4696_p3 = scmp.lt.s32.totalorder %s243_s15, %s243_s15 }
  0x7f   :  { %p4692_p2 = scmp.ne.s32.totalorder %s243_s15, %s4691_s16  ;;  %p4697_p4 = scmp.lt.s32.totalorder %s4691_s16, %s4691_s16 }
  0x81   :  { %p4698_p5 = por %p4697_p4, %p4696_p3 }
  0x83   :  { %p4699_p6 = pnand %p4698_p5, %p4692_p2 }
  0x85   :  { %4702 = shalt.err (!%p4699_p6)
}
  0x86   :  { %245 = dma.hbm_to_vmem [thread:$0]  %s5206_s9, 32, %s243_s15, [#allocation32]  }
  0x87   :  { %s4711_s18 = scalar_lea.vmem %s263_s29, 16  ;;  %s4715_s22 = scalar_lea.vmem %s263_s29, 32 }
  0x88   :  { %p4712_p7 = scmp.ne.s32.totalorder %s263_s29, %s4711_s18  ;;  %p4716_p8 = scmp.lt.s32.totalorder %s263_s29, %s263_s29 }
  0x89   :  { %p4717_p9 = scmp.lt.s32.totalorder %s4715_s22, %s4711_s18 }
  0x8b   :  { %p4718_p10 = por %p4717_p9, %p4716_p8 }
  0x8d   :  { %p4719_p11 = pnand %p4718_p10, %p4712_p7 }
  0x8f   :  { %4722 = shalt.err (!%p4719_p11)
}
  0x90   :  { %265 = dma.hbm_to_vmem [thread:$0]  %s5216_s21, 16, %s263_s29, [#allocation35]  }
  0x91   :  { %s5078_s4 = smov [#allocation37]   ;;  %s5079_s26 = smov [#allocation40]  }
  0x92   :  { %s283_s23 = sshll.u32 %s5078_s4, 4  ;;  %s310_s8 = sshll.u32 %s5079_s26, 4  ;;  %s284_s23 = int_to_ptr.vmem [resolvable:$true] %s283_s23  ;;  %s311_s8 = int_to_ptr.vmem [resolvable:$true] %s310_s8 }
  0x93   :  { %s4731_s24 = scalar_lea.vmem %s284_s23, 512  ;;  %p4736_p13 = scmp.lt.s32.totalorder %s284_s23, %s284_s23 }
  0x94   :  { %p4732_p12 = scmp.ne.s32.totalorder %s284_s23, %s4731_s24  ;;  %p4737_p0 = scmp.lt.s32.totalorder %s4731_s24, %s4731_s24 }
  0x96   :  { %p4738_p1 = por %p4737_p0, %p4736_p13 }
  0x98   :  { %p4739_p2 = pnand %p4738_p1, %p4732_p12 }
  0x9a   :  { %4742 = shalt.err (!%p4739_p2)
}
  0x9b   :  { %289 = dma.hbm_to_vmem [thread:$0]  %s5231_s5, 512, %s284_s23, [#allocation38], %s5067_s0, %s5067_s0, %s5068_s28  }
  0x9c   :  { %s4751_s9 = scalar_lea.vmem %s311_s8, 16  ;;  %s4755_s21 = scalar_lea.vmem %s311_s8, 32 }
  0x9d   :  { %p4752_p3 = scmp.ne.s32.totalorder %s311_s8, %s4751_s9  ;;  %p4756_p4 = scmp.lt.s32.totalorder %s311_s8, %s311_s8 }
  0x9e   :  { %p4757_p5 = scmp.lt.s32.totalorder %s4755_s21, %s4751_s9 }
  0xa0   :  { %p4758_p6 = por %p4757_p5, %p4756_p4 }
  0xa2   :  { %p4759_p7 = pnand %p4758_p6, %p4752_p3 }
  0xa4   :  { %4762 = shalt.err (!%p4759_p7)
}
  0xa5   :  { %313 = dma.hbm_to_vmem [thread:$0]  %s5251_s27, 16, %s311_s8, [#allocation41]  }
  0xa6   :  { %s5080_s1 = smov [#allocation10]   ;;  %s5081_s7 = smov [#allocation15]  }
  0xa7   :  { %s96_s2 = sshll.u32 %s5080_s1, 4  ;;  %s117_s11 = sshll.u32 %s5081_s7, 4  ;;  %s97_s2 = int_to_ptr.vmem [resolvable:$true] %s96_s2  ;;  %s118_s11 = int_to_ptr.vmem [resolvable:$true] %s117_s11 }
  0xa8   :  { %s4771_s15 = scalar_lea.vmem %s97_s2, 128  ;;  %p4776_p9 = scmp.lt.s32.totalorder %s97_s2, %s97_s2 }
  0xa9   :  { %p4772_p8 = scmp.ne.s32.totalorder %s97_s2, %s4771_s15  ;;  %p4777_p10 = scmp.lt.s32.totalorder %s4771_s15, %s4771_s15 }
  0xab   :  { %p4778_p11 = por %p4777_p10, %p4776_p9 }
  0xad   :  { %p4779_p12 = pnand %p4778_p11, %p4772_p8 }
  0xaf   :  { %4782 = shalt.err (!%p4779_p12)
}
  0xb0   :  { %99 = dma.hbm_to_vmem [thread:$0]  %s5136_s25, 128, %s97_s2, [#allocation11]  }
  0xb1   :  { %s4791_s5 = scalar_lea.vmem %s118_s11, 512  ;;  %p4796_p0 = scmp.lt.s32.totalorder %s118_s11, %s118_s11 }
  0xb2   :  { %p4792_p13 = scmp.ne.s32.totalorder %s118_s11, %s4791_s5  ;;  %p4797_p1 = scmp.lt.s32.totalorder %s4791_s5, %s4791_s5 }
  0xb4   :  { %p4798_p2 = por %p4797_p1, %p4796_p0 }
  0xb6   :  { %p4799_p3 = pnand %p4798_p2, %p4792_p13 }
  0xb8   :  { %4802 = shalt.err (!%p4799_p3)
}
  0xb9   :  { %123 = dma.hbm_to_vmem [thread:$0]  %s5146_s3, 512, %s118_s11, [#allocation14], %s5067_s0, %s5067_s0, %s5068_s28  }
  0xba   :  { %s5082_s27 = smov [#allocation18]   ;;  %s5083_s29 = smov [#allocation21]  }
  0xbb   :  { %s144_s20 = sshll.u32 %s5082_s27, 4  ;;  %s163_s16 = sshll.u32 %s5083_s29, 4  ;;  %s145_s20 = int_to_ptr.vmem [resolvable:$true] %s144_s20  ;;  %s164_s16 = int_to_ptr.vmem [resolvable:$true] %s163_s16 }
  0xbc   :  { %s4811_s18 = scalar_lea.vmem %s145_s20, 16  ;;  %s4815_s25 = scalar_lea.vmem %s145_s20, 32 }
  0xbd   :  { %p4812_p4 = scmp.ne.s32.totalorder %s145_s20, %s4811_s18  ;;  %p4816_p5 = scmp.lt.s32.totalorder %s145_s20, %s145_s20 }
  0xbe   :  { %p4817_p6 = scmp.lt.s32.totalorder %s4815_s25, %s4811_s18 }
  0xc0   :  { %p4818_p7 = por %p4817_p6, %p4816_p5 }
  0xc2   :  { %p4819_p8 = pnand %p4818_p7, %p4812_p4 }
  0xc4   :  { %4822 = shalt.err (!%p4819_p8)
}
  0xc5   :  { %147 = dma.hbm_to_vmem [thread:$0]  %s5161_s19, 16, %s145_s20, [#allocation17]  }
  0xc6   :  { %s4831_s22 = scalar_lea.vmem %s164_s16, 512  ;;  %p4836_p10 = scmp.lt.s32.totalorder %s164_s16, %s164_s16 }
  0xc7   :  { %p4832_p9 = scmp.ne.s32.totalorder %s164_s16, %s4831_s22  ;;  %p4837_p11 = scmp.lt.s32.totalorder %s4831_s22, %s4831_s22 }
  0xc9   :  { %p4838_p12 = por %p4837_p11, %p4836_p10 }
  0xcb   :  { %p4839_p13 = pnand %p4838_p12, %p4832_p9 }
  0xcd   :  { %4842 = shalt.err (!%p4839_p13)
}
  0xce   :  { %169 = dma.hbm_to_vmem [thread:$0]  %s5171_s30, 512, %s164_s16, [#allocation20], %s5067_s0, %s5067_s0, %s5068_s28  }
  0xcf   :  { %s5084_s3 = smov [#allocation24]   ;;  %s5085_s23 = smov [#allocation27]  }
  0xd0   :  { %s188_s4 = sshll.u32 %s5084_s3, 4  ;;  %s208_s26 = sshll.u32 %s5085_s23, 4  ;;  %s189_s4 = int_to_ptr.vmem [resolvable:$true] %s188_s4  ;;  %s209_s26 = int_to_ptr.vmem [resolvable:$true] %s208_s26 }
  0xd1   :  { %s4851_s8 = scalar_lea.vmem %s189_s4, 16  ;;  %s4855_s19 = scalar_lea.vmem %s189_s4, 32 }
  0xd2   :  { %p4852_p0 = scmp.ne.s32.totalorder %s189_s4, %s4851_s8  ;;  %p4856_p1 = scmp.lt.s32.totalorder %s189_s4, %s189_s4 }
  0xd3   :  { %p4857_p2 = scmp.lt.s32.totalorder %s4855_s19, %s4851_s8 }
  0xd5   :  { %p4858_p3 = por %p4857_p2, %p4856_p1 }
  0xd7   :  { %p4859_p4 = pnand %p4858_p3, %p4852_p0 }
  0xd9   :  { %4862 = shalt.err (!%p4859_p4)
}
  0xda   :  { %191 = dma.hbm_to_vmem [thread:$0]  %s5181_s12, 16, %s189_s4, [#allocation23]  }
  0xdb   :  { %s4871_s24 = scalar_lea.vmem %s209_s26, 16  ;;  %s4875_s9 = scalar_lea.vmem %s209_s26, 32 }
  0xdc   :  { %p4872_p5 = scmp.ne.s32.totalorder %s209_s26, %s4871_s24  ;;  %p4876_p6 = scmp.lt.s32.totalorder %s209_s26, %s209_s26 }
  0xdd   :  { %p4877_p7 = scmp.lt.s32.totalorder %s4875_s9, %s4871_s24 }
  0xdf   :  { %p4878_p8 = por %p4877_p7, %p4876_p6 }
  0xe1   :  { %p4879_p9 = pnand %p4878_p8, %p4872_p5 }
  0xe3   :  { %4882 = shalt.err (!%p4879_p9)
}
  0xe4   :  { %s6559_s30 = sld [smem:[#allocation62_spill]]  ;;  %s5086_s21 = smov [#allocation30]  }
  0xe5   :  { %s229_s1 = sshll.u32 %s5086_s21, 4  ;;  %s5087_s2 = smov [#allocation33]   ;;  %s230_s1 = int_to_ptr.vmem [resolvable:$true] %s229_s1 }
  0xe6   :  { %s252_s7 = sshll.u32 %s5087_s2, 4  ;;  %s4891_s11 = scalar_lea.vmem %s230_s1, 2048  ;;  %s253_s7 = int_to_ptr.vmem [resolvable:$true] %s252_s7 }
  0xe7   :  { %p4892_p10 = scmp.ne.s32.totalorder %s230_s1, %s4891_s11  ;;  %p4896_p11 = scmp.lt.s32.totalorder %s230_s1, %s230_s1 }
  0xe8   :  { %p4897_p12 = scmp.lt.s32.totalorder %s4891_s11, %s4891_s11 }
  0xea   :  { %211 = dma.hbm_to_vmem [thread:$0]  %s6559_s30, 16, %s209_s26, [#allocation26]  }
  0xeb   :  { %p4898_p13 = por %p4897_p12, %p4896_p11 }
  0xed   :  { %p4899_p0 = pnand %p4898_p13, %p4892_p10 }
  0xef   :  { %4902 = shalt.err (!%p4899_p0)
}
  0xf0   :  { %s6560_s12 = sld [smem:[#allocation63_spill]]  ;;  %s4911_s15 = scalar_lea.vmem %s253_s7, 16 }
  0xf1   :  { %p4912_p1 = scmp.ne.s32.totalorder %s253_s7, %s4911_s15  ;;  %s4915_s5 = scalar_lea.vmem %s253_s7, 32 }
  0xf2   :  { %p4916_p2 = scmp.lt.s32.totalorder %s253_s7, %s253_s7  ;;  %p4917_p3 = scmp.lt.s32.totalorder %s4915_s5, %s4911_s15 }
  0xf4   :  { %p4918_p4 = por %p4917_p3, %p4916_p2 }
  0xf6   :  { %235 = dma.hbm_to_vmem [thread:$0]  %s6560_s12, 2048, %s230_s1, [#allocation29], %s5074_s6, %s5074_s6, %s5075_s10  }
  0xf7   :  { %p4919_p5 = pnand %p4918_p4, %p4912_p1 }
  0xf9   :  { %4922 = shalt.err (!%p4919_p5)
}
  0xfa   :  { %s6561_s27 = sld [smem:[#allocation64_spill]]  ;;  %s5088_s20 = smov [#allocation36]  }
  0xfb   :  { %s274_s29 = sshll.u32 %s5088_s20, 4  ;;  %s5089_s16 = smov [#allocation39]   ;;  %s275_s29 = int_to_ptr.vmem [resolvable:$true] %s274_s29 }
  0xfc   :  { %s296_s18 = sshll.u32 %s5089_s16, 4  ;;  %s4931_s25 = scalar_lea.vmem %s275_s29, 16  ;;  %s297_s18 = int_to_ptr.vmem [resolvable:$true] %s296_s18 }
  0xfd   :  { %p4932_p6 = scmp.ne.s32.totalorder %s275_s29, %s4931_s25  ;;  %s4935_s22 = scalar_lea.vmem %s275_s29, 32 }
  0xfe   :  { %p4936_p7 = scmp.lt.s32.totalorder %s275_s29, %s275_s29  ;;  %p4937_p8 = scmp.lt.s32.totalorder %s4935_s22, %s4931_s25 }
 0x100   :  { %255 = dma.hbm_to_vmem [thread:$0]  %s6561_s27, 16, %s253_s7, [#allocation32]  }
 0x101   :  { %p4938_p9 = por %p4937_p8, %p4936_p7 }
 0x103   :  { %p4939_p10 = pnand %p4938_p9, %p4932_p6 }
 0x105   :  { %4942 = shalt.err (!%p4939_p10)
}
 0x106   :  { %s6562_s6 = sld [smem:[#allocation66_spill]]  ;;  %s4951_s10 = scalar_lea.vmem %s297_s18, 16 }
 0x107   :  { %p4952_p11 = scmp.ne.s32.totalorder %s297_s18, %s4951_s10  ;;  %s4955_s3 = scalar_lea.vmem %s297_s18, 32 }
 0x108   :  { %p4956_p12 = scmp.lt.s32.totalorder %s297_s18, %s297_s18  ;;  %p4957_p13 = scmp.lt.s32.totalorder %s4955_s3, %s4951_s10 }
 0x10a   :  { %p4958_p0 = por %p4957_p13, %p4956_p12 }
 0x10c   :  { %277 = dma.hbm_to_vmem [thread:$0]  %s6562_s6, 16, %s275_s29, [#allocation35]  }
 0x10d   :  { %p4959_p1 = pnand %p4958_p0, %p4952_p11 }
 0x10f   :  { %4962 = shalt.err (!%p4959_p1)
}
 0x110   :  { %s6563_s4 = sld [smem:[#allocation67_spill]]  ;;  %s5090_s23 = smov [#allocation42]  }
 0x111   :  { %s319_s26 = sshll.u32 %s5090_s23, 4  ;;  %s320_s26 = int_to_ptr.vmem [resolvable:$true] %s319_s26 }
 0x112   :  { %s4971_s8 = scalar_lea.vmem %s320_s26, 512  ;;  %p4976_p3 = scmp.lt.s32.totalorder %s320_s26, %s320_s26 }
 0x113   :  { %p4972_p2 = scmp.ne.s32.totalorder %s320_s26, %s4971_s8  ;;  %p4977_p4 = scmp.lt.s32.totalorder %s4971_s8, %s4971_s8 }
 0x115   :  { %p4978_p5 = por %p4977_p4, %p4976_p3 }
 0x116   :  { %299 = dma.hbm_to_vmem [thread:$0]  %s6563_s4, 16, %s297_s18, [#allocation38]  }
 0x117   :  { %p4979_p6 = pnand %p4978_p5, %p4972_p2 }
 0x119   :  { %4982 = shalt.err (!%p4979_p6)
}
 0x11a   :  { %325 = dma.hbm_to_vmem [thread:$0]  %s5256_s13, 512, %s320_s26, [#allocation41], %s5067_s0, %s5067_s0, %s5068_s28  }
 0x11b   :  { %5007 = dma.done.wait [#allocation11], 128  }
 0x11c   :  { %5008 = vsyncadd [#allocation11], 4294967168 }
 0x11d   :  { %5009 = dma.done.wait [#allocation14], 2560  }
 0x11e   :  { %5010 = vsyncadd [#allocation14], 4294964736 }
 0x11f   :  { %5011 = dma.done.wait [#allocation17], 528  }
 0x120   :  { %5012 = vsyncadd [#allocation17], 4294966768 }
 0x121   :  { %5013 = dma.done.wait [#allocation20], 528  }
 0x122   :  { %5014 = vsyncadd [#allocation20], 4294966768 }
 0x123   :  { %5015 = dma.done.wait [#allocation23], 528  }
 0x124   :  { %5016 = vsyncadd [#allocation23], 4294966768 }
 0x125   :  { %5017 = dma.done.wait [#allocation26], 32  }
 0x126   :  { %5018 = vsyncadd [#allocation26], 4294967264 }
 0x127   :  { %5019 = dma.done.wait [#allocation29], 3072  }
 0x128   :  { %5020 = vsyncadd [#allocation29], 4294964224 }
 0x129   :  { %5021 = dma.done.wait [#allocation32], 48  }
 0x12a   :  { %5022 = vsyncadd [#allocation32], 4294967248 }
 0x12b   :  { %5023 = dma.done.wait [#allocation35], 32  }
 0x12c   :  { %5024 = vsyncadd [#allocation35], 4294967264 }
 0x12d   :  { %5025 = dma.done.wait [#allocation38], 528  }
 0x12e   :  { %5026 = vsyncadd [#allocation38], 4294966768 }
 0x12f   :  { %5027 = dma.done.wait [#allocation41], 528  }
 0x130   :  { %5028 = vsyncadd [#allocation41], 4294966768  ;;  %s6564_s13 = sld [smem:[#allocation61_spill]]  ;;  %v5091_v0 = vmov 0.0   ;;  %vm5092_vm0 = vmmov 0   ;;  %vm455_vm1 = vcmask 261120   ;;  %v391_v24 = vlaneseq }
 0x131   :  { %4203 = vmatprep.subr.mxu0 %v5091_v0  ;;  %s6565_s19 = sld [smem:[#allocation65_spill]]  ;;  %4219 = vmatprep.mubr.msk.f32.mxu0 %vm5092_vm0, %v5091_v0  ;;  %v5319_v2 = vld [vmem:[#allocation24] ss:$0 sm:$0xff]  ;;  %v5321_v3 = vld [vmem:[#allocation40] ss:$0 sm:$0xff]  ;;  %vm488_vm2 = vcmask 523264  }
 0x132   :  { %4222 = vmatprep.subr.mxu1 %v5091_v0  ;;  %4230 = vmatprep.mubr.msk.f32.mxu1 %vm5092_vm0, %v5091_v0  ;;  %6567 = vst [vmem:[#allocation71_spill] sm:$0xff] %v5319_v2  ;;  %6568 = vst [vmem:[#allocation72_spill] sm:$0xff] %v5321_v3  ;;  %v5324_v4 = vld [vmem:[%s5261_s17] ss:$0 sm:$0xff]  ;;  %v4093_v5 = vld [vmem:[#allocation18] ss:$0 sm:$0xff] }
 0x133   :  { %6569 = vst [vmem:[#allocation73_spill] sm:$0xff] %v5324_v4  ;;  %v4094_v6 = vld [vmem:[#allocation19] ss:$0 sm:$0xff]  ;;  %456 = vst.msk [vmem:[#allocation2] sm:$0xff] %vm455_vm1, %v4093_v5  ;;  %v4095_v7 = vld [vmem:[#allocation25] ss:$0 sm:$0xff] }
 0x134   :  { %464 = vst.msk [vmem:[#allocation3] sm:$0xff] %vm455_vm1, %v4094_v6  ;;  %v4096_v8 = vld [vmem:[#allocation27] ss:$0 sm:$0xff]  ;;  %472 = vst.msk [vmem:[#allocation4] sm:$0xff] %vm455_vm1, %v4095_v7  ;;  %v4097_v12 = vld [vmem:[#allocation33] ss:$0 sm:$0xff] }
 0x135   :  { %480 = vst.msk [vmem:[#allocation5] sm:$0xff] %vm455_vm1, %v4096_v8  ;;  %v4098_v13 = vld [vmem:[#allocation34] ss:$0 sm:$0xff]  ;;  %v583_v21 = vld [vmem:[#allocation37 + $0x10] sm:$0xff]  ;;  %v582_v22 = vld [vmem:[#allocation37 + $0x8] sm:$0xff]  ;;  %v5342_v25 = vshrl.u32 %v391_v24, 7 }
 0x136   :  { %v5317_v1 = vld [vmem:[%s6564_s13] ss:$0 sm:$0xff]  ;;  %489 = vst.msk [vmem:[#allocation6] sm:$0xff] %vm488_vm2, %v4097_v12  ;;  %497 = vst.msk [vmem:[#allocation7] sm:$0xff] %vm488_vm2, %v4098_v13  ;;  %v584_v15 = vld [vmem:[#allocation37 + $0x18] sm:$0xff]  ;;  %s6572_s17 = sld [smem:[#allocation59_spill]] }
 0x137   :  { %6566 = vst [vmem:[#allocation70_spill] sm:$0xff] %v5317_v1  ;;  %v506_v9 = vld [vmem:[%s6565_s19 + $0x38] sm:$0xff]  ;;  %v505_v10 = vld [vmem:[%s6565_s19 + $0x30] sm:$0xff]  ;;  %v504_v11 = vld [vmem:[%s6565_s19 + $0x28] sm:$0xff]  ;;  %4223 = vmatpush3.msra.mxu1 %v584_v15  ;;  %v5349_v28 = vsub.s32 0, %v5342_v25  ;;  %v5352_v29 = vsub.s32 1, %v5342_v25 }
 0x138   :  { %4204 = vmatpush3.msra.mxu0 %v506_v9  ;;  %v503_v14 = vld [vmem:[%s6565_s19 + $0x20] sm:$0xff]  ;;  %v502_v16 = vld [vmem:[%s6565_s19 + $0x18] sm:$0xff]  ;;  %4224 = vmatprep.subr.mxu1 %v5091_v0  ;;  %v501_v17 = vld [vmem:[%s6565_s19 + $0x10] sm:$0xff]  ;;  %v5359_v32 = vsub.s32 2, %v5342_v25  ;;  %v5368_v36 = vsub.s32 3, %v5342_v25  ;;  %v5373_v38 = vsub.s32 4, %v5342_v25 }
 0x139   :  { %4205 = vmatprep.subr.mxu0 %v5091_v0  ;;  %v500_v18 = vld [vmem:[%s6565_s19 + $0x8] sm:$0xff]  ;;  %v499_v19 = vld [vmem:[%s6565_s19] sm:$0xff]  ;;  %4225 = vmatpush3.msra.mxu1 %v583_v21  ;;  %v5346_v27 = vld [vmem:[#allocation31] sm:$0x3]  ;;  %v5378_v40 = vsub.s32 5, %v5342_v25  ;;  %v5383_v42 = vsub.s32 6, %v5342_v25 }
 0x13a   :  { %4206 = vmatpush3.msra.mxu0 %v505_v10  ;;  %4226 = vmatprep.subr.mxu1 %v5091_v0  ;;  %v581_v23 = vld [vmem:[#allocation37] sm:$0xff]  ;;  %6570 = vst [vmem:[#allocation74_spill] sm:$0xff] %v5346_v27  ;;  %v5387_v44 = vld [vmem:[#allocation36] ss:$0 sm:$0xff]  ;;  %v5093_v49 = vmov 1966171168  }
 0x13b   :  { %4207 = vmatprep.subr.mxu0 %v5091_v0  ;;  %4227 = vmatpush3.msra.mxu1 %v582_v22  ;;  %v5344_v26 = vld [vmem:[#allocation10] sm:$0xff]  ;;  %6571 = vst [vmem:[#allocation75_spill] sm:$0xff] %v5387_v44  ;;  %v693_v50 = vunpack.c.l.s4 %v5093_v49  ;;  %v5391_v52 = vld [vmem:[#allocation39] ss:$0 sm:$0xff]  ;;  %vm1839_vm3 = vcmask 7168   ;;  %vm1038_vm4 = vcmask 130112  }
 0x13c   :  { %4208 = vmatpush3.msra.mxu0 %v504_v11  ;;  %4228 = vmatprep.subr.mxu1 %v5091_v0  ;;  %v848_v30 = vrot.slane %v5344_v26, %v5349_v28  ;;  %v859_v34 = vrot.slane %v5344_v26, %v5352_v29  ;;  %v870_v35 = vrot.slane %v5344_v26, %v5359_v32  ;;  %v658_v62 = vld [vmem:[%s6572_s17] sm:$0xff]  ;;  %v660_v6 = vld [vmem:[%s6572_s17 + $0x10] sm:$0xff]  ;;  %v659_v7 = vld [vmem:[%s6572_s17 + $0x8] sm:$0xff]  ;;  %vm1103_vm5 = vcmask 1041409   ;;  %s6582_s24 = sld [smem:[#allocation60_spill]]  ;;  %s5884_s9 = smov 0  }
 0x13d   :  { %4209 = vmatprep.subr.mxu0 %v5091_v0  ;;  %v498_v20 = vld [vmem:[#allocation6] sm:$0xff]  ;;  %4229 = vmatpush3.msra.mxu1 %v581_v23  ;;  %v881_v37 = vrot.slane %v5344_v26, %v5368_v36  ;;  %v892_v39 = vrot.slane %v5344_v26, %v5373_v38  ;;  %v903_v41 = vrot.slane %v5344_v26, %v5378_v40  ;;  %v694_v51 = vunpack.c.0.s8 %v693_v50  ;;  %v661_v10 = vld [vmem:[%s6572_s17 + $0x18] sm:$0xff] }
 0x13e   :  { %4210 = vmatpush3.msra.mxu0 %v503_v14  ;;  %854 = vbcast.lane.b32.xlu1 %v848_v30, 264  ;;  %v914_v43 = vrot.slane %v5344_v26, %v5383_v42  ;;  %6573 = vst [vmem:[#allocation76_spill] sm:$0xff] %v5391_v52  ;;  %v665_v50 = vld [vmem:[%s6572_s17 + $0x38] sm:$0xff]  ;;  %vm1105_vm6 = vcmask 1042434   ;;  %vm1107_vm7 = vcmask 1043459   ;;  %vm1109_vm8 = vcmask 1044484  }
 0x13f   :  { %4211 = vmatprep.subr.mxu0 %v5091_v0  ;;  %850 = vbcast.lane.b32.xlu0 %v848_v30, 256  ;;  %v5394_v53 = vsub.s32 %v694_v51, %v5342_v25  ;;  %vm1111_vm9 = vcmask 1045509   ;;  %vm1113_vm10 = vcmask 1046534   ;;  %vm1115_vm11 = vcmask 1047559  }
 0x140   :  { %4212 = vmatpush3.msra.mxu0 %v502_v16  ;;  %v662_v16 = vld [vmem:[%s6572_s17 + $0x20] sm:$0xff]  ;;  %vm1118_vm12 = vcmask 130048  }
 0x141   :  { %4213 = vmatprep.subr.mxu0 %v5091_v0  ;;  %6574 = vst [vmem:[#allocation77_spill] sm:$0xff] %v5394_v53 }
 0x142   :  { %4214 = vmatpush3.msra.mxu0 %v501_v17  ;;  %861 = vbcast.lane.b32.xlu1 %v859_v34, 256 }
 0x143   :  { %4215 = vmatprep.subr.mxu0 %v5091_v0  ;;  %872 = vbcast.lane.b32.xlu0 %v870_v35, 256 }
 0x144   :  { %4216 = vmatpush3.msra.mxu0 %v500_v18 }
 0x145   :  { %4217 = vmatprep.subr.mxu0 %v5091_v0 }
 0x146   :  { %4218 = vmatpush3.msra.mxu0 %v499_v19  ;;  %865 = vbcast.lane.b32.xlu1 %v859_v34, 264  ;;  %v666_v34 = vld [vmem:[%s6572_s17 + $0x40] sm:$0xff] }
 0x147   :  { %4220 = vmatmul.mubr.msk.f32.vlgmr.msra.gmra.mxu0 %vm488_vm2, %v498_v20  ;;  %883 = vbcast.lane.b32.xlu0 %v881_v37, 256  ;;  %v663_v20 = vld [vmem:[%s6572_s17 + $0x28] sm:$0xff] }
 0x14a   :  { %876 = vbcast.lane.b32.xlu1 %v870_v35, 264 }
 0x14b   :  { %894 = vbcast.lane.b32.xlu0 %v892_v39, 256 }
 0x14e   :  { %887 = vbcast.lane.b32.xlu1 %v881_v37, 264 }
 0x14f   :  { %905 = vbcast.lane.b32.xlu0 %v903_v41, 256 }
 0x152   :  { %898 = vbcast.lane.b32.xlu1 %v892_v39, 264  ;;  %v667_v39 = vld [vmem:[%s6572_s17 + $0x48] sm:$0xff] }
 0x153   :  { %916 = vbcast.lane.b32.xlu0 %v914_v43, 256 }
 0x156   :  { %909 = vbcast.lane.b32.xlu1 %v903_v41, 264 }
 0x15a   :  { %920 = vbcast.lane.b32.xlu1 %v914_v43, 264 }
 0x207   :  { %v576_v45 = vpop.f32.mrf.mxu0 }
 0x208   :  { %v577_v46 = vadd.f32 %v5387_v44, %v576_v45 }
 0x209   :  { %v4221_v47 = vpop.f32.mrf.mxu0 }
 0x20a   :  { %v580_v48 = vmax.f32 %v577_v46, 0.0  ;;  %v664_v47 = vld [vmem:[%s6572_s17 + $0x30] sm:$0xff] }
 0x20c   :  { %4231 = vmatmul.mubr.msk.f32.vlgmr.msra.gmra.mxu1 %vm455_vm1, %v580_v48 }
 0x2cc   :  { %v654_v54 = vpop.f32.mrf.mxu1 }
 0x2cd   :  { %v655_v55 = vadd.f32 %v5391_v52, %v654_v54 }
 0x2ce   :  { %v4232_v56 = vpop.f32.mrf.mxu1 }
 0x2cf   :  { %v691_v57 = vcombine.high %v655_v55, %v655_v55  ;;  %v698_v58 = vrot.slane %v655_v55, %v5394_v53 }
 0x2d1   :  { %v706_v59 = vcombine.high %v698_v58, %v698_v58  ;;  %v714_v60 = vrot.slane %v698_v58, %v5394_v53  ;;  %v705_v61 = vrot.slane %v691_v57, %v5394_v53  ;;  %v5094_v57 = vmov 0   ;;  %v668_v58 = vld [vmem:[%s6572_s17 + $0x50] sm:$0xff] }
 0x2d2   :  { %4459 = vset.pattern.permute.xlu0 %v5094_v57  ;;  %1840 = vst.msk [vmem:[#allocation9] sm:$0xff] %vm1839_vm3, %v5094_v57  ;;  %4460 = vset.pattern.permute.xlu1 %v5094_v57 }
 0x2d3   :  { %v743_v63 = vrot.slane %v714_v60, %v5349_v28  ;;  %v728_v0 = vrot.slane %v706_v59, %v5394_v53  ;;  %v736_v5 = vcombine.high %v714_v60, %v714_v60  ;;  %v721_v11 = vrot.slane %v705_v61, %v5394_v53 }
 0x2d4   :  { %v707_v19 = vcombine.high %v705_v61, %v705_v61  ;;  %v669_v61 = vld [vmem:[%s6572_s17 + $0x58] sm:$0xff] }
 0x2d5   :  { %v780_v8 = vmul.f32 %v743_v63, %v658_v62  ;;  %v747_v9 = vrot.slane %v728_v0, %v5349_v28  ;;  %v781_v14 = vmul.f32 %v743_v63, %v659_v7  ;;  %v751_v15 = vrot.slane %v736_v5, %v5349_v28 }
 0x2d6   :  { %v759_v23 = vrot.slane %v721_v11, %v5349_v28  ;;  %v738_v30 = vcombine.high %v728_v0, %v728_v0  ;;  %v735_v46 = vrot.slane %v707_v19, %v5394_v53  ;;  %v737_v56 = vcombine.high %v721_v11, %v721_v11 }
 0x2d7   :  { %v796_v12 = vsel %vm455_vm1, %v780_v8, 0.0  ;;  %v782_v13 = vmul.f32 %v747_v9, %v660_v6  ;;  %v783_v18 = vmul.f32 %v747_v9, %v661_v10  ;;  %v799_v21 = vsel %vm455_vm1, %v781_v14, 0.0  ;;  %v670_v6 = vld [vmem:[%s6572_s17 + $0x60] sm:$0xff]  ;;  %v671_v9 = vld [vmem:[%s6572_s17 + $0x68] sm:$0xff] }
 0x2d8   :  { %797 = vadd.xlane.f32.xlu0 %v796_v12  ;;  %v784_v22 = vmul.f32 %v751_v15, %v662_v16  ;;  %v785_v37 = vmul.f32 %v751_v15, %v663_v20  ;;  %v788_v43 = vmul.f32 %v759_v23, %v666_v34  ;;  %v755_v45 = vrot.slane %v738_v30, %v5349_v28  ;;  %v673_v16 = vld [vmem:[%s6572_s17 + $0x78] sm:$0xff]  ;;  %v5449_v34 = vpop.permute.xlu1 %854 }
 0x2d9   :  { %v802_v17 = vsel %vm455_vm1, %v782_v13, 0.0  ;;  %v805_v35 = vsel %vm455_vm1, %v783_v18, 0.0  ;;  %v789_v49 = vmul.f32 %v759_v23, %v667_v39  ;;  %v763_v55 = vrot.slane %v735_v46, %v5349_v28  ;;  %v672_v13 = vld [vmem:[%s6572_s17 + $0x70] sm:$0xff] }
 0x2da   :  { %803 = vadd.xlane.f32.xlu1 %v802_v17  ;;  %v808_v41 = vsel %vm455_vm1, %v784_v22, 0.0  ;;  %v811_v48 = vsel %vm455_vm1, %v785_v37, 0.0  ;;  %v820_v51 = vsel %vm455_vm1, %v788_v43, 0.0  ;;  %v786_v54 = vmul.f32 %v755_v45, %v664_v47  ;;  %v5453_v37 = vpop.permute.xlu0 %850 }
 0x2db   :  { %v823_v59 = vsel %vm455_vm1, %v789_v49, 0.0  ;;  %v787_v60 = vmul.f32 %v755_v45, %v665_v50  ;;  %v790_v63 = vmul.f32 %v763_v55, %v668_v58  ;;  %v767_v0 = vrot.slane %v737_v56, %v5349_v28 }
 0x2dc   :  { %800 = vadd.xlane.f32.xlu0 %v799_v21  ;;  %v814_v62 = vsel %vm455_vm1, %v786_v54, 0.0  ;;  %v739_v5 = vcombine.high %v735_v46, %v735_v46  ;;  %v791_v8 = vmul.f32 %v763_v55, %v669_v61  ;;  %v5445_v23 = vsub.s32 7, %v5342_v25 }
 0x2dd   :  { %v817_v7 = vsel %vm455_vm1, %v787_v60, 0.0  ;;  %v826_v10 = vsel %vm455_vm1, %v790_v63, 0.0  ;;  %v792_v11 = vmul.f32 %v767_v0, %v670_v6  ;;  %v793_v15 = vmul.f32 %v767_v0, %v671_v9 }
 0x2de   :  { %806 = vadd.xlane.f32.xlu1 %v805_v35  ;;  %v771_v12 = vrot.slane %v739_v5, %v5349_v28  ;;  %v829_v14 = vsel %vm455_vm1, %v791_v8, 0.0  ;;  %v925_v30 = vrot.slane %v5344_v26, %v5445_v23  ;;  %v5451_v35 = vpop.permute.xlu1 %861 }
 0x2df   :  { %v832_v17 = vsel %vm455_vm1, %v792_v11, 0.0  ;;  %v835_v19 = vsel %vm455_vm1, %v793_v15, 0.0 }
 0x2e0   :  { %809 = vadd.xlane.f32.xlu0 %v808_v41  ;;  %v794_v18 = vmul.f32 %v771_v12, %v672_v13  ;;  %v795_v20 = vmul.f32 %v771_v12, %v673_v16  ;;  %v5457_v41 = vpop.permute.xlu0 %872 }
 0x2e2   :  { %812 = vadd.xlane.f32.xlu1 %v811_v48  ;;  %v838_v21 = vsel %vm455_vm1, %v794_v18, 0.0  ;;  %v841_v22 = vsel %vm455_vm1, %v795_v20, 0.0  ;;  %v5455_v39 = vpop.permute.xlu1 %865 }
 0x2e4   :  { %821 = vadd.xlane.f32.xlu0 %v820_v51  ;;  %v5461_v45 = vpop.permute.xlu0 %883 }
 0x2e6   :  { %824 = vadd.xlane.f32.xlu1 %v823_v59  ;;  %v5459_v43 = vpop.permute.xlu1 %876 }
 0x2e8   :  { %815 = vadd.xlane.f32.xlu0 %v814_v62  ;;  %v5465_v47 = vpop.permute.xlu0 %894 }
 0x2ea   :  { %818 = vadd.xlane.f32.xlu1 %v817_v7  ;;  %v5463_v46 = vpop.permute.xlu1 %887 }
 0x2ec   :  { %827 = vadd.xlane.f32.xlu0 %v826_v10  ;;  %v5469_v48 = vpop.permute.xlu0 %905 }
 0x2ee   :  { %830 = vadd.xlane.f32.xlu1 %v829_v14  ;;  %v5467_v26 = vpop.permute.xlu1 %898 }
 0x2f0   :  { %833 = vadd.xlane.f32.xlu0 %v832_v17  ;;  %v5473_v50 = vpop.permute.xlu0 %916 }
 0x2f2   :  { %836 = vadd.xlane.f32.xlu1 %v835_v19  ;;  %v5471_v49 = vpop.permute.xlu1 %909 }
 0x2f4   :  { %839 = vadd.xlane.f32.xlu0 %v838_v21 }
 0x2f6   :  { %842 = vadd.xlane.f32.xlu1 %v841_v22  ;;  %v5475_v51 = vpop.permute.xlu1 %920 }
 0x2f7   :  { %6575 = vst [vmem:[#allocation78_spill] sm:$0xff] %v5475_v51 }
 0x307   :  { %931 = vbcast.lane.b32.xlu1 %v925_v30, 264 }
 0x30a   :  { %927 = vbcast.lane.b32.xlu0 %v925_v30, 256 }
 0x361   :  { %v798_v54 = vpop.xlane.xlu0 %797 }
 0x362   :  { %v5478_v55 = vmul.f32 %v5453_v37, %v798_v54 }
 0x363   :  { %v804_v56 = vpop.xlane.xlu1 %803 }
 0x364   :  { %982 = vperm.xlu0 %4459, %v5478_v55   ;;  %v5489_v62 = vmul.f32 %v5451_v35, %v804_v56 }
 0x365   :  { %v801_v57 = vpop.xlane.xlu0 %800 }
 0x366   :  { %v5482_v58 = vmul.f32 %v5449_v34, %v801_v57 }
 0x367   :  { %v807_v59 = vpop.xlane.xlu1 %806 }
 0x368   :  { %v5485_v60 = vmul.f32 %v5455_v39, %v807_v59  ;;  %985 = vperm.xlu1 %4460, %v5482_v58  }
 0x369   :  { %v810_v61 = vpop.xlane.xlu0 %809 }
 0x36a   :  { %991 = vperm.xlu0 %4459, %v5485_v60   ;;  %v5497_v6 = vmul.f32 %v5457_v41, %v810_v61 }
 0x36b   :  { %v813_v63 = vpop.xlane.xlu1 %812 }
 0x36c   :  { %v5493_v0 = vmul.f32 %v5459_v43, %v813_v63  ;;  %988 = vperm.xlu1 %4460, %v5489_v62  }
 0x36d   :  { %v822_v5 = vpop.xlane.xlu0 %821 }
 0x36e   :  { %997 = vperm.xlu0 %4459, %v5493_v0   ;;  %v5505_v10 = vmul.f32 %v5465_v47, %v822_v5 }
 0x36f   :  { %v825_v7 = vpop.xlane.xlu1 %824 }
 0x370   :  { %v5501_v8 = vmul.f32 %v5467_v26, %v825_v7  ;;  %994 = vperm.xlu1 %4460, %v5497_v6  }
 0x371   :  { %v816_v9 = vpop.xlane.xlu0 %815 }
 0x372   :  { %1009 = vperm.xlu0 %4459, %v5501_v8   ;;  %v5513_v14 = vmul.f32 %v5461_v45, %v816_v9 }
 0x373   :  { %v819_v11 = vpop.xlane.xlu1 %818 }
 0x374   :  { %v5509_v12 = vmul.f32 %v5463_v46, %v819_v11  ;;  %1006 = vperm.xlu1 %4460, %v5505_v10  }
 0x375   :  { %v828_v13 = vpop.xlane.xlu0 %827 }
 0x376   :  { %1003 = vperm.xlu0 %4459, %v5509_v12   ;;  %v5521_v18 = vmul.f32 %v5469_v48, %v828_v13 }
 0x377   :  { %v831_v15 = vpop.xlane.xlu1 %830 }
 0x378   :  { %v5517_v16 = vmul.f32 %v5471_v49, %v831_v15  ;;  %1000 = vperm.xlu1 %4460, %v5513_v14   ;;  %v5546_v15 = vand.u32 127, %v391_v24 }
 0x379   :  { %v834_v17 = vpop.xlane.xlu0 %833 }
 0x37a   :  { %1015 = vperm.xlu0 %4459, %v5517_v16   ;;  %v5529_v22 = vmul.f32 %v5473_v50, %v834_v17  ;;  %6578 = vst [vmem:[#allocation81_spill] sm:$0xff] %v5546_v15  ;;  %v5551_v33 = vsub.s32 %v5546_v15, %v5342_v25 }
 0x37b   :  { %v837_v19 = vpop.xlane.xlu1 %836 }
 0x37c   :  { %v5525_v20 = vmul.f32 %v5475_v51, %v837_v19  ;;  %1012 = vperm.xlu1 %4460, %v5521_v18   ;;  %v1033_v19 = vadd.s32 4294967288, %v5546_v15 }
 0x37d   :  { %v840_v21 = vpop.xlane.xlu0 %839 }
 0x37e   :  { %1021 = vperm.xlu0 %4459, %v5525_v20   ;;  %v5554_v31 = vsub.s32 %v1033_v19, %v5342_v25 }
 0x37f   :  { %v843_v30 = vpop.xlane.xlu1 %842 }
 0x380   :  { %1018 = vperm.xlu1 %4460, %v5529_v22  }
 0x381   :  { %v5533_v54 = vpop.permute.xlu0 %927 }
 0x382   :  { %6576 = vst [vmem:[#allocation79_spill] sm:$0xff] %v5533_v54  ;;  %v5536_v56 = vmul.f32 %v5533_v54, %v840_v21 }
 0x383   :  { %v5538_v57 = vpop.permute.xlu1 %931 }
 0x384   :  { %6577 = vst [vmem:[#allocation80_spill] sm:$0xff] %v5538_v57  ;;  %v5541_v59 = vmul.f32 %v5538_v57, %v843_v30  ;;  %1024 = vperm.xlu1 %4460, %v5536_v56  }
 0x386   :  { %1027 = vperm.xlu0 %4459, %v5541_v59  }
 0x3df   :  { %v983_v61 = vpop.permute.xlu0 %982 }
 0x3e0   :  { %v1032_v1 = vrot.slane %v983_v61, %v5551_v33 }
 0x3e3   :  { %v986_v63 = vpop.permute.xlu1 %985 }
 0x3e4   :  { %v1037_v24 = vrot.slane %v986_v63, %v5554_v31 }
 0x3e5   :  { %v992_v5 = vpop.permute.xlu0 %991 }
 0x3e6   :  { %v1047_v44 = vrot.slane %v992_v5, %v5554_v31  ;;  %v1039_v63 = vsel %vm1038_vm4, %v1037_v24, %v1032_v1 }
 0x3e7   :  { %v989_v7 = vpop.permute.xlu1 %988 }
 0x3e8   :  { %v1043_v4 = vrot.slane %v989_v7, %v5551_v33 }
 0x3e9   :  { %v998_v9 = vpop.permute.xlu0 %997 }
 0x3ea   :  { %v1056_v2 = vrot.slane %v998_v9, %v5554_v31  ;;  %v1048_v25 = vsel %vm1038_vm4, %v1047_v44, %v1043_v4 }
 0x3eb   :  { %v995_v11 = vpop.permute.xlu1 %994  ;;  %v1104_v9 = vsel %vm1103_vm5, %v1048_v25, %v1039_v63 }
 0x3ec   :  { %v1052_v53 = vrot.slane %v995_v11, %v5551_v33 }
 0x3ed   :  { %v1010_v13 = vpop.permute.xlu0 %1009 }
 0x3ee   :  { %v1057_v11 = vsel %vm1038_vm4, %v1056_v2, %v1052_v53  ;;  %v1074_v2 = vrot.slane %v1010_v13, %v5554_v31 }
 0x3ef   :  { %v1007_v17 = vpop.permute.xlu1 %1006  ;;  %v1106_v44 = vsel %vm1105_vm6, %v1057_v11, %v1104_v9 }
 0x3f0   :  { %v1070_v61 = vrot.slane %v1007_v17, %v5551_v33 }
 0x3f1   :  { %v1004_v21 = vpop.permute.xlu0 %1003 }
 0x3f2   :  { %v1065_v7 = vrot.slane %v1004_v21, %v5554_v31  ;;  %v1075_v24 = vsel %vm1038_vm4, %v1074_v2, %v1070_v61 }
 0x3f3   :  { %v1001_v30 = vpop.permute.xlu1 %1000 }
 0x3f4   :  { %v1061_v27 = vrot.slane %v1001_v30, %v5551_v33 }
 0x3f5   :  { %v1016_v3 = vpop.permute.xlu0 %1015 }
 0x3f6   :  { %v1066_v5 = vsel %vm1038_vm4, %v1065_v7, %v1061_v27  ;;  %v1083_v21 = vrot.slane %v1016_v3, %v5554_v31 }
 0x3f7   :  { %v1013_v52 = vpop.permute.xlu1 %1012  ;;  %v1108_v1 = vsel %vm1107_vm7, %v1066_v5, %v1106_v44 }
 0x3f8   :  { %v1079_v30 = vrot.slane %v1013_v52, %v5551_v33  ;;  %v1110_v13 = vsel %vm1109_vm8, %v1075_v24, %v1108_v1 }
 0x3f9   :  { %v1022_v15 = vpop.permute.xlu0 %1021 }
 0x3fa   :  { %v1092_v53 = vrot.slane %v1022_v15, %v5554_v31  ;;  %v1084_v52 = vsel %vm1038_vm4, %v1083_v21, %v1079_v30 }
 0x3fb   :  { %v1019_v19 = vpop.permute.xlu1 %1018  ;;  %v1112_v15 = vsel %vm1111_vm9, %v1084_v52, %v1110_v13 }
 0x3fc   :  { %v1088_v4 = vrot.slane %v1019_v19, %v5551_v33 }
 0x3fe   :  { %v1093_v17 = vsel %vm1038_vm4, %v1092_v53, %v1088_v4 }
 0x3ff   :  { %v1025_v27 = vpop.permute.xlu1 %1024  ;;  %v1114_v19 = vsel %vm1113_vm10, %v1093_v17, %v1112_v15 }
 0x400   :  { %v1097_v7 = vrot.slane %v1025_v27, %v5551_v33 }
 0x401   :  { %v1028_v25 = vpop.permute.xlu0 %1027 }
 0x402   :  { %v1101_v3 = vrot.slane %v1028_v25, %v5554_v31 }
 0x404   :  { %v1102_v11 = vsel %vm1038_vm4, %v1101_v3, %v1097_v7 }
 0x405   :  { %v1116_v63 = vsel %vm1115_vm11, %v1102_v11, %v1114_v19 }
 0x406   :  { %v1119_v5 = vsel %vm1118_vm12, %v1116_v63, -inf }
 0x407   :  { %1120 = vmax.xlane.f32.xlu1 %v1119_v5 }
 0x490   :  { %v1121_v30 = vpop.xlane.xlu1 %1120 }
 0x491   :  { %v1126_v9 = vrot.slane %v1121_v30, %v5349_v28  ;;  %v1130_v4 = vrot.slane %v1121_v30, %v5352_v29  ;;  %v1142_v21 = vrot.slane %v1121_v30, %v5373_v38  ;;  %v5596_v52 = vrot.slane %v1121_v30, %v5445_v23 }
 0x492   :  { %v1134_v24 = vrot.slane %v1121_v30, %v5359_v32 }
 0x493   :  { %v1163_v61 = vsub.f32 %v5478_v55, %v1126_v9  ;;  %v1164_v44 = vsub.f32 %v5482_v58, %v1126_v9  ;;  %v1165_v1 = vsub.f32 %v5489_v62, %v1130_v4  ;;  %v1172_v27 = vsub.f32 %v5501_v8, %v1142_v21 }
 0x494   :  { %v1166_v55 = vsub.f32 %v5485_v60, %v1130_v4  ;;  %v1178_v58 = vsub.f32 %v5541_v59, %v5596_v52  ;;  %v1167_v7 = vsub.f32 %v5497_v6, %v1134_v24  ;;  %v1138_v8 = vrot.slane %v1121_v30, %v5368_v36 }
 0x495   :  { %v1179_v2 = vmul.f32 1.442695, %v1163_v61  ;;  %v1181_v53 = vmul.f32 1.442695, %v1164_v44  ;;  %v1183_v17 = vmul.f32 1.442695, %v1165_v1  ;;  %v1168_v13 = vsub.f32 %v5493_v0, %v1134_v24 }
 0x496   :  { %v1197_v25 = vmul.f32 1.442695, %v1172_v27  ;;  %v1185_v62 = vmul.f32 1.442695, %v1166_v55  ;;  %v1209_v3 = vmul.f32 1.442695, %v1178_v58  ;;  %v1169_v60 = vsub.f32 %v5513_v14, %v1138_v8 }
 0x497   :  { %4461 = vpow2.f32 %v1179_v2  ;;  %v1187_v15 = vmul.f32 1.442695, %v1167_v7  ;;  %v1189_v59 = vmul.f32 1.442695, %v1168_v13  ;;  %v1170_v19 = vsub.f32 %v5509_v12, %v1138_v8 }
 0x498   :  { %4463 = vpow2.f32 %v1181_v53  ;;  %v1191_v63 = vmul.f32 1.442695, %v1169_v60  ;;  %v1146_v14 = vrot.slane %v1121_v30, %v5378_v40  ;;  %v1171_v9 = vsub.f32 %v5505_v10, %v1142_v21 }
 0x499   :  { %4465 = vpow2.f32 %v1183_v17  ;;  %v1193_v61 = vmul.f32 1.442695, %v1170_v19  ;;  %v1150_v10 = vrot.slane %v1121_v30, %v5383_v42 }
 0x49a   :  { %4467 = vpow2.f32 %v1197_v25  ;;  %v1173_v44 = vsub.f32 %v5521_v18, %v1146_v14  ;;  %v1195_v2 = vmul.f32 1.442695, %v1171_v9  ;;  %v1174_v21 = vsub.f32 %v5517_v16, %v1146_v14 }
 0x49b   :  { %4469 = vpow2.f32 %v1185_v62  ;;  %v1175_v18 = vsub.f32 %v5529_v22, %v1150_v10  ;;  %v1176_v17 = vsub.f32 %v5525_v20, %v1150_v10  ;;  %v1177_v16 = vsub.f32 %v5536_v56, %v5596_v52 }
 0x49c   :  { %4471 = vpow2.f32 %v1209_v3  ;;  %v1199_v53 = vmul.f32 1.442695, %v1173_v44  ;;  %v1201_v24 = vmul.f32 1.442695, %v1174_v21 }
 0x49d   :  { %4473 = vpow2.f32 %v1187_v15  ;;  %v1203_v30 = vmul.f32 1.442695, %v1175_v18  ;;  %v1205_v58 = vmul.f32 1.442695, %v1176_v17  ;;  %v1207_v7 = vmul.f32 1.442695, %v1177_v16 }
 0x49e   :  { %4475 = vpow2.f32 %v1189_v59 }
 0x49f   :  { %4477 = vpow2.f32 %v1191_v63 }
 0x4a0   :  { %4479 = vpow2.f32 %v1193_v61 }
 0x4a1   :  { %4481 = vpow2.f32 %v1195_v2 }
 0x4a2   :  { %4483 = vpow2.f32 %v1199_v53 }
 0x4a3   :  { %4485 = vpow2.f32 %v1201_v24 }
 0x4a4   :  { %v5605_v11 = vpop.eup %4461  ;;  %4487 = vpow2.f32 %v1203_v30 }
 0x4a5   :  { %1228 = vperm.xlu0 %4459, %v5605_v11   ;;  %v5609_v6 = vpop.eup %4463  ;;  %4489 = vpow2.f32 %v1205_v58 }
 0x4a6   :  { %v5613_v0 = vpop.eup %4465  ;;  %4491 = vpow2.f32 %v1207_v7 }
 0x4a7   :  { %v5615_v5 = vpop.eup %4467 }
 0x4a8   :  { %1255 = vperm.xlu1 %4460, %v5615_v5   ;;  %v5621_v4 = vpop.eup %4469 }
 0x4a9   :  { %1231 = vperm.xlu0 %4459, %v5609_v6   ;;  %v5624_v12 = vpop.eup %4471 }
 0x4aa   :  { %v5627_v1 = vpop.eup %4473 }
 0x4ab   :  { %v5633_v27 = vpop.eup %4475 }
 0x4ac   :  { %1273 = vperm.xlu1 %4460, %v5624_v12   ;;  %v5637_v55 = vpop.eup %4477 }
 0x4ad   :  { %1234 = vperm.xlu0 %4459, %v5613_v0   ;;  %v5641_v25 = vpop.eup %4479 }
 0x4ae   :  { %v5646_v22 = vpop.eup %4481 }
 0x4af   :  { %v5649_v62 = vpop.eup %4483 }
 0x4b0   :  { %v5652_v20 = vpop.eup %4485 }
 0x4b1   :  { %1237 = vperm.xlu0 %4459, %v5621_v4   ;;  %v5655_v3 = vpop.eup %4487 }
 0x4b2   :  { %v5658_v56 = vpop.eup %4489 }
 0x4b3   :  { %v5661_v52 = vpop.eup %4491 }
 0x4b4   :  { %6579 = vst [vmem:[#allocation82_spill] sm:$0xff] %v5661_v52 }
 0x4b5   :  { %1240 = vperm.xlu0 %4459, %v5627_v1  }
 0x4b9   :  { %1243 = vperm.xlu0 %4459, %v5633_v27  }
 0x4bd   :  { %1246 = vperm.xlu0 %4459, %v5637_v55  }
 0x4c1   :  { %1249 = vperm.xlu0 %4459, %v5641_v25  }
 0x4c5   :  { %1252 = vperm.xlu0 %4459, %v5646_v22  }
 0x4c9   :  { %1258 = vperm.xlu0 %4459, %v5649_v62  }
 0x4cd   :  { %1261 = vperm.xlu0 %4459, %v5652_v20  }
 0x4d1   :  { %1264 = vperm.xlu0 %4459, %v5655_v3  }
 0x4d5   :  { %1267 = vperm.xlu0 %4459, %v5658_v56  }
 0x4d9   :  { %1270 = vperm.xlu0 %4459, %v5661_v52  }
 0x520   :  { %v1229_v8 = vpop.permute.xlu0 %1228 }
 0x521   :  { %v1278_v58 = vrot.slane %v1229_v8, %v5551_v33 }
 0x523   :  { %v1256_v10 = vpop.permute.xlu1 %1255 }
 0x524   :  { %v1232_v13 = vpop.permute.xlu0 %1231 }
 0x525   :  { %v1282_v18 = vrot.slane %v1232_v13, %v5554_v31 }
 0x527   :  { %v1274_v8 = vpop.permute.xlu1 %1273 }
 0x528   :  { %v1235_v15 = vpop.permute.xlu0 %1234 }
 0x529   :  { %v1287_v24 = vrot.slane %v1235_v15, %v5551_v33  ;;  %v1283_v15 = vsel %vm1038_vm4, %v1282_v18, %v1278_v58 }
 0x52c   :  { %v1238_v60 = vpop.permute.xlu0 %1237 }
 0x52d   :  { %v1291_v2 = vrot.slane %v1238_v60, %v5554_v31 }
 0x52f   :  { %v1292_v7 = vsel %vm1038_vm4, %v1291_v2, %v1287_v24 }
 0x530   :  { %v1241_v59 = vpop.permute.xlu0 %1240  ;;  %v1347_v2 = vsel %vm1103_vm5, %v1292_v7, %v1283_v15 }
 0x531   :  { %v1296_v30 = vrot.slane %v1241_v59, %v5551_v33 }
 0x534   :  { %v1244_v19 = vpop.permute.xlu0 %1243 }
 0x535   :  { %v1300_v21 = vrot.slane %v1244_v19, %v5554_v31  ;;  %v1318_v19 = vrot.slane %v1256_v10, %v5554_v31 }
 0x537   :  { %v1301_v13 = vsel %vm1038_vm4, %v1300_v21, %v1296_v30 }
 0x538   :  { %v1247_v63 = vpop.permute.xlu0 %1246  ;;  %v1348_v10 = vsel %vm1105_vm6, %v1301_v13, %v1347_v2 }
 0x539   :  { %v1305_v60 = vrot.slane %v1247_v63, %v5551_v33 }
 0x53c   :  { %v1250_v14 = vpop.permute.xlu0 %1249 }
 0x53d   :  { %v1309_v17 = vrot.slane %v1250_v14, %v5554_v31 }
 0x53f   :  { %v1310_v14 = vsel %vm1038_vm4, %v1309_v17, %v1305_v60 }
 0x540   :  { %v1253_v9 = vpop.permute.xlu0 %1252  ;;  %v1349_v24 = vsel %vm1107_vm7, %v1310_v14, %v1348_v10 }
 0x541   :  { %v1314_v16 = vrot.slane %v1253_v9, %v5551_v33 }
 0x543   :  { %v1319_v63 = vsel %vm1038_vm4, %v1318_v19, %v1314_v16 }
 0x544   :  { %v1259_v61 = vpop.permute.xlu0 %1258 }
 0x545   :  { %v1323_v59 = vrot.slane %v1259_v61, %v5551_v33  ;;  %v1345_v61 = vrot.slane %v1274_v8, %v5554_v31 }
 0x548   :  { %v1262_v44 = vpop.permute.xlu0 %1261 }
 0x549   :  { %v1327_v54 = vrot.slane %v1262_v44, %v5554_v31 }
 0x54b   :  { %v1328_v21 = vsel %vm1038_vm4, %v1327_v54, %v1323_v59 }
 0x54c   :  { %v1265_v53 = vpop.permute.xlu0 %1264 }
 0x54d   :  { %v1332_v44 = vrot.slane %v1265_v53, %v5551_v33 }
 0x550   :  { %v1268_v52 = vpop.permute.xlu0 %1267 }
 0x551   :  { %v1336_v9 = vrot.slane %v1268_v52, %v5554_v31  ;;  %v1350_v52 = vsel %vm1109_vm8, %v1319_v63, %v1349_v24 }
 0x552   :  { %v1351_v58 = vsel %vm1111_vm9, %v1328_v21, %v1350_v52 }
 0x553   :  { %v1337_v18 = vsel %vm1038_vm4, %v1336_v9, %v1332_v44 }
 0x554   :  { %v1271_v17 = vpop.permute.xlu0 %1270  ;;  %v1352_v53 = vsel %vm1113_vm10, %v1337_v18, %v1351_v58 }
 0x555   :  { %v1341_v30 = vrot.slane %v1271_v17, %v5551_v33 }
 0x557   :  { %v1346_v16 = vsel %vm1038_vm4, %v1345_v61, %v1341_v30 }
 0x558   :  { %v1353_v7 = vsel %vm1115_vm11, %v1346_v16, %v1352_v53 }
 0x559   :  { %v1355_v54 = vsel %vm1118_vm12, %v1353_v7, 0.0 }
 0x55a   :  { %1356 = vadd.xlane.f32.xlu0 %v1355_v54 }
 0x5e3   :  { %v1357_v60 = vpop.xlane.xlu0 %1356 }
 0x5e4   :  { %4493 = vrcp.f32 %v1357_v60 }
 0x5f1   :  { %v4494_v19 = vpop.eup %4493 }
 0x5f2   :  { %v1379_v13 = vrot.slane %v4494_v19, %v5373_v38  ;;  %v1363_v15 = vrot.slane %v4494_v19, %v5349_v28  ;;  %v5699_v14 = vrot.slane %v4494_v19, %v5445_v23  ;;  %v1367_v59 = vrot.slane %v4494_v19, %v5352_v29 }
 0x5f3   :  { %v1375_v54 = vrot.slane %v4494_v19, %v5368_v36 }
 0x5f4   :  { %v1408_v9 = vmul.f32 %v5646_v22, %v1379_v13  ;;  %v1400_v8 = vmul.f32 %v5605_v11, %v1363_v15  ;;  %v1415_v2 = vmul.f32 %v5624_v12, %v5699_v14  ;;  %v1401_v63 = vmul.f32 %v5609_v6, %v1363_v15 }
 0x5f5   :  { %v1402_v21 = vmul.f32 %v5613_v0, %v1367_v59  ;;  %v1371_v6 = vrot.slane %v4494_v19, %v5359_v32  ;;  %v1403_v61 = vmul.f32 %v5621_v4, %v1367_v59  ;;  %v1406_v15 = vmul.f32 %v5637_v55, %v1375_v54 }
 0x5f6   :  { %v5708_v44 = vmul.f32 %v1408_v9, %v5465_v47  ;;  %v5711_v10 = vmul.f32 %v1400_v8, %v5453_v37  ;;  %v5717_v22 = vmul.f32 %v1415_v2, %v5538_v57  ;;  %v5720_v11 = vmul.f32 %v1401_v63, %v5449_v34 }
 0x5f7   :  { %v5726_v0 = vmul.f32 %v1402_v21, %v5451_v35  ;;  %v5731_v30 = vmul.f32 %v1403_v61, %v5455_v39  ;;  %v1404_v58 = vmul.f32 %v5627_v1, %v1371_v6  ;;  %v1405_v7 = vmul.f32 %v5633_v27, %v1371_v6 }
 0x5f8   :  { %v1440_v24 = vand.u32 2147483647, %v5708_v44  ;;  %v1432_v18 = vand.u32 2147483647, %v5711_v10  ;;  %v1447_v12 = vand.u32 2147483647, %v5717_v22  ;;  %v5747_v59 = vmul.f32 %v1406_v15, %v5461_v45 }
 0x5f9   :  { %v1433_v17 = vand.u32 2147483647, %v5720_v11  ;;  %v1434_v52 = vand.u32 2147483647, %v5726_v0  ;;  %v1435_v16 = vand.u32 2147483647, %v5731_v30  ;;  %v5736_v53 = vmul.f32 %v1404_v58, %v5457_v41 }
 0x5fa   :  { %1489 = vperm.xlu0 %4459, %v1440_v24   ;;  %1465 = vperm.xlu1 %4460, %v1432_v18   ;;  %v5742_v60 = vmul.f32 %v1405_v7, %v5459_v43  ;;  %v1407_v9 = vmul.f32 %v5641_v25, %v1375_v54  ;;  %v1438_v27 = vand.u32 2147483647, %v5747_v59  ;;  %v1409_v2 = vmul.f32 %v5615_v5, %v1379_v13  ;;  %v6580_v58 = vld [vmem:[#allocation82_spill] sm:$0xff]  ;;  %v6581_v7 = vld [vmem:[#allocation79_spill] sm:$0xff] }
 0x5fb   :  { %v1436_v4 = vand.u32 2147483647, %v5736_v53  ;;  %v1383_v63 = vrot.slane %v4494_v19, %v5378_v40  ;;  %v1387_v5 = vrot.slane %v4494_v19, %v5383_v42 }
 0x5fc   :  { %v1437_v1 = vand.u32 2147483647, %v5742_v60  ;;  %v5752_v8 = vmul.f32 %v1407_v9, %v5463_v46  ;;  %v5758_v21 = vmul.f32 %v1409_v2, %v5467_v26 }
 0x5fd   :  { %v1410_v24 = vmul.f32 %v5649_v62, %v1383_v63  ;;  %v1411_v6 = vmul.f32 %v5652_v20, %v1383_v63 }
 0x5fe   :  { %1510 = vperm.xlu0 %4459, %v1447_v12   ;;  %1468 = vperm.xlu1 %4460, %v1433_v17   ;;  %v1439_v55 = vand.u32 2147483647, %v5752_v8  ;;  %v1441_v25 = vand.u32 2147483647, %v5758_v21  ;;  %v1412_v17 = vmul.f32 %v5655_v3, %v1387_v5 }
 0x5ff   :  { %v5763_v18 = vmul.f32 %v1410_v24, %v5469_v48  ;;  %v5769_v12 = vmul.f32 %v1411_v6, %v5471_v49 }
 0x600   :  { %v5774_v61 = vmul.f32 %v1412_v17, %v5473_v50 }
 0x601   :  { %v1442_v13 = vand.u32 2147483647, %v5763_v18  ;;  %v1443_v62 = vand.u32 2147483647, %v5769_v12 }
 0x602   :  { %1471 = vperm.xlu1 %4460, %v1434_v52   ;;  %v1413_v52 = vmul.f32 %v5658_v56, %v1387_v5  ;;  %v1444_v20 = vand.u32 2147483647, %v5774_v61 }
 0x604   :  { %v5779_v19 = vmul.f32 %v1413_v52, %v5475_v51 }
 0x606   :  { %1474 = vperm.xlu1 %4460, %v1435_v16   ;;  %v1414_v16 = vmul.f32 %v6580_v58, %v5699_v14  ;;  %v1445_v3 = vand.u32 2147483647, %v5779_v19 }
 0x608   :  { %v5785_v54 = vmul.f32 %v1414_v16, %v6581_v7 }
 0x60a   :  { %1477 = vperm.xlu1 %4460, %v1436_v4   ;;  %v1446_v4 = vand.u32 2147483647, %v5785_v54 }
 0x60e   :  { %1480 = vperm.xlu1 %4460, %v1437_v1  }
 0x612   :  { %1483 = vperm.xlu1 %4460, %v1438_v27  }
 0x616   :  { %1486 = vperm.xlu1 %4460, %v1439_v55  }
 0x61a   :  { %1492 = vperm.xlu1 %4460, %v1441_v25  }
 0x61e   :  { %1495 = vperm.xlu1 %4460, %v1442_v13  }
 0x622   :  { %1498 = vperm.xlu1 %4460, %v1443_v62  }
 0x626   :  { %1501 = vperm.xlu1 %4460, %v1444_v20  }
 0x62a   :  { %1504 = vperm.xlu1 %4460, %v1445_v3  }
 0x62e   :  { %1507 = vperm.xlu1 %4460, %v1446_v4  }
 0x675   :  { %v1466_v56 = vpop.permute.xlu1 %1465  ;;  %v1490_v5 = vpop.permute.xlu0 %1489 }
 0x676   :  { %v1515_v3 = vrot.slane %v1466_v56, %v5551_v33 }
 0x679   :  { %v1469_v15 = vpop.permute.xlu1 %1468  ;;  %v1511_v56 = vpop.permute.xlu0 %1510 }
 0x67a   :  { %v1519_v62 = vrot.slane %v1469_v15, %v5554_v31 }
 0x67d   :  { %v1472_v1 = vpop.permute.xlu1 %1471 }
 0x67e   :  { %v1524_v52 = vrot.slane %v1472_v1, %v5551_v33  ;;  %v1520_v1 = vsel %vm1038_vm4, %v1519_v62, %v1515_v3 }
 0x681   :  { %v1475_v9 = vpop.permute.xlu1 %1474 }
 0x682   :  { %v1528_v6 = vrot.slane %v1475_v9, %v5554_v31 }
 0x684   :  { %v1529_v7 = vsel %vm1038_vm4, %v1528_v6, %v1524_v52 }
 0x685   :  { %v1478_v27 = vpop.permute.xlu1 %1477  ;;  %v1584_v6 = vsel %vm1103_vm5, %v1529_v7, %v1520_v1 }
 0x686   :  { %v1533_v58 = vrot.slane %v1478_v27, %v5551_v33 }
 0x689   :  { %v1481_v2 = vpop.permute.xlu1 %1480 }
 0x68a   :  { %v1537_v13 = vrot.slane %v1481_v2, %v5554_v31  ;;  %v1551_v2 = vrot.slane %v1490_v5, %v5551_v33 }
 0x68c   :  { %v1538_v15 = vsel %vm1038_vm4, %v1537_v13, %v1533_v58 }
 0x68d   :  { %v1484_v63 = vpop.permute.xlu1 %1483  ;;  %v1585_v5 = vsel %vm1105_vm6, %v1538_v15, %v1584_v6 }
 0x68e   :  { %v1542_v4 = vrot.slane %v1484_v63, %v5551_v33 }
 0x691   :  { %v1487_v55 = vpop.permute.xlu1 %1486 }
 0x692   :  { %v1546_v20 = vrot.slane %v1487_v55, %v5554_v31 }
 0x694   :  { %v1547_v55 = vsel %vm1038_vm4, %v1546_v20, %v1542_v4 }
 0x695   :  { %v1493_v24 = vpop.permute.xlu1 %1492  ;;  %v1586_v52 = vsel %vm1107_vm7, %v1547_v55, %v1585_v5 }
 0x696   :  { %v1555_v16 = vrot.slane %v1493_v24, %v5554_v31 }
 0x698   :  { %v1556_v63 = vsel %vm1038_vm4, %v1555_v16, %v1551_v2 }
 0x699   :  { %v1496_v14 = vpop.permute.xlu1 %1495 }
 0x69a   :  { %v1560_v27 = vrot.slane %v1496_v14, %v5551_v33  ;;  %v1582_v14 = vrot.slane %v1511_v56, %v5554_v31 }
 0x69d   :  { %v1499_v25 = vpop.permute.xlu1 %1498 }
 0x69e   :  { %v1564_v9 = vrot.slane %v1499_v25, %v5554_v31 }
 0x6a0   :  { %v1565_v13 = vsel %vm1038_vm4, %v1564_v9, %v1560_v27 }
 0x6a1   :  { %v1502_v17 = vpop.permute.xlu1 %1501 }
 0x6a2   :  { %v1569_v25 = vrot.slane %v1502_v17, %v5551_v33 }
 0x6a5   :  { %v1505_v57 = vpop.permute.xlu1 %1504 }
 0x6a6   :  { %v1573_v24 = vrot.slane %v1505_v57, %v5554_v31  ;;  %v1587_v57 = vsel %vm1109_vm8, %v1556_v63, %v1586_v52 }
 0x6a7   :  { %v1588_v3 = vsel %vm1111_vm9, %v1565_v13, %v1587_v57 }
 0x6a8   :  { %v1574_v62 = vsel %vm1038_vm4, %v1573_v24, %v1569_v25 }
 0x6a9   :  { %v1508_v20 = vpop.permute.xlu1 %1507  ;;  %v1589_v17 = vsel %vm1113_vm10, %v1574_v62, %v1588_v3 }
 0x6aa   :  { %v1578_v58 = vrot.slane %v1508_v20, %v5551_v33 }
 0x6ac   :  { %v1583_v16 = vsel %vm1038_vm4, %v1582_v14, %v1578_v58 }
 0x6ad   :  { %v1590_v7 = vsel %vm1115_vm11, %v1583_v16, %v1589_v17  ;;  %v677_v16 = vld [vmem:[%s6582_s24 + $0x18] sm:$0xff]  ;;  %v679_v17 = vld [vmem:[%s6582_s24 + $0x28] sm:$0xff] }
 0x6ae   :  { %v1592_v4 = vsel %vm1118_vm12, %v1590_v7, 0.0  ;;  %v675_v7 = vld [vmem:[%s6582_s24 + $0x8] sm:$0xff] }
 0x6af   :  { %1593 = vadd.xlane.f32.xlu1 %v1592_v4  ;;  %v681_v4 = vld [vmem:[%s6582_s24 + $0x38] sm:$0xff] }
 0x738   :  { %v1594_v9 = vpop.xlane.xlu1 %1593 }
 0x739   :  { %v1595_v2 = vmax.f32 %v1594_v9, 1e-12 }
 0x73b   :  { %4495 = vrcp.f32 %v1595_v2  ;;  %v678_v2 = vld [vmem:[%s6582_s24 + $0x20] sm:$0xff] }
 0x748   :  { %v4496_v15 = vpop.eup %4495 }
 0x749   :  { %v1617_v1 = vrot.slane %v4496_v15, %v5373_v38  ;;  %v1601_v55 = vrot.slane %v4496_v15, %v5349_v28  ;;  %v1629_v56 = vrot.slane %v4496_v15, %v5445_v23  ;;  %v1605_v25 = vrot.slane %v4496_v15, %v5352_v29 }
 0x74b   :  { %v1647_v27 = vmul.f32 %v1617_v1, %v5758_v21  ;;  %v1638_v24 = vmul.f32 %v1601_v55, %v5711_v10  ;;  %v1653_v6 = vmul.f32 %v1629_v56, %v5717_v22  ;;  %v1639_v63 = vmul.f32 %v1601_v55, %v5720_v11  ;;  %v680_v55 = vld [vmem:[%s6582_s24 + $0x30] sm:$0xff] }
 0x74c   :  { %v1640_v5 = vmul.f32 %v1605_v25, %v5726_v0  ;;  %v1641_v13 = vmul.f32 %v1605_v25, %v5731_v30  ;;  %v1609_v21 = vrot.slane %v4496_v15, %v5359_v32  ;;  %v1613_v22 = vrot.slane %v4496_v15, %v5368_v36 }
 0x74d   :  { %1701 = vperm.xlu1 %4460, %v1647_v27   ;;  %1656 = vperm.xlu0 %4459, %v1638_v24   ;;  %v1646_v0 = vmul.f32 %v1617_v1, %v5708_v44  ;;  %v1621_v30 = vrot.slane %v4496_v15, %v5378_v40  ;;  %v682_v27 = vld [vmem:[%s6582_s24 + $0x40] sm:$0xff]  ;;  %v683_v24 = vld [vmem:[%s6582_s24 + $0x48] sm:$0xff] }
 0x74e   :  { %v1642_v10 = vmul.f32 %v1609_v21, %v5736_v53  ;;  %v1643_v52 = vmul.f32 %v1609_v21, %v5742_v60  ;;  %v1644_v11 = vmul.f32 %v1613_v22, %v5747_v59  ;;  %v1645_v62 = vmul.f32 %v1613_v22, %v5752_v8 }
 0x74f   :  { %v1648_v20 = vmul.f32 %v1621_v30, %v5763_v18  ;;  %v1649_v53 = vmul.f32 %v1621_v30, %v5769_v12  ;;  %v1625_v60 = vrot.slane %v4496_v15, %v5383_v42  ;;  %v1652_v8 = vmul.f32 %v1629_v56, %v5785_v54  ;;  %v674_v15 = vld [vmem:[%s6582_s24] sm:$0xff] }
 0x751   :  { %1731 = vperm.xlu1 %4460, %v1653_v6   ;;  %1661 = vperm.xlu0 %4459, %v1639_v63   ;;  %v1650_v59 = vmul.f32 %v1625_v60, %v5774_v61  ;;  %v1651_v44 = vmul.f32 %v1625_v60, %v5779_v19  ;;  %v676_v19 = vld [vmem:[%s6582_s24 + $0x10] sm:$0xff] }
 0x755   :  { %1666 = vperm.xlu0 %4459, %v1640_v5  }
 0x759   :  { %1671 = vperm.xlu0 %4459, %v1641_v13  }
 0x75d   :  { %1676 = vperm.xlu0 %4459, %v1642_v10  }
 0x761   :  { %1681 = vperm.xlu0 %4459, %v1643_v52  }
 0x765   :  { %1686 = vperm.xlu0 %4459, %v1644_v11  }
 0x769   :  { %1691 = vperm.xlu0 %4459, %v1645_v62  }
 0x76d   :  { %1696 = vperm.xlu0 %4459, %v1646_v0  }
 0x771   :  { %1706 = vperm.xlu0 %4459, %v1648_v20  }
 0x775   :  { %1711 = vperm.xlu0 %4459, %v1649_v53  }
 0x779   :  { %1716 = vperm.xlu0 %4459, %v1650_v59  }
 0x77d   :  { %1721 = vperm.xlu0 %4459, %v1651_v44   ;;  %v684_v44 = vld [vmem:[%s6582_s24 + $0x50] sm:$0xff] }
 0x781   :  { %1726 = vperm.xlu0 %4459, %v1652_v8  }
 0x7c8   :  { %v1657_v18 = vpop.permute.xlu0 %1656  ;;  %v1702_v56 = vpop.permute.xlu1 %1701 }
 0x7c9   :  { %v1734_v21 = vmul.f32 %v1657_v18, %v674_v15  ;;  %v1743_v11 = vmul.f32 %v1702_v56, %v683_v24  ;;  %v686_v56 = vld [vmem:[%s6582_s24 + $0x60] sm:$0xff] }
 0x7cb   :  { %v1750_v18 = vsel %vm455_vm1, %v1734_v21, 0.0  ;;  %v687_v21 = vld [vmem:[%s6582_s24 + $0x68] sm:$0xff] }
 0x7cc   :  { %v1662_v12 = vpop.permute.xlu0 %1661 }
 0x7cd   :  { %v1735_v6 = vmul.f32 %v1662_v12, %v675_v7 }
 0x7cf   :  { %v1751_v0 = vsel %vm455_vm1, %v1735_v6, 0.0 }
 0x7d0   :  { %v1667_v14 = vpop.permute.xlu0 %1666 }
 0x7d1   :  { %v1736_v63 = vmul.f32 %v1667_v14, %v676_v19 }
 0x7d3   :  { %v1759_v30 = vsel %vm455_vm1, %v1736_v63, 0.0 }
 0x7d4   :  { %v1672_v57 = vpop.permute.xlu0 %1671 }
 0x7d5   :  { %v1737_v54 = vmul.f32 %v1672_v57, %v677_v16  ;;  %v1787_v57 = vsel %vm455_vm1, %v1743_v11, 0.0  ;;  %v1732_v11 = vpop.permute.xlu1 %1731 }
 0x7d7   :  { %v1760_v10 = vsel %vm455_vm1, %v1737_v54, 0.0 }
 0x7d8   :  { %v1677_v58 = vpop.permute.xlu0 %1676  ;;  %v1761_v53 = vadd.f32 %v1760_v10, %v1759_v30 }
 0x7d9   :  { %v1738_v5 = vmul.f32 %v1677_v58, %v678_v2  ;;  %v1752_v58 = vadd.f32 %v1751_v0, %v1750_v18 }
 0x7da   :  { %v1762_v7 = vrot.slane %v1761_v53, 4 }
 0x7db   :  { %v1768_v60 = vsel %vm455_vm1, %v1738_v5, 0.0  ;;  %v1753_v54 = vrot.slane %v1752_v58, 4 }
 0x7dc   :  { %v1682_v61 = vpop.permute.xlu0 %1681 }
 0x7dd   :  { %v1739_v1 = vmul.f32 %v1682_v61, %v679_v17 }
 0x7df   :  { %v1769_v62 = vsel %vm455_vm1, %v1739_v1, 0.0 }
 0x7e0   :  { %v1687_v3 = vpop.permute.xlu0 %1686  ;;  %v1770_v12 = vadd.f32 %v1769_v62, %v1768_v60 }
 0x7e1   :  { %v1740_v52 = vmul.f32 %v1687_v3, %v680_v55  ;;  %v685_v3 = vld [vmem:[%s6582_s24 + $0x58] sm:$0xff] }
 0x7e3   :  { %v1777_v14 = vsel %vm455_vm1, %v1740_v52, 0.0 }
 0x7e4   :  { %v1692_v9 = vpop.permute.xlu0 %1691 }
 0x7e5   :  { %v1741_v25 = vmul.f32 %v1692_v9, %v681_v4  ;;  %v1771_v4 = vrot.slane %v1770_v12, 4 }
 0x7e7   :  { %v1778_v20 = vsel %vm455_vm1, %v1741_v25, 0.0  ;;  %v1772_v63 = vadd.f32 %v1771_v4, %v1770_v12  ;;  %v1754_v25 = vadd.f32 %v1753_v54, %v1752_v58 }
 0x7e8   :  { %v1697_v13 = vpop.permute.xlu0 %1696  ;;  %v1779_v61 = vadd.f32 %v1778_v20, %v1777_v14 }
 0x7e9   :  { %v1742_v22 = vmul.f32 %v1697_v13, %v682_v27  ;;  %v1763_v27 = vadd.f32 %v1762_v7, %v1761_v53  ;;  %v1773_v20 = vrot.slane %v1772_v63, 2 }
 0x7ea   :  { %v1780_v2 = vrot.slane %v1779_v61, 4 }
 0x7eb   :  { %v1786_v59 = vsel %vm455_vm1, %v1742_v22, 0.0  ;;  %v689_v22 = vld [vmem:[%s6582_s24 + $0x78] sm:$0xff]  ;;  %v1764_v62 = vrot.slane %v1763_v27, 2 }
 0x7ec   :  { %v1707_v8 = vpop.permute.xlu0 %1706  ;;  %v1788_v16 = vadd.f32 %v1787_v57, %v1786_v59  ;;  %v1781_v5 = vadd.f32 %v1780_v2, %v1779_v61  ;;  %v1755_v59 = vrot.slane %v1754_v25, 2 }
 0x7ed   :  { %v1744_v17 = vmul.f32 %v1707_v8, %v684_v44  ;;  %v688_v44 = vld [vmem:[%s6582_s24 + $0x70] sm:$0xff]  ;;  %v1749_v8 = vmul.f32 %v1732_v11, %v689_v22  ;;  %v1765_v57 = vadd.f32 %v1764_v62, %v1763_v27 }
 0x7ee   :  { %v1789_v15 = vrot.slane %v1788_v16, 4  ;;  %v1782_v53 = vrot.slane %v1781_v5, 2  ;;  %v1756_v7 = vadd.f32 %v1755_v59, %v1754_v25 }
 0x7ef   :  { %v1795_v1 = vsel %vm455_vm1, %v1744_v17, 0.0 }
 0x7f0   :  { %v1712_v19 = vpop.permute.xlu0 %1711  ;;  %v1790_v10 = vadd.f32 %v1789_v15, %v1788_v16  ;;  %v1774_v16 = vadd.f32 %v1773_v20, %v1772_v63  ;;  %v1766_v15 = vrot.slane %v1765_v57, 1 }
 0x7f1   :  { %v1745_v9 = vmul.f32 %v1712_v19, %v685_v3  ;;  %v1783_v19 = vadd.f32 %v1782_v53, %v1781_v5 }
 0x7f2   :  { %v1791_v18 = vrot.slane %v1790_v10, 2  ;;  %v1767_v63 = vadd.f32 %v1766_v15, %v1765_v57 }
 0x7f3   :  { %v1796_v55 = vsel %vm455_vm1, %v1745_v9, 0.0  ;;  %v1814_v9 = vsel %vm455_vm1, %v1749_v8, 0.0  ;;  %v1784_v27 = vrot.slane %v1783_v19, 1 }
 0x7f4   :  { %v1797_v24 = vadd.f32 %v1796_v55, %v1795_v1  ;;  %v1717_v6 = vpop.permute.xlu0 %1716  ;;  %v1792_v54 = vadd.f32 %v1791_v18, %v1790_v10 }
 0x7f5   :  { %v1746_v52 = vmul.f32 %v1717_v6, %v686_v56  ;;  %v1775_v56 = vrot.slane %v1774_v16, 1  ;;  %v1757_v6 = vrot.slane %v1756_v7, 1 }
 0x7f6   :  { %v1798_v13 = vrot.slane %v1797_v24, 4 }
 0x7f7   :  { %v1804_v12 = vsel %vm455_vm1, %v1746_v52, 0.0  ;;  %v1793_v52 = vrot.slane %v1792_v54, 1  ;;  %v1776_v11 = vadd.f32 %v1775_v56, %v1774_v16  ;;  %v1758_v62 = vadd.f32 %v1757_v6, %v1756_v7 }
 0x7f8   :  { %v1799_v0 = vadd.f32 %v1798_v13, %v1797_v24  ;;  %v1722_v30 = vpop.permute.xlu0 %1721 }
 0x7f9   :  { %v1747_v60 = vmul.f32 %v1722_v30, %v687_v21  ;;  %v1785_v30 = vadd.f32 %v1784_v27, %v1783_v19 }
 0x7fa   :  { %v1800_v58 = vrot.slane %v1799_v0, 2 }
 0x7fb   :  { %v1805_v14 = vsel %vm455_vm1, %v1747_v60, 0.0  ;;  %v1794_v60 = vadd.f32 %v1793_v52, %v1792_v54 }
 0x7fc   :  { %v1806_v61 = vadd.f32 %v1805_v14, %v1804_v12  ;;  %v1727_v3 = vpop.permute.xlu0 %1726  ;;  %v1801_v1 = vadd.f32 %v1800_v58, %v1799_v0  ;;  %v1830_v0 = vsel %vm1103_vm5, %v1767_v63, %v1758_v62 }
 0x7fd   :  { %v1748_v17 = vmul.f32 %v1727_v3, %v688_v44  ;;  %v1831_v44 = vsel %vm1105_vm6, %v1776_v11, %v1830_v0 }
 0x7fe   :  { %v1807_v4 = vrot.slane %v1806_v61, 4  ;;  %v1802_v22 = vrot.slane %v1801_v1, 1  ;;  %v1832_v18 = vsel %vm1107_vm7, %v1785_v30, %v1831_v44 }
 0x7ff   :  { %v1813_v2 = vsel %vm455_vm1, %v1748_v17, 0.0  ;;  %v1833_v14 = vsel %vm1109_vm8, %v1794_v60, %v1832_v18 }
 0x800   :  { %v1808_v55 = vadd.f32 %v1807_v4, %v1806_v61  ;;  %v1815_v24 = vadd.f32 %v1814_v9, %v1813_v2  ;;  %v1803_v59 = vadd.f32 %v1802_v22, %v1801_v1 }
 0x802   :  { %v1809_v13 = vrot.slane %v1808_v55, 2  ;;  %v1816_v21 = vrot.slane %v1815_v24, 4  ;;  %v1834_v57 = vsel %vm1111_vm9, %v1803_v59, %v1833_v14 }
 0x804   :  { %v1810_v25 = vadd.f32 %v1809_v13, %v1808_v55  ;;  %v1817_v5 = vadd.f32 %v1816_v21, %v1815_v24 }
 0x806   :  { %v1811_v10 = vrot.slane %v1810_v25, 1  ;;  %v1818_v20 = vrot.slane %v1817_v5, 2 }
 0x808   :  { %v1819_v53 = vadd.f32 %v1818_v20, %v1817_v5  ;;  %v1812_v8 = vadd.f32 %v1811_v10, %v1810_v25 }
 0x80a   :  { %v1820_v12 = vrot.slane %v1819_v53, 1  ;;  %v1835_v61 = vsel %vm1113_vm10, %v1812_v8, %v1834_v57 }
 0x80c   :  { %v1821_v58 = vadd.f32 %v1820_v12, %v1819_v53 }
 0x80e   :  { %v1836_v3 = vsel %vm1115_vm11, %v1821_v58, %v1835_v61 }
 0x80f   :  { %1838 = vst.msk [vmem:[#allocation8] sm:$0xff] %vm455_vm1, %v1836_v3 }
 0x810 LB: > { %s6583_s30 = sld [smem:[#allocation56_spill]]  ;;  %v1877_v16 = vld [vmem:[#allocation13 + $0x78] sm:$0xff]  ;;  %v5095_v17 = vmov 0   ;;  %v6537_v7 = vmov 0.0   ;;  %v1876_v19 = vld [vmem:[#allocation13 + $0x70] sm:$0xff]  ;;  %s5892_s1 = sshll.u32 %s5033_s9, 3  ;;  %s5033_s9 = sphi %s5884_s9, %s1846_s9  }
 0x811   : > { %s6584_s21 = sld [smem:[#allocation57_spill]]  ;;  %4497 = vset.pattern.permute.xlu0 %v5095_v17  ;;  %4244 = vmatprep.subr.mxu1 %v6537_v7  ;;  %v1853_v4 = vld [vmem:[#allocation9] sm:$0xff]  ;;  %v1875_v9 = vld [vmem:[#allocation13 + $0x68] sm:$0xff]  ;;  %v1881_v54 = vld [vmem:[#allocation15 + $0x18] sm:$0xff]  ;;  %vm5097_vm13 = vmmov 0   ;;  %s5098_s11 = smov 32  }
 0x812   : > { %4245 = vmatpush3.msra.mxu1 %v1877_v16  ;;  %4233 = vmatprep.subr.mxu0 %v6537_v7  ;;  %v1880_v2 = vld [vmem:[#allocation15 + $0x10] sm:$0xff]  ;;  %v1874_v55 = vld [vmem:[#allocation13 + $0x60] sm:$0xff]  ;;  %v1879_v56 = vld [vmem:[#allocation15 + $0x8] sm:$0xff]  ;;  %v5099_v14 = vmov 1.0   ;;  %s5100_s12 = smov 64   ;;  %s6592_s15 = sld [smem:[#allocation65_spill]] }
 0x813   : > { %4246 = vmatprep.subr.mxu1 %v6537_v7  ;;  %4241 = vmatprep.mubr.msk.f32.mxu0 %vm5097_vm13, %v6537_v7  ;;  %v1873_v6 = vld [vmem:[#allocation13 + $0x58] sm:$0xff]  ;;  %v1878_v27 = vld [vmem:[#allocation15] sm:$0xff]  ;;  %v1872_v13 = vld [vmem:[#allocation13 + $0x50] sm:$0xff]  ;;  %s6594_s5 = sld [smem:[#allocation68_spill]]  ;;  %s5101_s20 = smov 96  }
 0x814   : > { %4247 = vmatpush3.msra.mxu1 %v1876_v19  ;;  %4234 = vmatpush3.msra.mxu0 %v1881_v54  ;;  %v1871_v52 = vld [vmem:[#allocation13 + $0x48] sm:$0xff]  ;;  %v2029_v63 = vld [vmem:[#allocation16 + $0x18] sm:$0xff]  ;;  %v1870_v22 = vld [vmem:[#allocation13 + $0x40] sm:$0xff]  ;;  %s6597_s27 = sld [smem:[#allocation59_spill]]  ;;  %s4008_s22 = scalar_lea.vmem [#allocation43], %s5892_s1 }
 0x815   : > { %4248 = vmatprep.subr.mxu1 %v6537_v7  ;;  %4235 = vmatprep.subr.mxu0 %v6537_v7  ;;  %v2028_v25 = vld [vmem:[#allocation16 + $0x10] sm:$0xff]  ;;  %v1869_v5 = vld [vmem:[#allocation13 + $0x38] sm:$0xff]  ;;  %v2027_v11 = vld [vmem:[#allocation16 + $0x8] sm:$0xff]  ;;  %s6609_s29 = sld [smem:[#allocation69_spill]]  ;;  %s1846_s9 = sadd.s32 1, %s5033_s9  }
 0x816   : > { %s1848_s2 = scalar_lea.vmem %s6583_s30, %s5892_s1  ;;  %4249 = vmatpush3.msra.mxu1 %v1875_v9  ;;  %4236 = vmatpush3.msra.mxu0 %v1880_v2  ;;  %v1861_v21 = vld [vmem:[#allocation8] sm:$0xff]  ;;  %v1868_v62 = vld [vmem:[#allocation13 + $0x30] sm:$0xff]  ;;  %v2026_v30 = vld [vmem:[#allocation16] sm:$0xff]  ;;  %s6611_s16 = sld [smem:[#allocation60_spill]] }
 0x817   : > { %s1850_s7 = scalar_lea.vmem %s6584_s21, %s5892_s1  ;;  %v1849_v15 = vld [vmem:[%s1848_s2] sm:$0xff]  ;;  %4250 = vmatprep.subr.mxu1 %v6537_v7  ;;  %4237 = vmatprep.subr.mxu0 %v6537_v7  ;;  %v1867_v10 = vld [vmem:[#allocation13 + $0x28] sm:$0xff]  ;;  %v1866_v60 = vld [vmem:[#allocation13 + $0x20] sm:$0xff]  ;;  %s6612_s18 = sld [smem:[#allocation58_spill]] }
 0x818   : > { %v1851_v1 = vld [vmem:[%s1850_s7] sm:$0xff]  ;;  %4251 = vmatpush3.msra.mxu1 %v1874_v55  ;;  %4238 = vmatpush3.msra.mxu0 %v1879_v56  ;;  %v2105_v0 = vld [vmem:[#allocation3] sm:$0xff]  ;;  %v1864_v53 = vld [vmem:[#allocation13 + $0x10] sm:$0xff]  ;;  %p1843_p7 = scmp.ge.s32.totalorder %s1846_s9, 8  }
 0x819   : > { %vm1852_vm14 = vcmp.gt.s32.totalorder %v1851_v1, 0  ;;  %4252 = vmatprep.subr.mxu1 %v6537_v7  ;;  %4239 = vmatprep.subr.mxu0 %v6537_v7  ;;  %v2025_v20 = vld [vmem:[#allocation2] sm:$0xff]  ;;  %v1863_v44 = vld [vmem:[#allocation13 + $0x8] sm:$0xff]  ;;  %v1862_v8 = vld [vmem:[#allocation13] sm:$0xff]  ;;  %s5102_s6 = smov (%p1843_p7), [#allocation43]  }
 0x81a   : > { %v1854_v24 = vsel %vm1852_vm14, %v1849_v15, %v1853_v4  ;;  %4253 = vmatpush3.msra.mxu1 %v1873_v6  ;;  %4240 = vmatpush3.msra.mxu0 %v1878_v27  ;;  %v1865_v59 = vld [vmem:[#allocation13 + $0x18] sm:$0xff]  ;;  %v6585_v12 = vld [vmem:[#allocation81_spill] sm:$0xff]  ;;  %s4021_s10 = sshll.u32 (%p1843_p7), %s5102_s6, 4  ;;  %s4022_s10 = int_to_ptr.vmem [resolvable:$true] %s4021_s10 }
 0x81b   : > { %1856 = vperm.xlu0 %4497, %v1854_v24   ;;  %4254 = vmatprep.subr.mxu1 %v6537_v7  ;;  %v6586_v9 = vld [vmem:[#allocation70_spill] sm:$0xff]  ;;  %s4983_s3 = scalar_lea.vmem (%p1843_p7), %s4022_s10, 1024  ;;  %p4988_p9 = scmp.lt.s32.totalorder (%p1843_p7), %s4022_s10, %s4022_s10 }
 0x81c   : > { %4255 = vmatpush3.msra.mxu1 %v1872_v13  ;;  %4279 = vmatprep.subr.mxu0 %v6537_v7  ;;  %v6602_v51 = vld [vmem:[#allocation78_spill] sm:$0xff]  ;;  %p4984_p8 = scmp.ne.s32.totalorder (%p1843_p7), %s4022_s10, %s4983_s3  ;;  %p4989_p10 = scmp.lt.s32.totalorder (%p1843_p7), %s4983_s3, %s4983_s3 }
 0x81d   : > { %4256 = vmatprep.subr.mxu1 %v6537_v7  ;;  %4242 = vmatmul.mubr.msk.f32.vlgmr.msra.gmra.mxu0 %vm455_vm1, %v1861_v21  ;;  %s4010_s25 = scalar_lea.vmem %s6612_s18, %s5892_s1 }
 0x81e   : > { %4257 = vmatpush3.msra.mxu1 %v1871_v52  ;;  %4280 = vmatpush3.msra.mxu0 %v2029_v63  ;;  %v2152_v63 = vld [vmem:[#allocation22 + $0x18] sm:$0xff]  ;;  %p4990_p11 = por (%p1843_p7), %p4989_p10, %p4988_p9 }
 0x81f   : > { %4258 = vmatprep.subr.mxu1 %v6537_v7  ;;  %4281 = vmatprep.subr.mxu0 %v6537_v7 }
 0x820   : > { %4259 = vmatpush3.msra.mxu1 %v1870_v22  ;;  %4282 = vmatpush3.msra.mxu0 %v2028_v25  ;;  %v2151_v22 = vld [vmem:[#allocation22 + $0x10] sm:$0xff]  ;;  %v2150_v25 = vld [vmem:[#allocation22 + $0x8] sm:$0xff]  ;;  %p4991_p12 = pnand (%p1843_p7), %p4990_p11, %p4984_p8 }
 0x821   : > { %4260 = vmatprep.subr.mxu1 %v6537_v7  ;;  %4283 = vmatprep.subr.mxu0 %v6537_v7 }
 0x822   : > { %4261 = vmatpush3.msra.mxu1 %v1869_v5  ;;  %4284 = vmatpush3.msra.mxu0 %v2027_v11  ;;  %v2149_v5 = vld [vmem:[#allocation22] sm:$0xff] }
 0x823   : > { %4262 = vmatprep.subr.mxu1 %v6537_v7  ;;  %4285 = vmatprep.subr.mxu0 %v6537_v7  ;;  %v2148_v11 = vld [vmem:[#allocation4] sm:$0xff] }
 0x824   : > { %4263 = vmatpush3.msra.mxu1 %v1868_v62  ;;  %4276 = vmatprep.mubr.msk.f32.mxu1 %vm5097_vm13, %v6537_v7  ;;  %v2147_v62 = vld [vmem:[#allocation21 + $0x18] sm:$0xff] }
 0x825   : > { %4264 = vmatprep.subr.mxu1 %v6537_v7  ;;  %4286 = vmatpush3.msra.mxu0 %v2026_v30  ;;  %v2146_v30 = vld [vmem:[#allocation21 + $0x10] sm:$0xff] }
 0x826   : > { %4265 = vmatpush3.msra.mxu1 %v1867_v10  ;;  %4287 = vmatprep.mubr.msk.f32.mxu0 %vm5097_vm13, %v6537_v7 }
 0x827   : > { %4266 = vmatprep.subr.mxu1 %v6537_v7  ;;  %4288 = vmatmul.mubr.msk.f32.vlgmr.msra.gmra.mxu0 %vm455_vm1, %v2025_v20  ;;  %v2145_v20 = vld [vmem:[#allocation21 + $0x8] sm:$0xff] }
 0x828   : > { %4267 = vmatpush3.msra.mxu1 %v1866_v60  ;;  %2114 = vrot.lane.b32.xlu1 %v2105_v0, %s5098_s11  ;;  %v2144_v60 = vld [vmem:[#allocation21] sm:$0xff] }
 0x829   : > { %4268 = vmatprep.subr.mxu1 %v6537_v7  ;;  %4290 = vmatprep.subr.mxu0 %v6537_v7 }
 0x82a   : > { %4269 = vmatpush3.msra.mxu1 %v1865_v59  ;;  %4298 = vmatprep.mubr.msk.f32.mxu0 %vm5097_vm13, %v6537_v7 }
 0x82b   : > { %4270 = vmatprep.subr.mxu1 %v6537_v7  ;;  %4498 = vset.pattern.permute.xlu1 %v5095_v17 }
 0x82c   : > { %4271 = vmatpush3.msra.mxu1 %v1864_v53  ;;  %4291 = vmatpush3.msra.mxu0 %v2152_v63  ;;  %v2299_v53 = vld [vmem:[#allocation5] sm:$0xff]  ;;  %v2345_v63 = vld [vmem:[#allocation28 + $0x38] sm:$0xff] }
 0x82d   : > { %4272 = vmatprep.subr.mxu1 %v6537_v7  ;;  %4292 = vmatprep.subr.mxu0 %v6537_v7 }
 0x82e   : > { %4273 = vmatpush3.msra.mxu1 %v1863_v44  ;;  %4293 = vmatpush3.msra.mxu0 %v2151_v22  ;;  %v2356_v22 = vld [vmem:[#allocation30 + $0x48] sm:$0xff] }
 0x82f   : > { %4274 = vmatprep.subr.mxu1 %v6537_v7  ;;  %4294 = vmatprep.subr.mxu0 %v6537_v7 }
 0x830   : > { %4275 = vmatpush3.msra.mxu1 %v1862_v8  ;;  %4295 = vmatpush3.msra.mxu0 %v2150_v25  ;;  %v2344_v25 = vld [vmem:[#allocation28 + $0x30] sm:$0xff] }
 0x831   : > { %4296 = vmatprep.subr.mxu0 %v6537_v7  ;;  %2463 = vmatprep.subr.mxu1 %v2345_v63 }
 0x832   : > { %4297 = vmatpush3.msra.mxu0 %v2149_v5  ;;  %v2355_v5 = vld [vmem:[#allocation30 + $0x40] sm:$0xff] }
 0x833   : > { %4299 = vmatmul.mubr.msk.f32.vlgmr.msra.gmra.mxu0 %vm455_vm1, %v2148_v11  ;;  %4301 = vmatprep.subr.mxu0 %v6537_v7  ;;  %v2343_v11 = vld [vmem:[#allocation28 + $0x28] sm:$0xff] }
 0x834   : > { %4302 = vmatpush3.msra.mxu0 %v2147_v62  ;;  %4309 = vmatprep.mubr.msk.f32.mxu0 %vm5097_vm13, %v6537_v7  ;;  %v2342_v62 = vld [vmem:[#allocation28 + $0x20] sm:$0xff] }
 0x835   : > { %4303 = vmatprep.subr.mxu0 %v6537_v7 }
 0x836   : > { %4304 = vmatpush3.msra.mxu0 %v2146_v30  ;;  %v2354_v30 = vld [vmem:[#allocation30 + $0x38] sm:$0xff] }
 0x837   : > { %4305 = vmatprep.subr.mxu0 %v6537_v7 }
 0x838   : > { %4306 = vmatpush3.msra.mxu0 %v2145_v20  ;;  %v2353_v20 = vld [vmem:[#allocation30 + $0x30] sm:$0xff] }
 0x839   : > { %4307 = vmatprep.subr.mxu0 %v6537_v7 }
 0x83a   : > { %4308 = vmatpush3.msra.mxu0 %v2144_v60  ;;  %v2340_v60 = vld [vmem:[#allocation28 + $0x10] sm:$0xff] }
 0x896   : > { %v1857_v18 = vpop.permute.xlu0 %1856 }
 0x897   : > { %vm1858_vm15 = vcmp.eq.s32.totalorder %v6585_v12, %v1857_v18 }
 0x898   : > { %4277 = vmatmul.mubr.msk.f32.vlgmr.msra.gmra.mxu1 %vm1858_vm15, %v5099_v14 }
 0x899   : > { %2503 = vmatprep.mubr.f32.mxu1 %v6537_v7  ;;  %2464 = vmatpush1.msra.mxu1 %v2344_v25 }
 0x89a   : > { %v2115_v27 = vpop.permute.xlu1 %2114  ;;  %2465 = vmatprep.subr.mxu1 %v2343_v11  ;;  %v2556_v11 = vld [vmem:[%s6592_s15 + $0x38] sm:$0xff] }
 0x89b   : > { %2466 = vmatpush1.msra.mxu1 %v2342_v62  ;;  %v2555_v62 = vld [vmem:[%s6592_s15 + $0x30] sm:$0xff] }
 0x8dd   : > { %v1951_v57 = vpop.f32.mrf.mxu0 }
 0x8df   : > { %v4243_v58 = vpop.f32.mrf.mxu0 }
 0x8e0   : > { %v6588_v58 = vld [vmem:[#allocation71_spill] sm:$0xff] }
 0x8e7   : > { %v2099_v61 = vpop.f32.mrf.mxu0 }
 0x8e9   : > { %v4289_v3 = vpop.f32.mrf.mxu0 }
 0x8f3   : > { %v2222_v44 = vpop.f32.mrf.mxu0 }
 0x8f5   : > { %v4300_v8 = vpop.f32.mrf.mxu0 }
 0x958   : > { %v2021_v16 = vpop.f32.mrf.mxu1 }
 0x959   : > { %v2022_v17 = vadd.f32 %v2021_v16, %v1951_v57 }
 0x95a   : > { %v4278_v19 = vpop.f32.mrf.mxu1 }
 0x95b   : > { %v2103_v4 = vadd.f32 %v2099_v61, %v2022_v17 }
 0x95d   : > { %v2104_v54 = vadd.f32 %v6586_v9, %v2103_v4 }
 0x95f   : > { %4499 = vtanh.f32 %v2104_v54  ;;  %v4106_v15 = vmul.f32 -1.442695, %v2104_v54 }
 0x961   : > { %4501 = vpow2.f32 %v4106_v15 }
 0x96c   : > { %v4500_v2 = vpop.eup %4499 }
 0x96d   : > { %2119 = vrot.lane.b32.xlu0 %v4500_v2, %s5100_s12 }
 0x96e   : > { %v4502_v1 = vpop.eup %4501 }
 0x96f   : > { %v2109_v55 = vadd.f32 1.0, %v4502_v1 }
 0x971   : > { %4503 = vrcp.f32 %v2109_v55 }
 0x97e   : > { %v4504_v24 = vpop.eup %4503 }
 0x97f   : > { %v2117_v13 = vmul.f32 %v4504_v24, %v2115_v27  ;;  %v2359_v27 = vld [vmem:[#allocation30 + $0x60] sm:$0xff] }
 0x9df   : > { %v2120_v56 = vpop.permute.xlu0 %2119 }
 0x9e0   : > { %v2122_v6 = vmul.f32 %v4504_v24, %v2120_v56  ;;  %v2361_v56 = vld [vmem:[#allocation30 + $0x70] sm:$0xff] }
 0x9e2   : > { %2124 = vrot.lane.b32.xlu1 %v2122_v6, %s5098_s11  ;;  %v2360_v6 = vld [vmem:[#allocation30 + $0x68] sm:$0xff] }
 0xa54   : > { %v2125_v21 = vpop.permute.xlu1 %2124 }
 0xa55   : > { %v5939_v52 = vadd.f32 %v2125_v21, %v2117_v13  ;;  %v2358_v13 = vld [vmem:[#allocation30 + $0x58] sm:$0xff]  ;;  %v2357_v21 = vld [vmem:[#allocation30 + $0x50] sm:$0xff] }
 0xa57   : > { %6587 = vst [vmem:[#allocation83_spill] sm:$0xff] %v5939_v52  ;;  %4505 = vtanh.f32 %v5939_v52 }
 0xa64   : > { %v4506_v10 = vpop.eup %4505 }
 0xa65   : > { %2130 = vrot.lane.b32.xlu0 %v4506_v10, %s5100_s12  ;;  %v2341_v10 = vld [vmem:[#allocation28 + $0x18] sm:$0xff] }
 0xa66   : > { %2467 = vmatprep.subr.mxu1 %v2341_v10  ;;  %v2553_v10 = vld [vmem:[%s6592_s15 + $0x20] sm:$0xff] }
 0xa67   : > { %2468 = vmatpush1.msra.mxu1 %v2340_v60  ;;  %v2551_v60 = vld [vmem:[%s6592_s15 + $0x10] sm:$0xff] }
 0xad7   : > { %v2131_v0 = vpop.permute.xlu0 %2130 }
 0xad8   : > { %v2133_v59 = vmul.f32 %v4504_v24, %v2131_v0  ;;  %v2362_v24 = vld [vmem:[#allocation30 + $0x78] sm:$0xff]  ;;  %v2339_v0 = vld [vmem:[#allocation28 + $0x8] sm:$0xff] }
 0xad9   : > { %2382 = vmatprep.subr.mxu0 %v2362_v24  ;;  %2469 = vmatprep.subr.mxu1 %v2339_v0  ;;  %v2550_v0 = vld [vmem:[%s6592_s15 + $0x8] sm:$0xff] }
 0xada   : > { %2135 = vrot.lane.b32.xlu1 %v2133_v59, %s5098_s11  ;;  %v2352_v59 = vld [vmem:[#allocation30 + $0x28] sm:$0xff] }
 0xade   : > { %2308 = vrot.lane.b32.xlu1 %v2299_v53, %s5098_s11  ;;  %v2351_v53 = vld [vmem:[#allocation30 + $0x20] sm:$0xff] }
 0xb4c   : > { %v2136_v18 = vpop.permute.xlu1 %2135 }
 0xb4d   : > { %2138 = vst.msk [vmem:[#allocation2] sm:$0xff] %vm455_vm1, %v2136_v18  ;;  %4310 = vmatmul.mubr.msk.f32.vlgmr.msra.gmra.mxu0 %vm455_vm1, %v2136_v18  ;;  %v2350_v18 = vld [vmem:[#allocation30 + $0x18] sm:$0xff] }
 0xb4e   : > { %2430 = vmatprep.mubr.f32.mxu0 %v6537_v7  ;;  %2383 = vmatpush1.msra.mxu0 %v2361_v56 }
 0xb4f   : > { %2384 = vmatprep.subr.mxu0 %v2360_v6 }
 0xb50   : > { %v2309_v2 = vpop.permute.xlu1 %2308  ;;  %2385 = vmatpush1.msra.mxu0 %v2359_v27 }
 0xb51   : > { %2386 = vmatprep.subr.mxu0 %v2358_v13 }
 0xb52   : > { %2387 = vmatpush1.msra.mxu0 %v2357_v21 }
 0xb53   : > { %2388 = vmatprep.subr.mxu0 %v2356_v22 }
 0xb54   : > { %2389 = vmatpush1.msra.mxu0 %v2355_v5 }
 0xb55   : > { %2390 = vmatprep.subr.mxu0 %v2354_v30  ;;  %v2554_v30 = vld [vmem:[%s6592_s15 + $0x28] sm:$0xff] }
 0xb56   : > { %2391 = vmatpush1.msra.mxu0 %v2353_v20  ;;  %v2552_v20 = vld [vmem:[%s6592_s15 + $0x18] sm:$0xff] }
 0xb57   : > { %2392 = vmatprep.subr.mxu0 %v2352_v59  ;;  %v2549_v59 = vld [vmem:[%s6592_s15] sm:$0xff] }
 0xb58   : > { %2393 = vmatpush1.msra.mxu0 %v2351_v53 }
 0xb59   : > { %2394 = vmatprep.subr.mxu0 %v2350_v18 }
 0xc0d   : > { %v2294_v12 = vpop.f32.mrf.mxu0 }
 0xc0e   : > { %v2295_v14 = vadd.f32 %v2294_v12, %v2222_v44  ;;  %v2338_v44 = vld [vmem:[#allocation28] sm:$0xff]  ;;  %v2349_v12 = vld [vmem:[#allocation30 + $0x10] sm:$0xff] }
 0xc0f   : > { %v4311_v57 = vpop.f32.mrf.mxu0  ;;  %2470 = vmatpush1.msra.mxu1 %v2338_v44  ;;  %2395 = vmatpush1.msra.mxu0 %v2349_v12 }
 0xc10   : > { %v2298_v61 = vadd.f32 %v6588_v58, %v2295_v14  ;;  %v2348_v14 = vld [vmem:[#allocation30 + $0x8] sm:$0xff]  ;;  %v2347_v57 = vld [vmem:[#allocation30] sm:$0xff]  ;;  %4312 = vmatprep.subr.mxu1 %v6537_v7 }
 0xc11   : > { %v2346_v58 = vld [vmem:[#allocation6] sm:$0xff]  ;;  %2396 = vmatprep.subr.mxu0 %v2348_v14 }
 0xc12   : > { %4507 = vtanh.f32 %v2298_v61  ;;  %v4109_v16 = vmul.f32 -1.442695, %v2298_v61  ;;  %2397 = vmatpush1.msra.mxu0 %v2347_v57  ;;  %v2512_v61 = vld [vmem:[#allocation7] sm:$0xff] }
 0xc13   : > { %4110 = vmatmul.mubr.msk.f32.vlgmr.msra.gmra.mxu0 %vm488_vm2, %v2346_v58  ;;  %4331 = vmatprep.subr.mxu0 %v6537_v7 }
 0xc14   : > { %4509 = vpow2.f32 %v4109_v16  ;;  %4339 = vmatprep.mubr.msk.f32.mxu0 %vm5097_vm13, %v6537_v7 }
 0xc1f   : > { %v4508_v3 = vpop.eup %4507 }
 0xc20   : > { %2313 = vrot.lane.b32.xlu0 %v4508_v3, %s5100_s12 }
 0xc21   : > { %v4510_v17 = vpop.eup %4509 }
 0xc22   : > { %v2303_v19 = vadd.f32 1.0, %v4510_v17 }
 0xc24   : > { %4511 = vrcp.f32 %v2303_v19 }
 0xc31   : > { %v5960_v4 = vpop.eup %4511 }
 0xc32   : > { %v2311_v15 = vmul.f32 %v5960_v4, %v2309_v2  ;;  %v6590_v2 = vld [vmem:[#allocation74_spill] sm:$0xff] }
 0xc33   : > { %v6593_v27 = vrot.slane %v6590_v2, %v5352_v29 }
 0xc92   : > { %v2314_v9 = vpop.permute.xlu0 %2313 }
 0xc93   : > { %v2316_v54 = vmul.f32 %v5960_v4, %v2314_v9 }
 0xc95   : > { %2318 = vrot.lane.b32.xlu0 %v2316_v54, %s5098_s11 }
 0xcd3   : > { %v2432_v19 = vpop.f32.mrf.mxu0 }
 0xcd5   : > { %v2434_v56 = vpop.f32.mrf.mxu0 }
 0xd07   : > { %v2319_v1 = vpop.permute.xlu0 %2318 }
 0xd08   : > { %v5965_v55 = vadd.f32 %v2319_v1, %v2311_v15  ;;  %v6591_v15 = vrot.slane %v6590_v2, %v5349_v28 }
 0xd0a   : > { %6589 = vst [vmem:[#allocation84_spill] sm:$0xff] %v5965_v55  ;;  %4513 = vtanh.f32 %v5965_v55 }
 0xd17   : > { %v4514_v8 = vpop.eup %4513 }
 0xd18   : > { %2324 = vrot.lane.b32.xlu1 %v4514_v8, %s5100_s12 }
 0xd1c   : > { %2527 = vrot.lane.b32.xlu1 %v2512_v61, %s5100_s12 }
 0xd8a   : > { %v2325_v3 = vpop.permute.xlu1 %2324 }
 0xd8b   : > { %v2327_v16 = vmul.f32 %v5960_v4, %v2325_v3 }
 0xd8d   : > { %2329 = vrot.lane.b32.xlu0 %v2327_v16, %s5098_s11  ;;  %v2633_v16 = vld [vmem:[#allocation37 + $0x18] sm:$0xff] }
 0xd8e   : > { %v2528_v8 = vpop.permute.xlu1 %2527  ;;  %4332 = vmatpush3.msra.mxu0 %v2633_v16  ;;  %v2711_v16 = vld [vmem:[%s6597_s27 + $0x20] sm:$0xff] }
 0xd8f   : > { %4333 = vmatprep.subr.mxu0 %v6537_v7 }
 0xdff   : > { %v2330_v17 = vpop.permute.xlu0 %2329 }
 0xe00   : > { %2332 = vst.msk [vmem:[#allocation4] sm:$0xff] %vm455_vm1, %v2330_v17  ;;  %4111 = vmatmul.mubr.msk.f32.vlgmr.msra.gmra.mxu1 %vm455_vm1, %v2330_v17  ;;  %v3780_v17 = vld [vmem:[%s6594_s5 + $0x38] sm:$0xff] }
 0xe01   : > { %4328 = vmatprep.mubr.msk.f32.mxu1 %vm5097_vm13, %v6537_v7  ;;  %4313 = vmatpush3.msra.mxu1 %v2556_v11 }
 0xe02   : > { %4314 = vmatprep.subr.mxu1 %v6537_v7 }
 0xe03   : > { %4315 = vmatpush3.msra.mxu1 %v2555_v62 }
 0xe04   : > { %4316 = vmatprep.subr.mxu1 %v6537_v7 }
 0xe05   : > { %4317 = vmatpush3.msra.mxu1 %v2554_v30 }
 0xe06   : > { %4318 = vmatprep.subr.mxu1 %v6537_v7 }
 0xe07   : > { %4319 = vmatpush3.msra.mxu1 %v2553_v10  ;;  %v6599_v10 = vld [vmem:[#allocation76_spill] sm:$0xff] }
 0xe08   : > { %4320 = vmatprep.subr.mxu1 %v6537_v7 }
 0xe09   : > { %4321 = vmatpush3.msra.mxu1 %v2552_v20 }
 0xe0a   : > { %4322 = vmatprep.subr.mxu1 %v6537_v7 }
 0xe0b   : > { %4323 = vmatpush3.msra.mxu1 %v2551_v60 }
 0xe0c   : > { %4324 = vmatprep.subr.mxu1 %v6537_v7 }
 0xe0d   : > { %4325 = vmatpush3.msra.mxu1 %v2550_v0 }
 0xe0e   : > { %4326 = vmatprep.subr.mxu1 %v6537_v7 }
 0xe0f   : > { %4327 = vmatpush3.msra.mxu1 %v2549_v59  ;;  %v6600_v59 = vld [vmem:[#allocation77_spill] sm:$0xff] }
 0xe10   : > { %4353 = vmatprep.subr.mxu1 %v6537_v7 }
 0xec0   : > { %v2505_v9 = vpop.f32.mrf.mxu1 }
 0xec1   : > { %v2506_v54 = vadd.f32 %v2505_v9, %v2432_v19  ;;  %v3779_v9 = vld [vmem:[%s6594_s5 + $0x30] sm:$0xff] }
 0xec2   : > { %v2507_v24 = vpop.f32.mrf.mxu1 }
 0xec3   : > { %v2510_v1 = vadd.f32 %v2506_v54, %v6591_v15  ;;  %v2508_v6 = vadd.f32 %v2507_v24, %v2434_v56  ;;  %v3778_v54 = vld [vmem:[%s6594_s5 + $0x28] sm:$0xff]  ;;  %v3777_v15 = vld [vmem:[%s6594_s5 + $0x20] sm:$0xff] }
 0xec4   : > { %v3774_v24 = vld [vmem:[%s6594_s5 + $0x8] sm:$0xff]  ;;  %v3773_v56 = vld [vmem:[%s6594_s5] sm:$0xff] }
 0xec5   : > { %v4112_v4 = vmul.f32 -1.442695, %v2510_v1  ;;  %v2511_v13 = vadd.f32 %v2508_v6, %v6593_v27  ;;  %v3776_v1 = vld [vmem:[%s6594_s5 + $0x18] sm:$0xff]  ;;  %v2632_v6 = vld [vmem:[#allocation37 + $0x10] sm:$0xff]  ;;  %v2631_v27 = vld [vmem:[#allocation37 + $0x8] sm:$0xff] }
 0xec6   : > { %4334 = vmatpush3.msra.mxu0 %v2632_v6 }
 0xec7   : > { %4515 = vpow2.f32 %v4112_v4  ;;  %v4113_v53 = vmul.f32 -1.442695, %v2511_v13  ;;  %v3775_v4 = vld [vmem:[%s6594_s5 + $0x10] sm:$0xff]  ;;  %4335 = vmatprep.subr.mxu0 %v6537_v7 }
 0xec8   : > { %4517 = vtanh.f32 %v2511_v13  ;;  %4336 = vmatpush3.msra.mxu0 %v2631_v27  ;;  %v2630_v13 = vld [vmem:[#allocation37] sm:$0xff] }
 0xec9   : > { %4337 = vmatprep.subr.mxu0 %v6537_v7 }
 0xeca   : > { %4338 = vmatpush3.msra.mxu0 %v2630_v13 }
 0xecb   : > { %4342 = vmatprep.subr.mxu0 %v6537_v7 }
 0xed4   : > { %v4516_v21 = vpop.eup %4515 }
 0xed5   : > { %v2516_v63 = vadd.f32 1.0, %v4516_v21  ;;  %v4518_v22 = vpop.eup %4517 }
 0xed7   : > { %4519 = vrcp.f32 %v2516_v63  ;;  %v6596_v63 = vld [vmem:[#allocation75_spill] sm:$0xff] }
 0xed8   : > { %4521 = vpow2.f32 %v4113_v53 }
 0xee4   : > { %v4520_v25 = vpop.eup %4519 }
 0xee5   : > { %v2531_v5 = vmul.f32 %v4520_v25, %v4518_v22  ;;  %v4522_v44 = vpop.eup %4521  ;;  %v2530_v12 = vmul.f32 %v4520_v25, %v2528_v8 }
 0xee6   : > { %v2523_v18 = vadd.f32 1.0, %v4522_v44 }
 0xee7   : > { %2533 = vrot.lane.b32.xlu0 %v2531_v5, %s5100_s12 }
 0xee8   : > { %4523 = vrcp.f32 %v2523_v18 }
 0xef5   : > { %v4524_v58 = vpop.eup %4523 }
 0xf59   : > { %v2534_v14 = vpop.permute.xlu0 %2533 }
 0xf5a   : > { %v6004_v57 = vadd.f32 %v2534_v14, %v2530_v12  ;;  %v2708_v12 = vld [vmem:[%s6597_s27 + $0x8] sm:$0xff]  ;;  %v2707_v14 = vld [vmem:[%s6597_s27] sm:$0xff] }
 0xf5c   : > { %6595 = vst [vmem:[#allocation85_spill] sm:$0xff] %v6004_v57  ;;  %4525 = vtanh.f32 %v6004_v57 }
 0xf69   : > { %v4526_v61 = vpop.eup %4525 }
 0xf6a   : > { %v2538_v3 = vmul.f32 %v4526_v61, %v4524_v58 }
 0xf6c   : > { %2540 = vrot.lane.b32.xlu1 %v2538_v3, %s5100_s12 }
 0xfde   : > { %v2541_v19 = vpop.permute.xlu1 %2540 }
 0xfdf   : > { %2543 = vst.msk [vmem:[#allocation6] sm:$0xff] %vm488_vm2, %v2541_v19  ;;  %4329 = vmatmul.mubr.msk.f32.vlgmr.msra.gmra.mxu1 %vm488_vm2, %v2541_v19 }
 0xfe0   : > { %4354 = vmatpush3.msra.mxu1 %v3780_v17  ;;  %4369 = vmatprep.mubr.msk.f32.mxu1 %vm5097_vm13, %v6537_v7  ;;  %v2709_v17 = vld [vmem:[%s6597_s27 + $0x10] sm:$0xff] }
 0xfe1   : > { %4355 = vmatprep.subr.mxu1 %v6537_v7 }
 0xfe2   : > { %4356 = vmatpush3.msra.mxu1 %v3779_v9 }
 0xfe3   : > { %4357 = vmatprep.subr.mxu1 %v6537_v7 }
 0xfe4   : > { %4358 = vmatpush3.msra.mxu1 %v3778_v54 }
 0xfe5   : > { %4359 = vmatprep.subr.mxu1 %v6537_v7 }
 0xfe6   : > { %4360 = vmatpush3.msra.mxu1 %v3777_v15 }
 0xfe7   : > { %4361 = vmatprep.subr.mxu1 %v6537_v7 }
 0xfe8   : > { %4362 = vmatpush3.msra.mxu1 %v3776_v1 }
 0xfe9   : > { %4363 = vmatprep.subr.mxu1 %v6537_v7 }
 0xfea   : > { %4364 = vmatpush3.msra.mxu1 %v3775_v4 }
 0xfeb   : > { %4365 = vmatprep.subr.mxu1 %v6537_v7 }
 0xfec   : > { %4366 = vmatpush3.msra.mxu1 %v3774_v24 }
 0xfed   : > { %4367 = vmatprep.subr.mxu1 %v6537_v7 }
 0xfee   : > { %4368 = vmatpush3.msra.mxu1 %v3773_v56 }
 0xfef   : > { %4370 = vmatmul.mubr.msk.f32.vlgmr.msra.gmra.mxu1 %vm488_vm2, %v2541_v19 }
0x109f   : > { %v2625_v21 = vpop.f32.mrf.mxu1 }
0x10a0   : > { %v2626_v22 = vadd.f32 %v6596_v63, %v2625_v21  ;;  %v2710_v63 = vld [vmem:[%s6597_s27 + $0x18] sm:$0xff] }
0x10a1   : > { %v4330_v25 = vpop.f32.mrf.mxu1 }
0x10a2   : > { %v2629_v5 = vmax.f32 %v2626_v22, 0.0  ;;  %v2715_v22 = vld [vmem:[%s6597_s27 + $0x40] sm:$0xff] }
0x10a4   : > { %4340 = vmatmul.mubr.msk.f32.vlgmr.msra.gmra.mxu0 %vm455_vm1, %v2629_v5 }
0x10a5   : > { %4350 = vmatprep.mubr.msk.f32.mxu0 %vm5097_vm13, %v6537_v7 }
0x10af   : > { %v6036_v11 = vpop.f32.mrf.mxu1 }
0x10b0   : > { %6598 = vst [vmem:[#allocation86_spill] sm:$0xff] %v6036_v11 }
0x10b1   : > { %v4371_v62 = vpop.f32.mrf.mxu1 }
0x1164   : > { %v2703_v30 = vpop.f32.mrf.mxu0 }
0x1165   : > { %v2704_v20 = vadd.f32 %v6599_v10, %v2703_v30 }
0x1166   : > { %v4341_v60 = vpop.f32.mrf.mxu0 }
0x1167   : > { %v2740_v0 = vcombine.high %v2704_v20, %v2704_v20  ;;  %v2747_v53 = vrot.slane %v2704_v20, %v6600_v59  ;;  %v2712_v20 = vld [vmem:[%s6597_s27 + $0x28] sm:$0xff] }
0x1169   : > { %v2754_v44 = vrot.slane %v2740_v0, %v6600_v59  ;;  %v2755_v8 = vcombine.high %v2747_v53, %v2747_v53  ;;  %v2763_v18 = vrot.slane %v2747_v53, %v6600_v59  ;;  %v2713_v0 = vld [vmem:[%s6597_s27 + $0x30] sm:$0xff] }
0x116b   : > { %v2792_v58 = vrot.slane %v2763_v18, %v5349_v28  ;;  %v2785_v61 = vcombine.high %v2763_v18, %v2763_v18  ;;  %v2777_v3 = vrot.slane %v2755_v8, %v6600_v59  ;;  %v2770_v19 = vrot.slane %v2754_v44, %v6600_v59 }
0x116c   : > { %v2756_v4 = vcombine.high %v2754_v44, %v2754_v44 }
0x116d   : > { %v2830_v9 = vmul.f32 %v2792_v58, %v2708_v12  ;;  %v2829_v54 = vmul.f32 %v2792_v58, %v2707_v14  ;;  %v2800_v15 = vrot.slane %v2785_v61, %v5349_v28  ;;  %v2796_v1 = vrot.slane %v2777_v3, %v5349_v28  ;;  %v2716_v14 = vld [vmem:[%s6597_s27 + $0x48] sm:$0xff]  ;;  %v2717_v61 = vld [vmem:[%s6597_s27 + $0x50] sm:$0xff] }
0x116e   : > { %v2808_v24 = vrot.slane %v2770_v19, %v5349_v28  ;;  %v2787_v56 = vcombine.high %v2777_v3, %v2777_v3  ;;  %v2784_v5 = vrot.slane %v2756_v4, %v6600_v59  ;;  %v2786_v44 = vcombine.high %v2770_v19, %v2770_v19 }
0x116f   : > { %v2848_v6 = vsel %vm455_vm1, %v2830_v9, 0.0  ;;  %v2845_v27 = vsel %vm455_vm1, %v2829_v54, 0.0  ;;  %v2833_v13 = vmul.f32 %v2800_v15, %v2711_v16  ;;  %v2831_v21 = vmul.f32 %v2796_v1, %v2709_v17 }
0x1170   : > { %2849 = vadd.xlane.f32.xlu1 %v2848_v6  ;;  %2846 = vadd.xlane.f32.xlu0 %v2845_v27  ;;  %v2832_v25 = vmul.f32 %v2796_v1, %v2710_v63  ;;  %v2837_v10 = vmul.f32 %v2808_v24, %v2715_v22  ;;  %v2804_v60 = vrot.slane %v2787_v56, %v5349_v28  ;;  %v2719_v1 = vld [vmem:[%s6597_s27 + $0x60] sm:$0xff] }
0x1171   : > { %v2857_v62 = vsel %vm455_vm1, %v2833_v13, 0.0  ;;  %v2851_v30 = vsel %vm455_vm1, %v2831_v21, 0.0  ;;  %v2834_v53 = vmul.f32 %v2800_v15, %v2712_v20  ;;  %v2812_v58 = vrot.slane %v2784_v5, %v5349_v28  ;;  %v2714_v15 = vld [vmem:[%s6597_s27 + $0x38] sm:$0xff]  ;;  %v2721_v21 = vld [vmem:[%s6597_s27 + $0x70] sm:$0xff] }
0x1172   : > { %v2854_v8 = vsel %vm455_vm1, %v2832_v25, 0.0  ;;  %v2869_v18 = vsel %vm455_vm1, %v2837_v10, 0.0  ;;  %v2835_v12 = vmul.f32 %v2804_v60, %v2713_v0  ;;  %v2838_v16 = vmul.f32 %v2808_v24, %v2716_v14  ;;  %v2718_v13 = vld [vmem:[%s6597_s27 + $0x58] sm:$0xff] }
0x1173   : > { %v2860_v3 = vsel %vm455_vm1, %v2834_v53, 0.0  ;;  %v2839_v19 = vmul.f32 %v2812_v58, %v2717_v61  ;;  %v2816_v9 = vrot.slane %v2786_v44, %v5349_v28  ;;  %v2788_v54 = vcombine.high %v2784_v5, %v2784_v5 }
0x1174   : > { %2858 = vadd.xlane.f32.xlu1 %v2857_v62  ;;  %2852 = vadd.xlane.f32.xlu0 %v2851_v30  ;;  %v2863_v17 = vsel %vm455_vm1, %v2835_v12, 0.0  ;;  %v2872_v4 = vsel %vm455_vm1, %v2838_v16, 0.0  ;;  %v2836_v6 = vmul.f32 %v2804_v60, %v2714_v15  ;;  %v2840_v25 = vmul.f32 %v2812_v58, %v2718_v13  ;;  %v2720_v62 = vld [vmem:[%s6597_s27 + $0x68] sm:$0xff]  ;;  %v2722_v60 = vld [vmem:[%s6597_s27 + $0x78] sm:$0xff] }
0x1175   : > { %v2875_v56 = vsel %vm455_vm1, %v2839_v19, 0.0  ;;  %v2841_v27 = vmul.f32 %v2816_v9, %v2719_v1  ;;  %v2820_v24 = vrot.slane %v2788_v54, %v5349_v28  ;;  %v2842_v20 = vmul.f32 %v2816_v9, %v2720_v62 }
0x1176   : > { %v2866_v63 = vsel %vm455_vm1, %v2836_v6, 0.0  ;;  %v2878_v30 = vsel %vm455_vm1, %v2840_v25, 0.0 }
0x1177   : > { %v2881_v22 = vsel %vm455_vm1, %v2841_v27, 0.0  ;;  %v2843_v5 = vmul.f32 %v2820_v24, %v2721_v21  ;;  %v2884_v0 = vsel %vm455_vm1, %v2842_v20, 0.0  ;;  %v2844_v53 = vmul.f32 %v2820_v24, %v2722_v60 }
0x1178   : > { %2855 = vadd.xlane.f32.xlu0 %v2854_v8  ;;  %2870 = vadd.xlane.f32.xlu1 %v2869_v18 }
0x1179   : > { %v2887_v10 = vsel %vm455_vm1, %v2843_v5, 0.0  ;;  %v2890_v44 = vsel %vm455_vm1, %v2844_v53, 0.0 }
0x117c   : > { %2861 = vadd.xlane.f32.xlu0 %v2860_v3  ;;  %2864 = vadd.xlane.f32.xlu1 %v2863_v17 }
0x1180   : > { %2873 = vadd.xlane.f32.xlu0 %v2872_v4  ;;  %2876 = vadd.xlane.f32.xlu1 %v2875_v56 }
0x1184   : > { %2867 = vadd.xlane.f32.xlu0 %v2866_v63  ;;  %2882 = vadd.xlane.f32.xlu1 %v2881_v22 }
0x1188   : > { %2879 = vadd.xlane.f32.xlu0 %v2878_v30  ;;  %2888 = vadd.xlane.f32.xlu1 %v2887_v10  ;;  %v6601_v10 = vld [vmem:[#allocation79_spill] sm:$0xff] }
0x118c   : > { %2885 = vadd.xlane.f32.xlu0 %v2884_v0 }
0x1190   : > { %2891 = vadd.xlane.f32.xlu0 %v2890_v44  ;;  %v6603_v44 = vld [vmem:[#allocation80_spill] sm:$0xff] }
0x11f9   : > { %v2850_v8 = vpop.xlane.xlu1 %2849  ;;  %v2847_v18 = vpop.xlane.xlu0 %2846 }
0x11fa   : > { %v6086_v12 = vmul.f32 %v2850_v8, %v5449_v34  ;;  %v6089_v14 = vmul.f32 %v2847_v18, %v5453_v37 }
0x11fc   : > { %2929 = vperm.xlu0 %4497, %v6086_v12   ;;  %2926 = vperm.xlu1 %4498, %v6089_v14  }
0x11fd   : > { %v2859_v58 = vpop.xlane.xlu1 %2858  ;;  %v2853_v61 = vpop.xlane.xlu0 %2852 }
0x11fe   : > { %v6094_v3 = vmul.f32 %v2859_v58, %v5457_v41  ;;  %v6097_v16 = vmul.f32 %v2853_v61, %v5451_v35 }
0x1200   : > { %2938 = vperm.xlu0 %4497, %v6094_v3   ;;  %2932 = vperm.xlu1 %4498, %v6097_v16  }
0x1201   : > { %v2856_v17 = vpop.xlane.xlu0 %2855  ;;  %v2871_v19 = vpop.xlane.xlu1 %2870 }
0x1202   : > { %v6102_v9 = vmul.f32 %v2856_v17, %v5455_v39  ;;  %v6105_v54 = vmul.f32 %v2871_v19, %v5465_v47 }
0x1204   : > { %2950 = vperm.xlu0 %4497, %v6105_v54   ;;  %2935 = vperm.xlu1 %4498, %v6102_v9  }
0x1205   : > { %v2862_v15 = vpop.xlane.xlu0 %2861  ;;  %v2865_v1 = vpop.xlane.xlu1 %2864 }
0x1206   : > { %v6110_v4 = vmul.f32 %v2862_v15, %v5459_v43  ;;  %v6113_v56 = vmul.f32 %v2865_v1, %v5461_v45 }
0x1208   : > { %2944 = vperm.xlu0 %4497, %v6113_v56   ;;  %2941 = vperm.xlu1 %4498, %v6110_v4  }
0x1209   : > { %v2874_v6 = vpop.xlane.xlu0 %2873  ;;  %v2877_v27 = vpop.xlane.xlu1 %2876 }
0x120a   : > { %v6118_v24 = vmul.f32 %v2874_v6, %v5467_v26  ;;  %v6121_v13 = vmul.f32 %v2877_v27, %v5469_v48 }
0x120c   : > { %2956 = vperm.xlu0 %4497, %v6121_v13   ;;  %2953 = vperm.xlu1 %4498, %v6118_v24  }
0x120d   : > { %v2868_v21 = vpop.xlane.xlu0 %2867  ;;  %v2883_v63 = vpop.xlane.xlu1 %2882 }
0x120e   : > { %v6126_v22 = vmul.f32 %v2868_v21, %v5463_v46  ;;  %v6129_v25 = vmul.f32 %v2883_v63, %v5473_v50 }
0x1210   : > { %2962 = vperm.xlu0 %4497, %v6129_v25   ;;  %2947 = vperm.xlu1 %4498, %v6126_v22  }
0x1211   : > { %v2880_v5 = vpop.xlane.xlu0 %2879  ;;  %v2889_v62 = vpop.xlane.xlu1 %2888 }
0x1212   : > { %v6134_v30 = vmul.f32 %v2880_v5, %v5471_v49  ;;  %v6137_v20 = vmul.f32 %v2889_v62, %v6601_v10 }
0x1214   : > { %2959 = vperm.xlu1 %4498, %v6134_v30   ;;  %2968 = vperm.xlu0 %4497, %v6137_v20  }
0x1215   : > { %v2886_v60 = vpop.xlane.xlu0 %2885 }
0x1216   : > { %v6142_v0 = vmul.f32 %v2886_v60, %v6602_v51 }
0x1218   : > { %2965 = vperm.xlu1 %4498, %v6142_v0  }
0x1219   : > { %v2892_v53 = vpop.xlane.xlu0 %2891 }
0x121a   : > { %v6146_v8 = vmul.f32 %v2892_v53, %v6603_v44 }
0x121c   : > { %2971 = vperm.xlu1 %4498, %v6146_v8  }
0x1277   : > { %v2930_v18 = vpop.permute.xlu0 %2929  ;;  %v2927_v58 = vpop.permute.xlu1 %2926 }
0x1278   : > { %v2980_v60 = vrot.slane %v2930_v18, %v5554_v31  ;;  %v2976_v53 = vrot.slane %v2927_v58, %v5551_v33 }
0x127b   : > { %v2939_v61 = vpop.permute.xlu0 %2938  ;;  %v2933_v17 = vpop.permute.xlu1 %2932 }
0x127c   : > { %v2985_v7 = vrot.slane %v2933_v17, %v5551_v33  ;;  %v2994_v59 = vrot.slane %v2939_v61, %v5551_v33 }
0x127f   : > { %v2951_v19 = vpop.permute.xlu0 %2950  ;;  %v2936_v15 = vpop.permute.xlu1 %2935 }
0x1280   : > { %v2989_v5 = vrot.slane %v2936_v15, %v5554_v31 }
0x1282   : > { %v2990_v55 = vsel %vm1038_vm4, %v2989_v5, %v2985_v7 }
0x1283   : > { %v2945_v1 = vpop.permute.xlu0 %2944  ;;  %v2942_v6 = vpop.permute.xlu1 %2941 }
0x1284   : > { %v2998_v62 = vrot.slane %v2942_v6, %v5554_v31  ;;  %v3003_v52 = vrot.slane %v2945_v1, %v5551_v33  ;;  %v2981_v6 = vsel %vm1038_vm4, %v2980_v60, %v2976_v53  ;;  %v3012_v1 = vrot.slane %v2951_v19, %v5551_v33 }
0x1285   : > { %v3045_v17 = vsel %vm1103_vm5, %v2990_v55, %v2981_v6 }
0x1286   : > { %v2999_v15 = vsel %vm1038_vm4, %v2998_v62, %v2994_v59 }
0x1287   : > { %v2954_v27 = vpop.permute.xlu1 %2953  ;;  %v2957_v21 = vpop.permute.xlu0 %2956  ;;  %v3046_v61 = vsel %vm1105_vm6, %v2999_v15, %v3045_v17 }
0x1288   : > { %v3021_v51 = vrot.slane %v2957_v21, %v5551_v33 }
0x128b   : > { %v2948_v63 = vpop.permute.xlu1 %2947  ;;  %v2963_v11 = vpop.permute.xlu0 %2962 }
0x128c   : > { %v3007_v2 = vrot.slane %v2948_v63, %v5554_v31  ;;  %v3016_v63 = vrot.slane %v2954_v27, %v5554_v31  ;;  %v3030_v59 = vrot.slane %v2963_v11, %v5551_v33 }
0x128e   : > { %v3008_v18 = vsel %vm1038_vm4, %v3007_v2, %v3003_v52  ;;  %v3017_v55 = vsel %vm1038_vm4, %v3016_v63, %v3012_v1 }
0x128f   : > { %v2960_v57 = vpop.permute.xlu1 %2959  ;;  %v3047_v5 = vsel %vm1107_vm7, %v3008_v18, %v3046_v61  ;;  %v2969_v52 = vpop.permute.xlu0 %2968 }
0x1290   : > { %v3025_v58 = vrot.slane %v2960_v57, %v5554_v31  ;;  %v3039_v62 = vrot.slane %v2969_v52, %v5551_v33 }
0x1292   : > { %v3026_v2 = vsel %vm1038_vm4, %v3025_v58, %v3021_v51 }
0x1293   : > { %v2966_v10 = vpop.permute.xlu1 %2965 }
0x1294   : > { %v3034_v7 = vrot.slane %v2966_v10, %v5554_v31  ;;  %v3048_v10 = vsel %vm1109_vm8, %v3017_v55, %v3047_v5 }
0x1295   : > { %v3049_v19 = vsel %vm1111_vm9, %v3026_v2, %v3048_v10 }
0x1296   : > { %v3035_v57 = vsel %vm1038_vm4, %v3034_v7, %v3030_v59 }
0x1297   : > { %v2972_v27 = vpop.permute.xlu1 %2971  ;;  %v3050_v60 = vsel %vm1113_vm10, %v3035_v57, %v3049_v19 }
0x1298   : > { %v3043_v21 = vrot.slane %v2972_v27, %v5554_v31 }
0x129a   : > { %v3044_v11 = vsel %vm1038_vm4, %v3043_v21, %v3039_v62 }
0x129b   : > { %v3051_v53 = vsel %vm1115_vm11, %v3044_v11, %v3050_v60 }
0x129c   : > { %v3053_v51 = vsel %vm1118_vm12, %v3051_v53, -inf }
0x129d   : > { %3054 = vmax.xlane.f32.xlu0 %v3053_v51 }
0x1326   : > { %v3055_v15 = vpop.xlane.xlu0 %3054 }
0x1327   : > { %v3060_v6 = vrot.slane %v3055_v15, %v5349_v28  ;;  %v3064_v58 = vrot.slane %v3055_v15, %v5352_v29  ;;  %v3076_v17 = vrot.slane %v3055_v15, %v5373_v38  ;;  %v6189_v5 = vrot.slane %v3055_v15, %v5445_v23 }
0x1328   : > { %v3068_v2 = vrot.slane %v3055_v15, %v5359_v32  ;;  %v3072_v27 = vrot.slane %v3055_v15, %v5368_v36 }
0x1329   : > { %v3097_v18 = vsub.f32 %v6089_v14, %v3060_v6  ;;  %v3098_v63 = vsub.f32 %v6086_v12, %v3060_v6  ;;  %v3099_v7 = vsub.f32 %v6097_v16, %v3064_v58  ;;  %v3105_v1 = vsub.f32 %v6105_v54, %v3076_v17 }
0x132a   : > { %v3100_v14 = vsub.f32 %v6102_v9, %v3064_v58  ;;  %v3112_v12 = vsub.f32 %v6146_v8, %v6189_v5  ;;  %v3101_v16 = vsub.f32 %v6094_v3, %v3068_v2  ;;  %v3102_v62 = vsub.f32 %v6110_v4, %v3068_v2 }
0x132b   : > { %v3113_v61 = vmul.f32 1.442695, %v3097_v18  ;;  %v3115_v59 = vmul.f32 1.442695, %v3098_v63  ;;  %v3117_v52 = vmul.f32 1.442695, %v3099_v7  ;;  %v3103_v9 = vsub.f32 %v6113_v56, %v3072_v27 }
0x132c   : > { %v3129_v55 = vmul.f32 1.442695, %v3105_v1  ;;  %v3119_v57 = vmul.f32 1.442695, %v3100_v14  ;;  %v3143_v54 = vmul.f32 1.442695, %v3112_v12  ;;  %v3104_v11 = vsub.f32 %v6126_v22, %v3072_v27 }
0x132d   : > { %4527 = vpow2.f32 %v3113_v61  ;;  %v3121_v21 = vmul.f32 1.442695, %v3101_v16  ;;  %v3123_v8 = vmul.f32 1.442695, %v3102_v62  ;;  %v3125_v4 = vmul.f32 1.442695, %v3103_v9 }
0x132e   : > { %4529 = vpow2.f32 %v3115_v59  ;;  %v3080_v56 = vrot.slane %v3055_v15, %v5378_v40  ;;  %v3106_v53 = vsub.f32 %v6118_v24, %v3076_v17  ;;  %v3127_v51 = vmul.f32 1.442695, %v3104_v11 }
0x132f   : > { %4531 = vpow2.f32 %v3117_v52  ;;  %v3084_v24 = vrot.slane %v3055_v15, %v5383_v42 }
0x1330   : > { %4533 = vpow2.f32 %v3129_v55  ;;  %v3107_v22 = vsub.f32 %v6121_v13, %v3080_v56  ;;  %v3131_v58 = vmul.f32 1.442695, %v3106_v53  ;;  %v3108_v17 = vsub.f32 %v6134_v30, %v3080_v56 }
0x1331   : > { %4535 = vpow2.f32 %v3119_v57  ;;  %v3109_v13 = vsub.f32 %v6129_v25, %v3084_v24  ;;  %v3110_v52 = vsub.f32 %v6142_v0, %v3084_v24  ;;  %v3111_v30 = vsub.f32 %v6137_v20, %v6189_v5 }
0x1332   : > { %4537 = vpow2.f32 %v3143_v54  ;;  %v3133_v61 = vmul.f32 1.442695, %v3107_v22  ;;  %v3135_v1 = vmul.f32 1.442695, %v3108_v17 }
0x1333   : > { %4539 = vpow2.f32 %v3121_v21  ;;  %v3137_v15 = vmul.f32 1.442695, %v3109_v13  ;;  %v3139_v14 = vmul.f32 1.442695, %v3110_v52  ;;  %v3141_v55 = vmul.f32 1.442695, %v3111_v30 }
0x1334   : > { %4541 = vpow2.f32 %v3123_v8 }
0x1335   : > { %4543 = vpow2.f32 %v3125_v4 }
0x1336   : > { %4545 = vpow2.f32 %v3127_v51 }
0x1337   : > { %4547 = vpow2.f32 %v3131_v58 }
0x1338   : > { %4549 = vpow2.f32 %v3133_v61 }
0x1339   : > { %4551 = vpow2.f32 %v3135_v1 }
0x133a   : > { %v6198_v10 = vpop.eup %4527  ;;  %4553 = vpow2.f32 %v3137_v15 }
0x133b   : > { %3162 = vperm.xlu1 %4498, %v6198_v10   ;;  %v6202_v19 = vpop.eup %4529  ;;  %4555 = vpow2.f32 %v3139_v14 }
0x133c   : > { %v6205_v3 = vpop.eup %4531  ;;  %4557 = vpow2.f32 %v3141_v55 }
0x133d   : > { %v6208_v60 = vpop.eup %4533 }
0x133e   : > { %3186 = vperm.xlu0 %4497, %v6208_v60   ;;  %v6214_v6 = vpop.eup %4535 }
0x133f   : > { %3165 = vperm.xlu1 %4498, %v6202_v19   ;;  %v6217_v18 = vpop.eup %4537 }
0x1340   : > { %v6220_v63 = vpop.eup %4539 }
0x1341   : > { %v6226_v7 = vpop.eup %4541 }
0x1342   : > { %3207 = vperm.xlu0 %4497, %v6217_v18   ;;  %v6230_v59 = vpop.eup %4543 }
0x1343   : > { %3168 = vperm.xlu1 %4498, %v6205_v3   ;;  %v6234_v2 = vpop.eup %4545 }
0x1344   : > { %v6239_v25 = vpop.eup %4547 }
0x1345   : > { %v6242_v12 = vpop.eup %4549 }
0x1346   : > { %v6245_v0 = vpop.eup %4551 }
0x1347   : > { %3171 = vperm.xlu1 %4498, %v6214_v6   ;;  %v6248_v16 = vpop.eup %4553 }
0x1348   : > { %v6251_v20 = vpop.eup %4555 }
0x1349   : > { %v6254_v5 = vpop.eup %4557 }
0x134b   : > { %3174 = vperm.xlu1 %4498, %v6220_v63  }
0x134f   : > { %3177 = vperm.xlu1 %4498, %v6226_v7  }
0x1353   : > { %3180 = vperm.xlu1 %4498, %v6230_v59  }
0x1357   : > { %3183 = vperm.xlu1 %4498, %v6234_v2  }
0x135b   : > { %3189 = vperm.xlu1 %4498, %v6239_v25  }
0x135f   : > { %3192 = vperm.xlu1 %4498, %v6242_v12  }
0x1363   : > { %3195 = vperm.xlu1 %4498, %v6245_v0  }
0x1367   : > { %3198 = vperm.xlu1 %4498, %v6248_v16  }
0x136b   : > { %3201 = vperm.xlu1 %4498, %v6251_v20  }
0x136f   : > { %3204 = vperm.xlu1 %4498, %v6254_v5  }
0x13b6   : > { %v3163_v57 = vpop.permute.xlu1 %3162 }
0x13b7   : > { %v3212_v15 = vrot.slane %v3163_v57, %v5551_v33 }
0x13b9   : > { %v3187_v22 = vpop.permute.xlu0 %3186 }
0x13ba   : > { %v3166_v54 = vpop.permute.xlu1 %3165 }
0x13bb   : > { %v3216_v17 = vrot.slane %v3166_v54, %v5554_v31 }
0x13bd   : > { %v3208_v57 = vpop.permute.xlu0 %3207 }
0x13be   : > { %v3169_v27 = vpop.permute.xlu1 %3168 }
0x13bf   : > { %v3221_v61 = vrot.slane %v3169_v27, %v5551_v33  ;;  %v3217_v27 = vsel %vm1038_vm4, %v3216_v17, %v3212_v15 }
0x13c2   : > { %v3172_v62 = vpop.permute.xlu1 %3171 }
0x13c3   : > { %v3225_v51 = vrot.slane %v3172_v62, %v5554_v31  ;;  %v3248_v62 = vrot.slane %v3187_v22, %v5551_v33 }
0x13c5   : > { %v3226_v30 = vsel %vm1038_vm4, %v3225_v51, %v3221_v61 }
0x13c6   : > { %v3175_v21 = vpop.permute.xlu1 %3174  ;;  %v3281_v51 = vsel %vm1103_vm5, %v3226_v30, %v3217_v27 }
0x13c7   : > { %v3230_v1 = vrot.slane %v3175_v21, %v5551_v33 }
0x13ca   : > { %v3178_v9 = vpop.permute.xlu1 %3177 }
0x13cb   : > { %v3234_v58 = vrot.slane %v3178_v9, %v5554_v31 }
0x13cd   : > { %v3235_v54 = vsel %vm1038_vm4, %v3234_v58, %v3230_v1 }
0x13ce   : > { %v3181_v8 = vpop.permute.xlu1 %3180  ;;  %v3282_v22 = vsel %vm1105_vm6, %v3235_v54, %v3281_v51 }
0x13cf   : > { %v3239_v14 = vrot.slane %v3181_v8, %v5551_v33 }
0x13d2   : > { %v3184_v11 = vpop.permute.xlu1 %3183 }
0x13d3   : > { %v3243_v13 = vrot.slane %v3184_v11, %v5554_v31 }
0x13d5   : > { %v3244_v11 = vsel %vm1038_vm4, %v3243_v13, %v3239_v14 }
0x13d6   : > { %v3190_v4 = vpop.permute.xlu1 %3189  ;;  %v3283_v61 = vsel %vm1107_vm7, %v3244_v11, %v3282_v22 }
0x13d7   : > { %v3252_v52 = vrot.slane %v3190_v4, %v5554_v31 }
0x13d9   : > { %v3253_v8 = vsel %vm1038_vm4, %v3252_v52, %v3248_v62 }
0x13da   : > { %v3193_v56 = vpop.permute.xlu1 %3192  ;;  %v3284_v1 = vsel %vm1109_vm8, %v3253_v8, %v3283_v61 }
0x13db   : > { %v3257_v21 = vrot.slane %v3193_v56, %v5551_v33  ;;  %v3279_v56 = vrot.slane %v3208_v57, %v5554_v31 }
0x13de   : > { %v3196_v53 = vpop.permute.xlu1 %3195 }
0x13df   : > { %v3261_v55 = vrot.slane %v3196_v53, %v5554_v31 }
0x13e1   : > { %v3262_v58 = vsel %vm1038_vm4, %v3261_v55, %v3257_v21 }
0x13e2   : > { %v3199_v24 = vpop.permute.xlu1 %3198  ;;  %v3285_v30 = vsel %vm1111_vm9, %v3262_v58, %v3284_v1 }
0x13e3   : > { %v3266_v53 = vrot.slane %v3199_v24, %v5551_v33 }
0x13e6   : > { %v3202_v9 = vpop.permute.xlu1 %3201 }
0x13e7   : > { %v3270_v4 = vrot.slane %v3202_v9, %v5554_v31 }
0x13e9   : > { %v3271_v17 = vsel %vm1038_vm4, %v3270_v4, %v3266_v53 }
0x13ea   : > { %v3205_v13 = vpop.permute.xlu1 %3204  ;;  %v3286_v24 = vsel %vm1113_vm10, %v3271_v17, %v3285_v30 }
0x13eb   : > { %v3275_v15 = vrot.slane %v3205_v13, %v5551_v33 }
0x13ed   : > { %v3280_v52 = vsel %vm1038_vm4, %v3279_v56, %v3275_v15 }
0x13ee   : > { %v3287_v14 = vsel %vm1115_vm11, %v3280_v52, %v3286_v24 }
0x13ef   : > { %v3289_v55 = vsel %vm1118_vm12, %v3287_v14, 0.0 }
0x13f0   : > { %3290 = vadd.xlane.f32.xlu1 %v3289_v55 }
0x1479   : > { %v3291_v62 = vpop.xlane.xlu1 %3290 }
0x147a   : > { %4559 = vrcp.f32 %v3291_v62 }
0x1487   : > { %v4560_v54 = vpop.eup %4559 }
0x1488   : > { %v3313_v9 = vrot.slane %v4560_v54, %v5373_v38  ;;  %v3297_v27 = vrot.slane %v4560_v54, %v5349_v28  ;;  %v6292_v11 = vrot.slane %v4560_v54, %v5445_v23  ;;  %v3301_v21 = vrot.slane %v4560_v54, %v5352_v29 }
0x1489   : > { %v3309_v55 = vrot.slane %v4560_v54, %v5368_v36 }
0x148a   : > { %v3343_v4 = vmul.f32 %v6239_v25, %v3313_v9  ;;  %v3334_v57 = vmul.f32 %v6198_v10, %v3297_v27  ;;  %v3349_v51 = vmul.f32 %v6217_v18, %v6292_v11  ;;  %v3335_v8 = vmul.f32 %v6202_v19, %v3297_v27 }
0x148b   : > { %v3336_v58 = vmul.f32 %v6205_v3, %v3301_v21  ;;  %v3305_v19 = vrot.slane %v4560_v54, %v5359_v32  ;;  %v3337_v56 = vmul.f32 %v6214_v6, %v3301_v21  ;;  %v3340_v27 = vmul.f32 %v6230_v59, %v3309_v55 }
0x148c   : > { %v6301_v53 = vmul.f32 %v3343_v4, %v5467_v26  ;;  %v6304_v22 = vmul.f32 %v3334_v57, %v5453_v37  ;;  %v6310_v25 = vmul.f32 %v3349_v51, %v6603_v44  ;;  %v6313_v10 = vmul.f32 %v3335_v8, %v5449_v34 }
0x148d   : > { %v6319_v3 = vmul.f32 %v3336_v58, %v5451_v35  ;;  %v6324_v15 = vmul.f32 %v3337_v56, %v5455_v39  ;;  %v3338_v30 = vmul.f32 %v6220_v63, %v3305_v19  ;;  %v3339_v14 = vmul.f32 %v6226_v7, %v3305_v19 }
0x148e   : > { %v3375_v61 = vand.u32 2147483647, %v6301_v53  ;;  %v3366_v17 = vand.u32 2147483647, %v6304_v22  ;;  %v3381_v18 = vand.u32 2147483647, %v6310_v25  ;;  %v6340_v21 = vmul.f32 %v3340_v27, %v5461_v45 }
0x148f   : > { %v3367_v13 = vand.u32 2147483647, %v6313_v10  ;;  %v3368_v1 = vand.u32 2147483647, %v6319_v3  ;;  %v3369_v52 = vand.u32 2147483647, %v6324_v15  ;;  %v6329_v24 = vmul.f32 %v3338_v30, %v5457_v41 }
0x1490   : > { %3426 = vperm.xlu1 %4498, %v3375_v61   ;;  %3399 = vperm.xlu0 %4497, %v3366_v17   ;;  %v6335_v62 = vmul.f32 %v3339_v14, %v5459_v43  ;;  %v3341_v4 = vmul.f32 %v6234_v2, %v3309_v55  ;;  %v3372_v7 = vand.u32 2147483647, %v6340_v21  ;;  %v3342_v51 = vmul.f32 %v6208_v60, %v3313_v9  ;;  %v6605_v14 = vld [vmem:[#allocation79_spill] sm:$0xff] }
0x1491   : > { %v3370_v6 = vand.u32 2147483647, %v6329_v24  ;;  %v3317_v8 = vrot.slane %v4560_v54, %v5378_v40  ;;  %v3321_v60 = vrot.slane %v4560_v54, %v5383_v42  ;;  %v6604_v54 = vld [vmem:[#allocation78_spill] sm:$0xff] }
0x1492   : > { %v3371_v63 = vand.u32 2147483647, %v6335_v62  ;;  %v6345_v57 = vmul.f32 %v3341_v4, %v5463_v46  ;;  %v6351_v58 = vmul.f32 %v3342_v51, %v5465_v47 }
0x1493   : > { %v3344_v61 = vmul.f32 %v6242_v12, %v3317_v8  ;;  %v3345_v19 = vmul.f32 %v6245_v0, %v3317_v8 }
0x1494   : > { %3444 = vperm.xlu1 %4498, %v3381_v18   ;;  %3402 = vperm.xlu0 %4497, %v3367_v13   ;;  %v3373_v59 = vand.u32 2147483647, %v6345_v57  ;;  %v3374_v2 = vand.u32 2147483647, %v6351_v58  ;;  %v3346_v13 = vmul.f32 %v6248_v16, %v3321_v60 }
0x1495   : > { %v6356_v17 = vmul.f32 %v3344_v61, %v5469_v48  ;;  %v6362_v18 = vmul.f32 %v3345_v19, %v5471_v49 }
0x1496   : > { %v6367_v56 = vmul.f32 %v3346_v13, %v5473_v50 }
0x1497   : > { %v3376_v9 = vand.u32 2147483647, %v6356_v17  ;;  %v3377_v12 = vand.u32 2147483647, %v6362_v18 }
0x1498   : > { %3405 = vperm.xlu0 %4497, %v3368_v1   ;;  %v3347_v1 = vmul.f32 %v6251_v20, %v3321_v60  ;;  %v3378_v0 = vand.u32 2147483647, %v6367_v56 }
0x149a   : > { %v6372_v30 = vmul.f32 %v3347_v1, %v6604_v54 }
0x149c   : > { %3408 = vperm.xlu0 %4497, %v3369_v52   ;;  %v3348_v52 = vmul.f32 %v6254_v5, %v6292_v11  ;;  %v3379_v16 = vand.u32 2147483647, %v6372_v30 }
0x149e   : > { %v6378_v55 = vmul.f32 %v3348_v52, %v6605_v14 }
0x14a0   : > { %3411 = vperm.xlu0 %4497, %v3370_v6   ;;  %v3380_v6 = vand.u32 2147483647, %v6378_v55 }
0x14a4   : > { %3414 = vperm.xlu0 %4497, %v3371_v63  }
0x14a8   : > { %3417 = vperm.xlu0 %4497, %v3372_v7  }
0x14ac   : > { %3420 = vperm.xlu0 %4497, %v3373_v59  }
0x14b0   : > { %3423 = vperm.xlu0 %4497, %v3374_v2  }
0x14b4   : > { %3429 = vperm.xlu0 %4497, %v3376_v9  }
0x14b8   : > { %3432 = vperm.xlu0 %4497, %v3377_v12  }
0x14bc   : > { %3435 = vperm.xlu0 %4497, %v3378_v0  }
0x14c0   : > { %3438 = vperm.xlu0 %4497, %v3379_v16  }
0x14c4   : > { %3441 = vperm.xlu0 %4497, %v3380_v6  }
0x150b   : > { %v3400_v20 = vpop.permute.xlu0 %3399  ;;  %v3427_v19 = vpop.permute.xlu1 %3426 }
0x150c   : > { %v3449_v52 = vrot.slane %v3400_v20, %v5551_v33 }
0x150f   : > { %v3403_v27 = vpop.permute.xlu0 %3402  ;;  %v3445_v20 = vpop.permute.xlu1 %3444 }
0x1510   : > { %v3453_v13 = vrot.slane %v3403_v27, %v5554_v31 }
0x1513   : > { %v3406_v63 = vpop.permute.xlu0 %3405 }
0x1514   : > { %v3458_v12 = vrot.slane %v3406_v63, %v5551_v33  ;;  %v3454_v63 = vsel %vm1038_vm4, %v3453_v13, %v3449_v52 }
0x1517   : > { %v3409_v4 = vpop.permute.xlu0 %3408 }
0x1518   : > { %v3462_v2 = vrot.slane %v3409_v4, %v5554_v31  ;;  %v3489_v4 = vrot.slane %v3427_v19, %v5554_v31 }
0x151a   : > { %v3463_v16 = vsel %vm1038_vm4, %v3462_v2, %v3458_v12 }
0x151b   : > { %v3412_v7 = vpop.permute.xlu0 %3411  ;;  %v3518_v2 = vsel %vm1103_vm5, %v3463_v16, %v3454_v63 }
0x151c   : > { %v3467_v0 = vrot.slane %v3412_v7, %v5551_v33 }
0x151f   : > { %v3415_v51 = vpop.permute.xlu0 %3414 }
0x1520   : > { %v3471_v60 = vrot.slane %v3415_v51, %v5554_v31 }
0x1522   : > { %v3472_v27 = vsel %vm1038_vm4, %v3471_v60, %v3467_v0 }
0x1523   : > { %v3418_v8 = vpop.permute.xlu0 %3417  ;;  %v3519_v19 = vsel %vm1105_vm6, %v3472_v27, %v3518_v2 }
0x1524   : > { %v3476_v14 = vrot.slane %v3418_v8, %v5551_v33 }
0x1527   : > { %v3421_v59 = vpop.permute.xlu0 %3420 }
0x1528   : > { %v3480_v1 = vrot.slane %v3421_v59, %v5554_v31 }
0x152a   : > { %v3481_v59 = vsel %vm1038_vm4, %v3480_v1, %v3476_v14 }
0x152b   : > { %v3424_v61 = vpop.permute.xlu0 %3423  ;;  %v3520_v12 = vsel %vm1107_vm7, %v3481_v59, %v3519_v19 }
0x152c   : > { %v3485_v54 = vrot.slane %v3424_v61, %v5551_v33 }
0x152e   : > { %v3490_v8 = vsel %vm1038_vm4, %v3489_v4, %v3485_v54 }
0x152f   : > { %v3430_v5 = vpop.permute.xlu0 %3429  ;;  %v3521_v0 = vsel %vm1109_vm8, %v3490_v8, %v3520_v12  ;;  %v6607_v12 = vld [vmem:[#allocation84_spill] sm:$0xff] }
0x1530   : > { %v3494_v7 = vrot.slane %v3430_v5, %v5551_v33  ;;  %v3516_v5 = vrot.slane %v3445_v20, %v5554_v31 }
0x1533   : > { %v3433_v11 = vpop.permute.xlu0 %3432 }
0x1534   : > { %v3498_v6 = vrot.slane %v3433_v11, %v5554_v31 }
0x1536   : > { %v3499_v60 = vsel %vm1038_vm4, %v3498_v6, %v3494_v7 }
0x1537   : > { %v3436_v9 = vpop.permute.xlu0 %3435  ;;  %v3522_v16 = vsel %vm1111_vm9, %v3499_v60, %v3521_v0  ;;  %v6606_v60 = vld [vmem:[#allocation83_spill] sm:$0xff] }
0x1538   : > { %v3503_v11 = vrot.slane %v3436_v9, %v5551_v33 }
0x153b   : > { %v3439_v51 = vpop.permute.xlu0 %3438 }
0x153c   : > { %v3507_v61 = vrot.slane %v3439_v51, %v5554_v31 }
0x153e   : > { %v3508_v13 = vsel %vm1038_vm4, %v3507_v61, %v3503_v11 }
0x153f   : > { %v3442_v1 = vpop.permute.xlu0 %3441  ;;  %v3523_v9 = vsel %vm1113_vm10, %v3508_v13, %v3522_v16  ;;  %v3784_v16 = vld [vmem:[%s6609_s29 + $0x18] sm:$0xff] }
0x1540   : > { %v3512_v52 = vrot.slane %v3442_v1, %v5551_v33  ;;  %4343 = vmatpush3.msra.mxu0 %v3784_v16 }
0x1542   : > { %v3517_v54 = vsel %vm1038_vm4, %v3516_v5, %v3512_v52 }
0x1543   : > { %v3524_v14 = vsel %vm1115_vm11, %v3517_v54, %v3523_v9  ;;  %v3783_v54 = vld [vmem:[%s6609_s29 + $0x10] sm:$0xff]  ;;  %v3782_v9 = vld [vmem:[%s6609_s29 + $0x8] sm:$0xff] }
0x1544   : > { %v3526_v6 = vsel %vm1118_vm12, %v3524_v14, 0.0 }
0x1545   : > { %3527 = vadd.xlane.f32.xlu0 %v3526_v6 }
0x15ce   : > { %v3528_v4 = vpop.xlane.xlu0 %3527 }
0x15cf   : > { %v3529_v27 = vmax.f32 %v3528_v4, 1e-12 }
0x15d1   : > { %4561 = vrcp.f32 %v3529_v27 }
0x15de   : > { %v4562_v51 = vpop.eup %4561 }
0x15df   : > { %v3551_v63 = vrot.slane %v4562_v51, %v5373_v38  ;;  %v3535_v59 = vrot.slane %v4562_v51, %v5349_v28  ;;  %v3563_v20 = vrot.slane %v4562_v51, %v5445_v23  ;;  %v3539_v11 = vrot.slane %v4562_v51, %v5352_v29 }
0x15e1   : > { %v3580_v7 = vmul.f32 %v3551_v63, %v6351_v58  ;;  %v3572_v61 = vmul.f32 %v3535_v59, %v6304_v22  ;;  %v3587_v2 = vmul.f32 %v3563_v20, %v6310_v25  ;;  %v3573_v8 = vmul.f32 %v3535_v59, %v6313_v10  ;;  %v6608_v10 = vld [vmem:[#allocation85_spill] sm:$0xff] }
0x15e2   : > { %v3574_v19 = vmul.f32 %v3539_v11, %v6319_v3  ;;  %v3575_v22 = vmul.f32 %v3539_v11, %v6324_v15  ;;  %v3543_v58 = vrot.slane %v4562_v51, %v5359_v32  ;;  %v3547_v3 = vrot.slane %v4562_v51, %v5368_v36  ;;  %v2725_v11 = vld [vmem:[%s6611_s16 + $0x10] sm:$0xff] }
0x15e3   : > { %3630 = vperm.xlu0 %4497, %v3580_v7   ;;  %3590 = vperm.xlu1 %4498, %v3572_v61   ;;  %v3581_v5 = vmul.f32 %v3551_v63, %v6301_v53  ;;  %v3586_v53 = vmul.f32 %v3563_v20, %v6378_v55  ;;  %v2726_v20 = vld [vmem:[%s6611_s16 + $0x18] sm:$0xff] }
0x15e4   : > { %v3576_v25 = vmul.f32 %v3543_v58, %v6329_v24  ;;  %v3577_v13 = vmul.f32 %v3543_v58, %v6335_v62  ;;  %v3578_v1 = vmul.f32 %v3547_v3, %v6340_v21  ;;  %v3579_v15 = vmul.f32 %v3547_v3, %v6345_v57  ;;  %v2727_v58 = vld [vmem:[%s6611_s16 + $0x20] sm:$0xff] }
0x15e5   : > { %v3555_v24 = vrot.slane %v4562_v51, %v5378_v40  ;;  %v3559_v21 = vrot.slane %v4562_v51, %v5383_v42  ;;  %v2731_v3 = vld [vmem:[%s6611_s16 + $0x40] sm:$0xff] }
0x15e7   : > { %3665 = vperm.xlu0 %4497, %v3587_v2   ;;  %3595 = vperm.xlu1 %4498, %v3573_v8   ;;  %v3582_v0 = vmul.f32 %v3555_v24, %v6356_v17  ;;  %v3583_v62 = vmul.f32 %v3555_v24, %v6362_v18  ;;  %v3584_v57 = vmul.f32 %v3559_v21, %v6367_v56  ;;  %v6610_v17 = vmov 0.0   ;;  %v3781_v18 = vld [vmem:[%s6609_s29] sm:$0xff]  ;;  %v2728_v2 = vld [vmem:[%s6611_s16 + $0x28] sm:$0xff] }
0x15e8   : > { %v3585_v52 = vmul.f32 %v3559_v21, %v6372_v30  ;;  %4344 = vmatprep.subr.mxu0 %v6610_v17  ;;  %v2724_v8 = vld [vmem:[%s6611_s16 + $0x8] sm:$0xff] }
0x15e9   : > { %4345 = vmatpush3.msra.mxu0 %v3783_v54 }
0x15ea   : > { %4346 = vmatprep.subr.mxu0 %v6610_v17 }
0x15eb   : > { %2140 = vrot.lane.b32.xlu0 %v6606_v60, %s5101_s20  ;;  %3600 = vperm.xlu1 %4498, %v3574_v19   ;;  %v2730_v19 = vld [vmem:[%s6611_s16 + $0x38] sm:$0xff] }
0x15ec   : > { %4347 = vmatpush3.msra.mxu0 %v3782_v9 }
0x15ed   : > { %4348 = vmatprep.subr.mxu0 %v6610_v17 }
0x15ee   : > { %4349 = vmatpush3.msra.mxu0 %v3781_v18 }
0x15ef   : > { %2334 = vrot.lane.b32.xlu0 %v6607_v12, %s5101_s20  ;;  %3605 = vperm.xlu1 %4498, %v3575_v22   ;;  %v2723_v12 = vld [vmem:[%s6611_s16] sm:$0xff] }
0x15f0   : > { %4372 = vmatprep.subr.mxu0 %v6610_v17 }
0x15f3   : > { %2545 = vrot.lane.b32.xlu0 %v6608_v10, %s5100_s12  ;;  %3610 = vperm.xlu1 %4498, %v3576_v25   ;;  %v2729_v10 = vld [vmem:[%s6611_s16 + $0x30] sm:$0xff] }
0x15f7   : > { %3615 = vperm.xlu1 %4498, %v3577_v13   ;;  %v2732_v13 = vld [vmem:[%s6611_s16 + $0x48] sm:$0xff] }
0x15fb   : > { %3620 = vperm.xlu1 %4498, %v3578_v1  }
0x15ff   : > { %3625 = vperm.xlu1 %4498, %v3579_v15  }
0x1603   : > { %3635 = vperm.xlu1 %4498, %v3581_v5  }
0x1607   : > { %3640 = vperm.xlu1 %4498, %v3582_v0  }
0x160b   : > { %3645 = vperm.xlu1 %4498, %v3583_v62  }
0x160f   : > { %3650 = vperm.xlu1 %4498, %v3584_v57  }
0x1613   : > { %3655 = vperm.xlu1 %4498, %v3585_v52  }
0x1617   : > { %3660 = vperm.xlu1 %4498, %v3586_v53  }
0x165e   : > { %v3631_v56 = vpop.permute.xlu0 %3630  ;;  %v3591_v30 = vpop.permute.xlu1 %3590 }
0x165f   : > { %v3668_v62 = vmul.f32 %v3591_v30, %v2723_v12  ;;  %v3676_v53 = vmul.f32 %v3631_v56, %v2731_v3  ;;  %v2733_v30 = vld [vmem:[%s6611_s16 + $0x50] sm:$0xff] }
0x1662   : > { %v6449_v55 = vpop.permute.xlu0 %3665  ;;  %v3596_v14 = vpop.permute.xlu1 %3595 }
0x1663   : > { %v3669_v1 = vmul.f32 %v3596_v14, %v2724_v8 }
0x1665   : > { %v3685_v54 = vsel %vm455_vm1, %v3669_v1, 0.0 }
0x1666   : > { %v2141_v6 = vpop.permute.xlu0 %2140  ;;  %v3601_v4 = vpop.permute.xlu1 %3600 }
0x1667   : > { %2143 = vst.msk [vmem:[#allocation3] sm:$0xff] %vm455_vm1, %v2141_v6  ;;  %v3670_v15 = vmul.f32 %v3601_v4, %v2725_v11 }
0x1669   : > { %v3693_v9 = vsel %vm455_vm1, %v3670_v15, 0.0  ;;  %v2735_v15 = vld [vmem:[%s6611_s16 + $0x60] sm:$0xff] }
0x166a   : > { %v2335_v27 = vpop.permute.xlu0 %2334  ;;  %v3606_v51 = vpop.permute.xlu1 %3605 }
0x166b   : > { %2337 = vst.msk [vmem:[#allocation5] sm:$0xff] %vm455_vm1, %v2335_v27  ;;  %v3671_v22 = vmul.f32 %v3606_v51, %v2726_v20  ;;  %v3684_v51 = vsel %vm455_vm1, %v3668_v62, 0.0  ;;  %v2734_v20 = vld [vmem:[%s6611_s16 + $0x58] sm:$0xff] }
0x166d   : > { %v3694_v21 = vsel %vm455_vm1, %v3671_v22, 0.0 }
0x166e   : > { %v2546_v63 = vpop.permute.xlu0 %2545  ;;  %v3611_v59 = vpop.permute.xlu1 %3610  ;;  %v3695_v14 = vadd.f32 %v3694_v21, %v3693_v9 }
0x166f   : > { %2548 = vst.msk [vmem:[#allocation7] sm:$0xff] %vm488_vm2, %v2546_v63  ;;  %v3672_v24 = vmul.f32 %v3611_v59, %v2727_v58  ;;  %v3720_v59 = vsel %vm455_vm1, %v3676_v53, 0.0 }
0x1670   : > { %v3696_v11 = vrot.slane %v3695_v14, 4 }
0x1671   : > { %v3702_v6 = vsel %vm455_vm1, %v3672_v24, 0.0 }
0x1672   : > { %v3616_v7 = vpop.permute.xlu1 %3615  ;;  %v3697_v3 = vadd.f32 %v3696_v11, %v3695_v14  ;;  %v2737_v14 = vld [vmem:[%s6611_s16 + $0x70] sm:$0xff] }
0x1673   : > { %v3673_v25 = vmul.f32 %v3616_v7, %v2728_v2  ;;  %v3686_v7 = vadd.f32 %v3685_v54, %v3684_v51 }
0x1674   : > { %v3698_v54 = vrot.slane %v3697_v3, 2 }
0x1675   : > { %v3703_v16 = vsel %vm455_vm1, %v3673_v25, 0.0  ;;  %v3687_v58 = vrot.slane %v3686_v7, 4 }
0x1676   : > { %v3621_v61 = vpop.permute.xlu1 %3620  ;;  %v3704_v63 = vadd.f32 %v3703_v16, %v3702_v6  ;;  %v2738_v16 = vld [vmem:[%s6611_s16 + $0x78] sm:$0xff] }
0x1677   : > { %v3674_v57 = vmul.f32 %v3621_v61, %v2729_v10  ;;  %v3683_v51 = vmul.f32 %v6449_v55, %v2738_v16 }
0x1679   : > { %v3711_v56 = vsel %vm455_vm1, %v3674_v57, 0.0  ;;  %v2736_v57 = vld [vmem:[%s6611_s16 + $0x68] sm:$0xff] }
0x167a   : > { %v3626_v60 = vpop.permute.xlu1 %3625 }
0x167b   : > { %v3675_v5 = vmul.f32 %v3626_v60, %v2730_v19  ;;  %v3705_v60 = vrot.slane %v3704_v63, 4 }
0x167d   : > { %v3712_v18 = vsel %vm455_vm1, %v3675_v5, 0.0  ;;  %v3706_v24 = vadd.f32 %v3705_v60, %v3704_v63 }
0x167e   : > { %v3636_v0 = vpop.permute.xlu1 %3635  ;;  %v3713_v61 = vadd.f32 %v3712_v18, %v3711_v56 }
0x167f   : > { %v3677_v52 = vmul.f32 %v3636_v0, %v2732_v13  ;;  %v3688_v0 = vadd.f32 %v3687_v58, %v3686_v7  ;;  %v3707_v6 = vrot.slane %v3706_v24, 2  ;;  %v3699_v7 = vadd.f32 %v3698_v54, %v3697_v3 }
0x1680   : > { %v3714_v12 = vrot.slane %v3713_v61, 4  ;;  %v3748_v58 = vsel %vm455_vm1, %v3683_v51, 0.0 }
0x1681   : > { %v3721_v4 = vsel %vm455_vm1, %v3677_v52, 0.0  ;;  %v3700_v55 = vrot.slane %v3699_v7, 1 }
0x1682   : > { %v3641_v27 = vpop.permute.xlu1 %3640  ;;  %v3722_v2 = vadd.f32 %v3721_v4, %v3720_v59  ;;  %v3715_v62 = vadd.f32 %v3714_v12, %v3713_v61 }
0x1683   : > { %v3678_v8 = vmul.f32 %v3641_v27, %v2733_v30  ;;  %v3689_v30 = vrot.slane %v3688_v0, 2 }
0x1684   : > { %v3723_v25 = vrot.slane %v3722_v2, 4  ;;  %v3716_v27 = vrot.slane %v3715_v62, 2 }
0x1685   : > { %v3729_v10 = vsel %vm455_vm1, %v3678_v8, 0.0  ;;  %v3708_v8 = vadd.f32 %v3707_v6, %v3706_v24  ;;  %v3701_v24 = vadd.f32 %v3700_v55, %v3699_v7 }
0x1686   : > { %v3646_v19 = vpop.permute.xlu1 %3645  ;;  %v3724_v52 = vadd.f32 %v3723_v25, %v3722_v2  ;;  %v3717_v60 = vadd.f32 %v3716_v27, %v3715_v62 }
0x1687   : > { %v3679_v22 = vmul.f32 %v3646_v19, %v2734_v20  ;;  %v3690_v19 = vadd.f32 %v3689_v30, %v3688_v0 }
0x1688   : > { %v3725_v56 = vrot.slane %v3724_v52, 2  ;;  %v3718_v3 = vrot.slane %v3717_v60, 1 }
0x1689   : > { %v3730_v13 = vsel %vm455_vm1, %v3679_v22, 0.0 }
0x168a   : > { %v3731_v1 = vadd.f32 %v3730_v13, %v3729_v10  ;;  %v3651_v5 = vpop.permute.xlu1 %3650  ;;  %v3726_v12 = vadd.f32 %v3725_v56, %v3724_v52  ;;  %v3719_v6 = vadd.f32 %v3718_v3, %v3717_v60  ;;  %v3932_v60 = vld [vmem:[#allocation42 + $0x8] sm:$0xff] }
0x168b   : > { %v3680_v53 = vmul.f32 %v3651_v5, %v2735_v15  ;;  %v3709_v15 = vrot.slane %v3708_v8, 1  ;;  %v3691_v5 = vrot.slane %v3690_v19, 1  ;;  %v4011_v3 = vld [vmem:[%s4010_s25] sm:$0xff] }
0x168c   : > { %v3732_v21 = vrot.slane %v3731_v1, 4 }
0x168d   : > { %v3738_v63 = vsel %vm455_vm1, %v3680_v53, 0.0  ;;  %v3727_v53 = vrot.slane %v3726_v12, 1  ;;  %v3710_v54 = vadd.f32 %v3709_v15, %v3708_v8 }
0x168e   : > { %v3733_v9 = vadd.f32 %v3732_v21, %v3731_v1  ;;  %v3656_v18 = vpop.permute.xlu1 %3655 }
0x168f   : > { %v3681_v4 = vmul.f32 %v3656_v18, %v2736_v57  ;;  %v3692_v18 = vadd.f32 %v3691_v5, %v3690_v19  ;;  %v3728_v30 = vadd.f32 %v3727_v53, %v3726_v12  ;;  %v3933_v19 = vld [vmem:[#allocation42 + $0x10] sm:$0xff]  ;;  %v6613_v12 = vld [vmem:[#allocation86_spill] sm:$0xff] }
0x1690   : > { %v3734_v61 = vrot.slane %v3733_v9, 2 }
0x1691   : > { %v3739_v59 = vsel %vm455_vm1, %v3681_v4, 0.0 }
0x1692   : > { %v3740_v20 = vadd.f32 %v3739_v59, %v3738_v63  ;;  %v3661_v2 = vpop.permute.xlu1 %3660  ;;  %v3735_v10 = vadd.f32 %v3734_v61, %v3733_v9 }
0x1693   : > { %v3682_v11 = vmul.f32 %v3661_v2, %v2737_v14  ;;  %v3764_v14 = vsel %vm1103_vm5, %v3701_v24, %v3692_v18 }
0x1694   : > { %v3741_v22 = vrot.slane %v3740_v20, 4  ;;  %v3736_v16 = vrot.slane %v3735_v10, 1  ;;  %v3765_v56 = vsel %vm1105_vm6, %v3710_v54, %v3764_v14 }
0x1695   : > { %v3747_v25 = vsel %vm455_vm1, %v3682_v11, 0.0  ;;  %v3766_v59 = vsel %vm1107_vm7, %v3719_v6, %v3765_v56  ;;  %v3934_v11 = vld [vmem:[#allocation42 + $0x18] sm:$0xff] }
0x1696   : > { %v3742_v13 = vadd.f32 %v3741_v22, %v3740_v20  ;;  %v3749_v1 = vadd.f32 %v3748_v58, %v3747_v25  ;;  %v3737_v9 = vadd.f32 %v3736_v16, %v3735_v10  ;;  %v3767_v7 = vsel %vm1109_vm8, %v3728_v30, %v3766_v59  ;;  %v3931_v22 = vld [vmem:[#allocation42] sm:$0xff]  ;;  %v6614_v10 = vld [vmem:[#allocation72_spill] sm:$0xff] }
0x1698   : > { %v3743_v21 = vrot.slane %v3742_v13, 2  ;;  %v3750_v57 = vrot.slane %v3749_v1, 4  ;;  %v3768_v20 = vsel %vm1111_vm9, %v3737_v9, %v3767_v7 }
0x169a   : > { %v3744_v0 = vadd.f32 %v3743_v21, %v3742_v13  ;;  %v3751_v62 = vadd.f32 %v3750_v57, %v3749_v1  ;;  %v6615_v21 = vld [vmem:[#allocation73_spill] sm:$0xff] }
0x169c   : > { %v3745_v52 = vrot.slane %v3744_v0, 1  ;;  %v3752_v4 = vrot.slane %v3751_v62, 2 }
0x169e   : > { %v3753_v27 = vadd.f32 %v3752_v4, %v3751_v62  ;;  %v3746_v51 = vadd.f32 %v3745_v52, %v3744_v0 }
0x16a0   : > { %v3754_v63 = vrot.slane %v3753_v27, 1  ;;  %v3769_v2 = vsel %vm1113_vm10, %v3746_v51, %v3768_v20 }
0x16a2   : > { %v3755_v61 = vadd.f32 %v3754_v63, %v3753_v27 }
0x16a4   : > { %v3770_v8 = vsel %vm1115_vm11, %v3755_v61, %v3769_v2 }
0x16a5   : > { %3772 = vst.msk [vmem:[#allocation8] sm:$0xff] %vm455_vm1, %v3770_v8  ;;  %4351 = vmatmul.mubr.msk.f32.vlgmr.msra.gmra.mxu0 %vm455_vm1, %v3770_v8 }
0x16a6   : > { %4380 = vmatprep.mubr.msk.f32.mxu0 %vm5097_vm13, %v6610_v17  ;;  %4373 = vmatpush3.msra.mxu0 %v3934_v11 }
0x16a7   : > { %4374 = vmatprep.subr.mxu0 %v6610_v17 }
0x16a8   : > { %4375 = vmatpush3.msra.mxu0 %v3933_v19 }
0x16a9   : > { %4376 = vmatprep.subr.mxu0 %v6610_v17 }
0x16aa   : > { %4377 = vmatpush3.msra.mxu0 %v3932_v60 }
0x16ab   : > { %4378 = vmatprep.subr.mxu0 %v6610_v17 }
0x16ac   : > { %4379 = vmatpush3.msra.mxu0 %v3931_v22 }
0x1765   : > { %v3853_v58 = vpop.f32.mrf.mxu0 }
0x1766   : > { %v3924_v25 = vadd.f32 %v6613_v12, %v3853_v58 }
0x1767   : > { %v4352_v55 = vpop.f32.mrf.mxu0 }
0x1768   : > { %v3927_v13 = vadd.f32 %v6614_v10, %v3924_v25 }
0x176a   : > { %vm3928_vm0 = vcmp.ge.f32.partialorder %v3927_v13, 0.0  ;;  %v3929_v1 = vmul.f32 0.01, %v3927_v13 }
0x176c   : > { %v3930_v15 = vsel %vm3928_vm0, %v3927_v13, %v3929_v1 }
0x176d   : > { %4381 = vmatmul.mubr.msk.f32.vlgmr.msra.gmra.mxu0 %vm455_vm1, %v3930_v15 }
0x182d   : > { %v4004_v5 = vpop.f32.mrf.mxu0 }
0x182e   : > { %v4005_v57 = vadd.f32 %v6615_v21, %v4004_v5 }
0x182f   : > { %v4382_v53 = vpop.f32.mrf.mxu0 }
0x1830   : > { %4009 = vst [vmem:[%s4008_s22] sm:$0xff] %v4005_v57  ;;  %v4012_v17 = vadd.f32 %v4011_v3, %v4005_v57 }
0x1832   : > { %4013 = vmax.index.xlane.f32.xlu1 %v4012_v17 }
0x18b8   :  { %1845 = sbr.rel (!%p1843_p7) target bundleno = 2064 (0x810), region = 270 }
0x18bb   : > { %v4014_v24 = vpop.xlane.xlu1 %4013 }
0x18bc   : > { %4015 = vst.msk [vmem:[#allocation9] sm:$0xff] %vm1839_vm3, %v4014_v24 }
0x18bd   :  { %4994 = shalt.err (!%p4991_p12)
}
0x18be   :  { %4027 = dma.vmem_to_hbm [thread:$0]  %s4022_s10, 1024, %s5266_s14, [#allocation12], %s5067_s0, %s5067_s0, %s5068_s28  }
0x18bf   :  { %5029 = dma.done.wait [#allocation12], 1024  }
0x18c0   :  { %5030 = vsyncadd [#allocation12], 4294966272 }
0x18c1   :  { %4031 = vsyncpa [#allocation11], 1 }
0x18c2   :  { %4032 = vsyncpa [#allocation14], 1 }
0x18c3   :  { %4033 = vsyncpa [#allocation17], 1 }
0x18c4   :  { %4034 = vsyncpa [#allocation20], 1 }
0x18c5   :  { %4035 = vsyncpa [#allocation23], 1 }
0x18c6   :  { %4036 = vsyncpa [#allocation26], 1 }
0x18c7   :  { %4037 = vsyncpa [#allocation29], 1 }
0x18c8   :  { %4038 = vsyncpa [#allocation32], 1 }
0x18c9   :  { %4039 = vsyncpa [#allocation35], 1 }
0x18ca   :  { %4040 = vsyncpa [#allocation38], 1 }
0x18cb   :  { %4041 = vsyncpa [#allocation41], 1 }
0x18cc   :  { %4042 = vsyncpa [#allocation12], 1 }

</bundles_post_ra>
